<compile_context>
chip_gen: v7x
topology: tpu7x:2x2x1
jax: 0.10.0
libtpu: 0.0.40
codegen_flags: <defaults>
</compile_context>

<pallas_src>
import math

import jax
import jax.numpy as jnp
from jax import lax
from jax.experimental import pallas as pl
from jax.experimental.pallas import tpu as pltpu

_INV_SQRT2 = 1.0 / math.sqrt(2.0)


def _gelu(x):
    # exact (erf-based) GELU -- matches torch.nn.GELU() default; f32 math
    # (kept f32 on purpose: v5e has no bf16 VPU/EUP and torch uses exact erf).
    return 0.5 * x * (1.0 + lax.erf(x * _INV_SQRT2))


def _conv3x3_s1_gelu(h, w_ref, b_ref):
    """Stride-1 3x3 valid conv + bias + GELU, batch folded into M.

    h:     (NB, Hi, Wi, IC) bf16 activations (kernel-local value)
    w_ref: (3, 3, IC, OC)   bf16 weights (HWIO)
    b_ref: (1, OC)          f32 bias
    returns (NB, Ho, Wo, OC) bf16
    """
    NB, Hi, Wi, IC = h.shape
    Ho, Wo = Hi - 2, Wi - 2
    OC = w_ref.shape[-1]

    acc = b_ref[...].astype(jnp.float32)                 # bias-initialized acc
    for kh in range(3):
        # One shared LHS per kh (leading-dim merge only => free reshape).
        lhs = h[:, kh:kh + Ho, :, :].reshape(NB * Ho, Wi, IC)
        for kw in range(3):
            # Per-tap K=IC matmul; f32 MXU accumulation.
            y = lax.dot_general(
                lhs, w_ref[kh, kw],
                dimension_numbers=(((2,), (0,)), ((), ())),
                preferred_element_type=jnp.float32)       # (NB*Ho, Wi, OC)
            acc = acc + y[:, kw:kw + Wo, :]               # sublane shift + add
    # GELU in f32, then cast activations to bf16 so downstream tap slicing and
    # any spills move half the bytes.
    return _gelu(acc).astype(jnp.bfloat16).reshape(NB, Ho, Wo, OC)


def _encoder_fused_kernel(p1_ref, w1_ref, b1_ref, w2_ref, b2_ref,
                          w3_ref, b3_ref, w4_ref, b4_ref, o_ref):
    NB, OH1, OW1, K1 = p1_ref.shape
    OC = w1_ref.shape[-1]

    # ---- layer 1: stride-2 conv as a single im2col matmul (K = 9*C) ----
    p = p1_ref[...].reshape(NB * OH1, OW1, K1)            # leading merge (free)
    acc = b1_ref[...].astype(jnp.float32) + lax.dot_general(
        p, w1_ref[...],
        dimension_numbers=(((2,), (0,)), ((), ())),
        preferred_element_type=jnp.float32)               # (NB*OH1, OW1, OC)
    h = _gelu(acc).astype(jnp.bfloat16).reshape(NB, OH1, OW1, OC)

    # ---- layers 2-4: stride-1 3x3 convs, per-tap K=32 matmuls ----
    h = _conv3x3_s1_gelu(h, w2_ref, b2_ref)
    h = _conv3x3_s1_gelu(h, w3_ref, b3_ref)
    h = _conv3x3_s1_gelu(h, w4_ref, b4_ref)               # (NB, OH4, OW4, OC)

    # ---- lane/sublane-dense 2D store: one (NB, OH4*OW4*OC) tile ----
    OH4, OW4 = h.shape[1], h.shape[2]
    o_ref[0] = h.reshape(NB, OH4 * OW4 * OC).astype(o_ref.dtype)


def _im2col_stride2_3x3(x):
    """x: (N, H, W, C) -> (N, OH, OW, 9*C) patches, (kh, kw, c) minor order."""
    N, H, W, C = x.shape
    OH = (H - 3) // 2 + 1
    OW = (W - 3) // 2 + 1
    cols = []
    for kh in range(3):
        for kw in range(3):
            cols.append(lax.slice(
                x, (0, kh, kw, 0),
                (N, kh + 2 * (OH - 1) + 1, kw + 2 * (OW - 1) + 1, C),
                (1, 2, 2, 1)))
    return jnp.concatenate(cols, axis=-1)


def _pick_nb(n, cap=64):
    """Largest divisor of n with grid >= 2 (so v7x's 2nd TC is used), <= cap."""
    limit = min(max(n // 2, 1), cap)
    for nb in range(limit, 0, -1):
        if n % nb == 0:
            return nb
    return 1


def _replicated_spec(shape):
    zeros = (0,) * len(shape)
    return pl.BlockSpec(shape, lambda n: zeros)


def init_encoder_params(key, in_ch, hidden=32):
    """Deterministic params matching nn.Conv2d default (kaiming-uniform-ish)."""
    params = []
    chans = [(in_ch, hidden), (hidden, hidden), (hidden, hidden), (hidden, hidden)]
    for i, (ic, oc) in enumerate(chans):
        kw_key, kb_key = jax.random.split(jax.random.fold_in(key, i))
        fan_in = ic * 3 * 3
        bound = 1.0 / math.sqrt(fan_in)
        w = jax.random.uniform(kw_key, (3, 3, ic, oc), jnp.float32, -bound, bound)
        b = jax.random.uniform(kb_key, (oc,), jnp.float32, -bound, bound)
        params.append((w, b))
    return params


def encoder_forward(obs_nhwc, params):
    """obs_nhwc: (N, H, W, C) float32 in [0, 1].  Returns (N, repr_dim)."""
    (w1, b1), (w2, b2), (w3, b3), (w4, b4) = params
    N, H, W, C = obs_nhwc.shape
    OC = w1.shape[-1]
    OH1, OW1 = (H - 3) // 2 + 1, (W - 3) // 2 + 1
    OH4, OW4 = OH1 - 6, OW1 - 6
    assert OH4 >= 1 and OW4 >= 1, "input too small for 4 conv layers"
    F_OUT = OH4 * OW4 * OC

    # Param prep (tiny, fused by jit):
    #   fold `obs - 0.5` into the first bias: conv(x-0.5) = conv(x) - 0.5*sum(w)
    #   bf16 for MXU operands, f32 biases.
    b1_eff = (b1 - 0.5 * jnp.sum(w1, axis=(0, 1, 2))).reshape(1, OC)
    w1_m = w1.reshape(9 * C, OC).astype(jnp.bfloat16)
    w2_m = w2.astype(jnp.bfloat16)
    w3_m = w3.astype(jnp.bfloat16)
    w4_m = w4.astype(jnp.bfloat16)
    b2_m, b3_m, b4_m = (b.reshape(1, OC) for b in (b2, b3, b4))

    # Stride-2 im2col done once here: no strided slices inside the kernel and a
    # lane-denser (9*C) first-layer input; bf16 halves the DMA bytes.
    patches = _im2col_stride2_3x3(obs_nhwc).astype(jnp.bfloat16)

    # Batch blocking: fold NB images into the matmul M dim per grid step,
    # keeping grid >= 2 so the "parallel" axis can shard across v7x's two TCs.
    NB = _pick_nb(N)
    G = N // NB

    out3 = pl.pallas_call(
        _encoder_fused_kernel,
        out_shape=jax.ShapeDtypeStruct((G, NB, F_OUT), jnp.float32),
        grid=(G,),
        in_specs=[
            pl.BlockSpec((NB, OH1, OW1, 9 * C), lambda n: (n, 0, 0, 0)),
            _replicated_spec((9 * C, OC)),
            _replicated_spec((1, OC)),
            _replicated_spec((3, 3, OC, OC)),
            _replicated_spec((1, OC)),
            _replicated_spec((3, 3, OC, OC)),
            _replicated_spec((1, OC)),
            _replicated_spec((3, 3, OC, OC)),
            _replicated_spec((1, OC)),
        ],
        out_specs=pl.BlockSpec((1, NB, F_OUT), lambda n: (n, 0, 0)),
        compiler_params=pltpu.CompilerParams(
            dimension_semantics=("parallel",)),
    )(patches, w1_m, b1_eff, w2_m, b2_m, w3_m, b3_m, w4_m, b4_m)

    # Kernel emits NHWC-minor features.  PyTorch flattens NCHW -> (N, C*OH*OW);
    # at the test shape OH4 = OW4 = 1 so the transpose is a metadata reshape.
    out = out3.reshape(N, OH4, OW4, OC)
    return jnp.transpose(out, (0, 3, 1, 2)).reshape(N, -1)


def _reference_forward(obs_nhwc, params):
    """Pure-JAX f32 reference (lax.conv) for correctness checking."""
    x = obs_nhwc - 0.5
    strides = [2, 1, 1, 1]
    dn = lax.conv_dimension_numbers(x.shape, params[0][0].shape,
                                    ("NHWC", "HWIO", "NHWC"))
    for (w, b), s in zip(params, strides):
        x = lax.conv_general_dilated(x, w, (s, s), "VALID",
                                     dimension_numbers=dn)
        x = x + b
        x = 0.5 * x * (1.0 + lax.erf(x * _INV_SQRT2))
    N = x.shape[0]
    return jnp.transpose(x, (0, 3, 1, 2)).reshape(N, -1)


if __name__ == "__main__":
    key = jax.random.PRNGKey(0)
    # small obs_shape = (H, W, C) = (16, 16, 4); batch = 2
    N, H, W, C = 2, 16, 16, 4
    obs = jax.random.uniform(jax.random.fold_in(key, 123), (N, H, W, C),
                             jnp.float32)
    params = init_encoder_params(jax.random.fold_in(key, 7), in_ch=C, hidden=32)

    fwd = jax.jit(encoder_forward)
    out = jax.block_until_ready(fwd(obs, params))

    ref = _reference_forward(obs, params)
    assert out.shape == ref.shape, (out.shape, ref.shape)
    # bf16 matmul operands with f32 accumulation: comfortably within tolerance.
    assert jnp.allclose(out, ref, atol=5e-3, rtol=5e-2), "mismatch vs reference"

    print("KERNEL_OK")
</pallas_src>

<mosaic_0001>
module attributes {stable_mosaic.version = 11 : i64} {
  func.func @_encoder_fused_kernel(%arg0: i32, %arg1: memref<1x7x7x36xbf16, #tpu.memory_space<vmem>>, %arg2: memref<36x32xbf16, #tpu.memory_space<vmem>>, %arg3: memref<1x32xf32, #tpu.memory_space<vmem>>, %arg4: memref<3x3x32x32xbf16, #tpu.memory_space<vmem>>, %arg5: memref<1x32xf32, #tpu.memory_space<vmem>>, %arg6: memref<3x3x32x32xbf16, #tpu.memory_space<vmem>>, %arg7: memref<1x32xf32, #tpu.memory_space<vmem>>, %arg8: memref<3x3x32x32xbf16, #tpu.memory_space<vmem>>, %arg9: memref<1x32xf32, #tpu.memory_space<vmem>>, %arg10: memref<1x1x32xf32, #tpu.memory_space<vmem>>) attributes {dimension_semantics = [#tpu.dimension_semantics<parallel>], iteration_bounds = array<i64: 2>, scalar_prefetch = 0 : i64, scratch_operands = 0 : i64, tpu.core_type = #tpu.core_type<tc>, window_params = [{transform_indices = @transform_0, window_bounds = array<i64: 1, 7, 7, 36>}, {pipeline_mode = #tpu.pipeline_mode<synchronous>, transform_indices = @transform_1, window_bounds = array<i64: 36, 32>}, {pipeline_mode = #tpu.pipeline_mode<synchronous>, transform_indices = @transform_2, window_bounds = array<i64: 1, 32>}, {pipeline_mode = #tpu.pipeline_mode<synchronous>, transform_indices = @transform_3, window_bounds = array<i64: 3, 3, 32, 32>}, {pipeline_mode = #tpu.pipeline_mode<synchronous>, transform_indices = @transform_4, window_bounds = array<i64: 1, 32>}, {pipeline_mode = #tpu.pipeline_mode<synchronous>, transform_indices = @transform_5, window_bounds = array<i64: 3, 3, 32, 32>}, {pipeline_mode = #tpu.pipeline_mode<synchronous>, transform_indices = @transform_6, window_bounds = array<i64: 1, 32>}, {pipeline_mode = #tpu.pipeline_mode<synchronous>, transform_indices = @transform_7, window_bounds = array<i64: 3, 3, 32, 32>}, {pipeline_mode = #tpu.pipeline_mode<synchronous>, transform_indices = @transform_8, window_bounds = array<i64: 1, 32>}, {transform_indices = @transform_9, window_bounds = array<i64: 1, 1, 32>}]} {
    %c0 = arith.constant 0 : index
    %c0_0 = arith.constant 0 : index
    %c0_1 = arith.constant 0 : index
    %c0_2 = arith.constant 0 : index
    %0 = vector.load %arg1[%c0, %c0_0, %c0_1, %c0_2] : memref<1x7x7x36xbf16, #tpu.memory_space<vmem>>, vector<1x7x7x36xbf16>
    %1 = vector.shape_cast %0 : vector<1x7x7x36xbf16> to vector<7x7x36xbf16>
    %c0_3 = arith.constant 0 : index
    %c0_4 = arith.constant 0 : index
    %2 = vector.load %arg3[%c0_3, %c0_4] : memref<1x32xf32, #tpu.memory_space<vmem>>, vector<1x32xf32>
    %c0_5 = arith.constant 0 : index
    %c0_6 = arith.constant 0 : index
    %3 = vector.load %arg2[%c0_5, %c0_6] : memref<36x32xbf16, #tpu.memory_space<vmem>>, vector<36x32xbf16>
    %cst = arith.constant dense<0.000000e+00> : vector<7x7x32xf32>
    %4 = tpu.matmul %1, %3, %cst {dimension_numbers = #tpu.dot_dimension_numbers<[2], [0], [0, 1], [1], [0, 0, 0, 1, 1, 1], [], []>} : vector<7x7x36xbf16>, vector<36x32xbf16>, vector<7x7x32xf32> -> vector<7x7x32xf32>
    %5 = vector.shape_cast %2 : vector<1x32xf32> to vector<1x1x32xf32>
    %6 = vector.broadcast %5 : vector<1x1x32xf32> to vector<7x7x32xf32>
    %7 = arith.addf %6, %4 : vector<7x7x32xf32>
    %cst_7 = arith.constant 5.000000e-01 : f32
    %8 = vector.broadcast %cst_7 : f32 to vector<7x7x32xf32>
    %9 = arith.mulf %8, %7 : vector<7x7x32xf32>
    %cst_8 = arith.constant 0.707106769 : f32
    %10 = vector.broadcast %cst_8 : f32 to vector<7x7x32xf32>
    %11 = arith.mulf %7, %10 : vector<7x7x32xf32>
    %12 = math.erf %11 : vector<7x7x32xf32>
    %cst_9 = arith.constant 1.000000e+00 : f32
    %13 = vector.broadcast %cst_9 : f32 to vector<7x7x32xf32>
    %14 = arith.addf %13, %12 : vector<7x7x32xf32>
    %15 = arith.mulf %9, %14 : vector<7x7x32xf32>
    %16 = arith.truncf %15 : vector<7x7x32xf32> to vector<7x7x32xbf16>
    %17 = vector.shape_cast %16 : vector<7x7x32xbf16> to vector<1x7x7x32xbf16>
    %c0_10 = arith.constant 0 : index
    %c0_11 = arith.constant 0 : index
    %18 = vector.load %arg5[%c0_10, %c0_11] : memref<1x32xf32, #tpu.memory_space<vmem>>, vector<1x32xf32>
    %19 = vector.extract_strided_slice %17 {offsets = [0, 0, 0, 0], sizes = [1, 5, 7, 32], strides = [1, 1, 1, 1]} : vector<1x7x7x32xbf16> to vector<1x5x7x32xbf16>
    %20 = vector.shape_cast %19 : vector<1x5x7x32xbf16> to vector<5x7x32xbf16>
    %c0_12 = arith.constant 0 : index
    %c0_13 = arith.constant 0 : index
    %c0_14 = arith.constant 0 : index
    %c0_15 = arith.constant 0 : index
    %21 = vector.load %arg4[%c0_12, %c0_13, %c0_14, %c0_15] : memref<3x3x32x32xbf16, #tpu.memory_space<vmem>>, vector<1x1x32x32xbf16>
    %22 = vector.shape_cast %21 : vector<1x1x32x32xbf16> to vector<32x32xbf16>
    %cst_16 = arith.constant dense<0.000000e+00> : vector<5x7x32xf32>
    %23 = tpu.matmul %20, %22, %cst_16 {dimension_numbers = #tpu.dot_dimension_numbers<[2], [0], [0, 1], [1], [0, 0, 0, 1, 1, 1], [], []>} : vector<5x7x32xbf16>, vector<32x32xbf16>, vector<5x7x32xf32> -> vector<5x7x32xf32>
    %24 = vector.extract_strided_slice %23 {offsets = [0, 0, 0], sizes = [5, 5, 32], strides = [1, 1, 1]} : vector<5x7x32xf32> to vector<5x5x32xf32>
    %25 = vector.shape_cast %18 : vector<1x32xf32> to vector<1x1x32xf32>
    %26 = vector.broadcast %25 : vector<1x1x32xf32> to vector<5x5x32xf32>
    %27 = arith.addf %26, %24 : vector<5x5x32xf32>
    %c0_17 = arith.constant 0 : index
    %c1 = arith.constant 1 : index
    %c0_18 = arith.constant 0 : index
    %c0_19 = arith.constant 0 : index
    %28 = vector.load %arg4[%c0_17, %c1, %c0_18, %c0_19] : memref<3x3x32x32xbf16, #tpu.memory_space<vmem>>, vector<1x1x32x32xbf16>
    %29 = vector.shape_cast %28 : vector<1x1x32x32xbf16> to vector<32x32xbf16>
    %cst_20 = arith.constant dense<0.000000e+00> : vector<5x7x32xf32>
    %30 = tpu.matmul %20, %29, %cst_20 {dimension_numbers = #tpu.dot_dimension_numbers<[2], [0], [0, 1], [1], [0, 0, 0, 1, 1, 1], [], []>} : vector<5x7x32xbf16>, vector<32x32xbf16>, vector<5x7x32xf32> -> vector<5x7x32xf32>
    %31 = vector.extract_strided_slice %30 {offsets = [0, 1, 0], sizes = [5, 5, 32], strides = [1, 1, 1]} : vector<5x7x32xf32> to vector<5x5x32xf32>
    %32 = arith.addf %27, %31 : vector<5x5x32xf32>
    %c0_21 = arith.constant 0 : index
    %c2 = arith.constant 2 : index
    %c0_22 = arith.constant 0 : index
    %c0_23 = arith.constant 0 : index
    %33 = vector.load %arg4[%c0_21, %c2, %c0_22, %c0_23] : memref<3x3x32x32xbf16, #tpu.memory_space<vmem>>, vector<1x1x32x32xbf16>
    %34 = vector.shape_cast %33 : vector<1x1x32x32xbf16> to vector<32x32xbf16>
    %cst_24 = arith.constant dense<0.000000e+00> : vector<5x7x32xf32>
    %35 = tpu.matmul %20, %34, %cst_24 {dimension_numbers = #tpu.dot_dimension_numbers<[2], [0], [0, 1], [1], [0, 0, 0, 1, 1, 1], [], []>} : vector<5x7x32xbf16>, vector<32x32xbf16>, vector<5x7x32xf32> -> vector<5x7x32xf32>
    %36 = vector.extract_strided_slice %35 {offsets = [0, 2, 0], sizes = [5, 5, 32], strides = [1, 1, 1]} : vector<5x7x32xf32> to vector<5x5x32xf32>
    %37 = arith.addf %32, %36 : vector<5x5x32xf32>
    %38 = vector.extract_strided_slice %17 {offsets = [0, 1, 0, 0], sizes = [1, 5, 7, 32], strides = [1, 1, 1, 1]} : vector<1x7x7x32xbf16> to vector<1x5x7x32xbf16>
    %39 = vector.shape_cast %38 : vector<1x5x7x32xbf16> to vector<5x7x32xbf16>
    %c1_25 = arith.constant 1 : index
    %c0_26 = arith.constant 0 : index
    %c0_27 = arith.constant 0 : index
    %c0_28 = arith.constant 0 : index
    %40 = vector.load %arg4[%c1_25, %c0_26, %c0_27, %c0_28] : memref<3x3x32x32xbf16, #tpu.memory_space<vmem>>, vector<1x1x32x32xbf16>
    %41 = vector.shape_cast %40 : vector<1x1x32x32xbf16> to vector<32x32xbf16>
    %cst_29 = arith.constant dense<0.000000e+00> : vector<5x7x32xf32>
    %42 = tpu.matmul %39, %41, %cst_29 {dimension_numbers = #tpu.dot_dimension_numbers<[2], [0], [0, 1], [1], [0, 0, 0, 1, 1, 1], [], []>} : vector<5x7x32xbf16>, vector<32x32xbf16>, vector<5x7x32xf32> -> vector<5x7x32xf32>
    %43 = vector.extract_strided_slice %42 {offsets = [0, 0, 0], sizes = [5, 5, 32], strides = [1, 1, 1]} : vector<5x7x32xf32> to vector<5x5x32xf32>
    %44 = arith.addf %37, %43 : vector<5x5x32xf32>
    %c1_30 = arith.constant 1 : index
    %c1_31 = arith.constant 1 : index
    %c0_32 = arith.constant 0 : index
    %c0_33 = arith.constant 0 : index
    %45 = vector.load %arg4[%c1_30, %c1_31, %c0_32, %c0_33] : memref<3x3x32x32xbf16, #tpu.memory_space<vmem>>, vector<1x1x32x32xbf16>
    %46 = vector.shape_cast %45 : vector<1x1x32x32xbf16> to vector<32x32xbf16>
    %cst_34 = arith.constant dense<0.000000e+00> : vector<5x7x32xf32>
    %47 = tpu.matmul %39, %46, %cst_34 {dimension_numbers = #tpu.dot_dimension_numbers<[2], [0], [0, 1], [1], [0, 0, 0, 1, 1, 1], [], []>} : vector<5x7x32xbf16>, vector<32x32xbf16>, vector<5x7x32xf32> -> vector<5x7x32xf32>
    %48 = vector.extract_strided_slice %47 {offsets = [0, 1, 0], sizes = [5, 5, 32], strides = [1, 1, 1]} : vector<5x7x32xf32> to vector<5x5x32xf32>
    %49 = arith.addf %44, %48 : vector<5x5x32xf32>
    %c1_35 = arith.constant 1 : index
    %c2_36 = arith.constant 2 : index
    %c0_37 = arith.constant 0 : index
    %c0_38 = arith.constant 0 : index
    %50 = vector.load %arg4[%c1_35, %c2_36, %c0_37, %c0_38] : memref<3x3x32x32xbf16, #tpu.memory_space<vmem>>, vector<1x1x32x32xbf16>
    %51 = vector.shape_cast %50 : vector<1x1x32x32xbf16> to vector<32x32xbf16>
    %cst_39 = arith.constant dense<0.000000e+00> : vector<5x7x32xf32>
    %52 = tpu.matmul %39, %51, %cst_39 {dimension_numbers = #tpu.dot_dimension_numbers<[2], [0], [0, 1], [1], [0, 0, 0, 1, 1, 1], [], []>} : vector<5x7x32xbf16>, vector<32x32xbf16>, vector<5x7x32xf32> -> vector<5x7x32xf32>
    %53 = vector.extract_strided_slice %52 {offsets = [0, 2, 0], sizes = [5, 5, 32], strides = [1, 1, 1]} : vector<5x7x32xf32> to vector<5x5x32xf32>
    %54 = arith.addf %49, %53 : vector<5x5x32xf32>
    %55 = vector.extract_strided_slice %17 {offsets = [0, 2, 0, 0], sizes = [1, 5, 7, 32], strides = [1, 1, 1, 1]} : vector<1x7x7x32xbf16> to vector<1x5x7x32xbf16>
    %56 = vector.shape_cast %55 : vector<1x5x7x32xbf16> to vector<5x7x32xbf16>
    %c2_40 = arith.constant 2 : index
    %c0_41 = arith.constant 0 : index
    %c0_42 = arith.constant 0 : index
    %c0_43 = arith.constant 0 : index
    %57 = vector.load %arg4[%c2_40, %c0_41, %c0_42, %c0_43] : memref<3x3x32x32xbf16, #tpu.memory_space<vmem>>, vector<1x1x32x32xbf16>
    %58 = vector.shape_cast %57 : vector<1x1x32x32xbf16> to vector<32x32xbf16>
    %cst_44 = arith.constant dense<0.000000e+00> : vector<5x7x32xf32>
    %59 = tpu.matmul %56, %58, %cst_44 {dimension_numbers = #tpu.dot_dimension_numbers<[2], [0], [0, 1], [1], [0, 0, 0, 1, 1, 1], [], []>} : vector<5x7x32xbf16>, vector<32x32xbf16>, vector<5x7x32xf32> -> vector<5x7x32xf32>
    %60 = vector.extract_strided_slice %59 {offsets = [0, 0, 0], sizes = [5, 5, 32], strides = [1, 1, 1]} : vector<5x7x32xf32> to vector<5x5x32xf32>
    %61 = arith.addf %54, %60 : vector<5x5x32xf32>
    %c2_45 = arith.constant 2 : index
    %c1_46 = arith.constant 1 : index
    %c0_47 = arith.constant 0 : index
    %c0_48 = arith.constant 0 : index
    %62 = vector.load %arg4[%c2_45, %c1_46, %c0_47, %c0_48] : memref<3x3x32x32xbf16, #tpu.memory_space<vmem>>, vector<1x1x32x32xbf16>
    %63 = vector.shape_cast %62 : vector<1x1x32x32xbf16> to vector<32x32xbf16>
    %cst_49 = arith.constant dense<0.000000e+00> : vector<5x7x32xf32>
    %64 = tpu.matmul %56, %63, %cst_49 {dimension_numbers = #tpu.dot_dimension_numbers<[2], [0], [0, 1], [1], [0, 0, 0, 1, 1, 1], [], []>} : vector<5x7x32xbf16>, vector<32x32xbf16>, vector<5x7x32xf32> -> vector<5x7x32xf32>
    %65 = vector.extract_strided_slice %64 {offsets = [0, 1, 0], sizes = [5, 5, 32], strides = [1, 1, 1]} : vector<5x7x32xf32> to vector<5x5x32xf32>
    %66 = arith.addf %61, %65 : vector<5x5x32xf32>
    %c2_50 = arith.constant 2 : index
    %c2_51 = arith.constant 2 : index
    %c0_52 = arith.constant 0 : index
    %c0_53 = arith.constant 0 : index
    %67 = vector.load %arg4[%c2_50, %c2_51, %c0_52, %c0_53] : memref<3x3x32x32xbf16, #tpu.memory_space<vmem>>, vector<1x1x32x32xbf16>
    %68 = vector.shape_cast %67 : vector<1x1x32x32xbf16> to vector<32x32xbf16>
    %cst_54 = arith.constant dense<0.000000e+00> : vector<5x7x32xf32>
    %69 = tpu.matmul %56, %68, %cst_54 {dimension_numbers = #tpu.dot_dimension_numbers<[2], [0], [0, 1], [1], [0, 0, 0, 1, 1, 1], [], []>} : vector<5x7x32xbf16>, vector<32x32xbf16>, vector<5x7x32xf32> -> vector<5x7x32xf32>
    %70 = vector.extract_strided_slice %69 {offsets = [0, 2, 0], sizes = [5, 5, 32], strides = [1, 1, 1]} : vector<5x7x32xf32> to vector<5x5x32xf32>
    %71 = arith.addf %66, %70 : vector<5x5x32xf32>
    %cst_55 = arith.constant 5.000000e-01 : f32
    %72 = vector.broadcast %cst_55 : f32 to vector<5x5x32xf32>
    %73 = arith.mulf %72, %71 : vector<5x5x32xf32>
    %cst_56 = arith.constant 0.707106769 : f32
    %74 = vector.broadcast %cst_56 : f32 to vector<5x5x32xf32>
    %75 = arith.mulf %71, %74 : vector<5x5x32xf32>
    %76 = math.erf %75 : vector<5x5x32xf32>
    %cst_57 = arith.constant 1.000000e+00 : f32
    %77 = vector.broadcast %cst_57 : f32 to vector<5x5x32xf32>
    %78 = arith.addf %77, %76 : vector<5x5x32xf32>
    %79 = arith.mulf %73, %78 : vector<5x5x32xf32>
    %80 = arith.truncf %79 : vector<5x5x32xf32> to vector<5x5x32xbf16>
    %81 = vector.shape_cast %80 : vector<5x5x32xbf16> to vector<1x5x5x32xbf16>
    %c0_58 = arith.constant 0 : index
    %c0_59 = arith.constant 0 : index
    %82 = vector.load %arg7[%c0_58, %c0_59] : memref<1x32xf32, #tpu.memory_space<vmem>>, vector<1x32xf32>
    %83 = vector.extract_strided_slice %81 {offsets = [0, 0, 0, 0], sizes = [1, 3, 5, 32], strides = [1, 1, 1, 1]} : vector<1x5x5x32xbf16> to vector<1x3x5x32xbf16>
    %84 = vector.shape_cast %83 : vector<1x3x5x32xbf16> to vector<3x5x32xbf16>
    %c0_60 = arith.constant 0 : index
    %c0_61 = arith.constant 0 : index
    %c0_62 = arith.constant 0 : index
    %c0_63 = arith.constant 0 : index
    %85 = vector.load %arg6[%c0_60, %c0_61, %c0_62, %c0_63] : memref<3x3x32x32xbf16, #tpu.memory_space<vmem>>, vector<1x1x32x32xbf16>
    %86 = vector.shape_cast %85 : vector<1x1x32x32xbf16> to vector<32x32xbf16>
    %cst_64 = arith.constant dense<0.000000e+00> : vector<3x5x32xf32>
    %87 = tpu.matmul %84, %86, %cst_64 {dimension_numbers = #tpu.dot_dimension_numbers<[2], [0], [0, 1], [1], [0, 0, 0, 1, 1, 1], [], []>} : vector<3x5x32xbf16>, vector<32x32xbf16>, vector<3x5x32xf32> -> vector<3x5x32xf32>
    %88 = vector.extract_strided_slice %87 {offsets = [0, 0, 0], sizes = [3, 3, 32], strides = [1, 1, 1]} : vector<3x5x32xf32> to vector<3x3x32xf32>
    %89 = vector.shape_cast %82 : vector<1x32xf32> to vector<1x1x32xf32>
    %90 = vector.broadcast %89 : vector<1x1x32xf32> to vector<3x3x32xf32>
    %91 = arith.addf %90, %88 : vector<3x3x32xf32>
    %c0_65 = arith.constant 0 : index
    %c1_66 = arith.constant 1 : index
    %c0_67 = arith.constant 0 : index
    %c0_68 = arith.constant 0 : index
    %92 = vector.load %arg6[%c0_65, %c1_66, %c0_67, %c0_68] : memref<3x3x32x32xbf16, #tpu.memory_space<vmem>>, vector<1x1x32x32xbf16>
    %93 = vector.shape_cast %92 : vector<1x1x32x32xbf16> to vector<32x32xbf16>
    %cst_69 = arith.constant dense<0.000000e+00> : vector<3x5x32xf32>
    %94 = tpu.matmul %84, %93, %cst_69 {dimension_numbers = #tpu.dot_dimension_numbers<[2], [0], [0, 1], [1], [0, 0, 0, 1, 1, 1], [], []>} : vector<3x5x32xbf16>, vector<32x32xbf16>, vector<3x5x32xf32> -> vector<3x5x32xf32>
    %95 = vector.extract_strided_slice %94 {offsets = [0, 1, 0], sizes = [3, 3, 32], strides = [1, 1, 1]} : vector<3x5x32xf32> to vector<3x3x32xf32>
    %96 = arith.addf %91, %95 : vector<3x3x32xf32>
    %c0_70 = arith.constant 0 : index
    %c2_71 = arith.constant 2 : index
    %c0_72 = arith.constant 0 : index
    %c0_73 = arith.constant 0 : index
    %97 = vector.load %arg6[%c0_70, %c2_71, %c0_72, %c0_73] : memref<3x3x32x32xbf16, #tpu.memory_space<vmem>>, vector<1x1x32x32xbf16>
    %98 = vector.shape_cast %97 : vector<1x1x32x32xbf16> to vector<32x32xbf16>
    %cst_74 = arith.constant dense<0.000000e+00> : vector<3x5x32xf32>
    %99 = tpu.matmul %84, %98, %cst_74 {dimension_numbers = #tpu.dot_dimension_numbers<[2], [0], [0, 1], [1], [0, 0, 0, 1, 1, 1], [], []>} : vector<3x5x32xbf16>, vector<32x32xbf16>, vector<3x5x32xf32> -> vector<3x5x32xf32>
    %100 = vector.extract_strided_slice %99 {offsets = [0, 2, 0], sizes = [3, 3, 32], strides = [1, 1, 1]} : vector<3x5x32xf32> to vector<3x3x32xf32>
    %101 = arith.addf %96, %100 : vector<3x3x32xf32>
    %102 = vector.extract_strided_slice %81 {offsets = [0, 1, 0, 0], sizes = [1, 3, 5, 32], strides = [1, 1, 1, 1]} : vector<1x5x5x32xbf16> to vector<1x3x5x32xbf16>
    %103 = vector.shape_cast %102 : vector<1x3x5x32xbf16> to vector<3x5x32xbf16>
    %c1_75 = arith.constant 1 : index
    %c0_76 = arith.constant 0 : index
    %c0_77 = arith.constant 0 : index
    %c0_78 = arith.constant 0 : index
    %104 = vector.load %arg6[%c1_75, %c0_76, %c0_77, %c0_78] : memref<3x3x32x32xbf16, #tpu.memory_space<vmem>>, vector<1x1x32x32xbf16>
    %105 = vector.shape_cast %104 : vector<1x1x32x32xbf16> to vector<32x32xbf16>
    %cst_79 = arith.constant dense<0.000000e+00> : vector<3x5x32xf32>
    %106 = tpu.matmul %103, %105, %cst_79 {dimension_numbers = #tpu.dot_dimension_numbers<[2], [0], [0, 1], [1], [0, 0, 0, 1, 1, 1], [], []>} : vector<3x5x32xbf16>, vector<32x32xbf16>, vector<3x5x32xf32> -> vector<3x5x32xf32>
    %107 = vector.extract_strided_slice %106 {offsets = [0, 0, 0], sizes = [3, 3, 32], strides = [1, 1, 1]} : vector<3x5x32xf32> to vector<3x3x32xf32>
    %108 = arith.addf %101, %107 : vector<3x3x32xf32>
    %c1_80 = arith.constant 1 : index
    %c1_81 = arith.constant 1 : index
    %c0_82 = arith.constant 0 : index
    %c0_83 = arith.constant 0 : index
    %109 = vector.load %arg6[%c1_80, %c1_81, %c0_82, %c0_83] : memref<3x3x32x32xbf16, #tpu.memory_space<vmem>>, vector<1x1x32x32xbf16>
    %110 = vector.shape_cast %109 : vector<1x1x32x32xbf16> to vector<32x32xbf16>
    %cst_84 = arith.constant dense<0.000000e+00> : vector<3x5x32xf32>
    %111 = tpu.matmul %103, %110, %cst_84 {dimension_numbers = #tpu.dot_dimension_numbers<[2], [0], [0, 1], [1], [0, 0, 0, 1, 1, 1], [], []>} : vector<3x5x32xbf16>, vector<32x32xbf16>, vector<3x5x32xf32> -> vector<3x5x32xf32>
    %112 = vector.extract_strided_slice %111 {offsets = [0, 1, 0], sizes = [3, 3, 32], strides = [1, 1, 1]} : vector<3x5x32xf32> to vector<3x3x32xf32>
    %113 = arith.addf %108, %112 : vector<3x3x32xf32>
    %c1_85 = arith.constant 1 : index
    %c2_86 = arith.constant 2 : index
    %c0_87 = arith.constant 0 : index
    %c0_88 = arith.constant 0 : index
    %114 = vector.load %arg6[%c1_85, %c2_86, %c0_87, %c0_88] : memref<3x3x32x32xbf16, #tpu.memory_space<vmem>>, vector<1x1x32x32xbf16>
    %115 = vector.shape_cast %114 : vector<1x1x32x32xbf16> to vector<32x32xbf16>
    %cst_89 = arith.constant dense<0.000000e+00> : vector<3x5x32xf32>
    %116 = tpu.matmul %103, %115, %cst_89 {dimension_numbers = #tpu.dot_dimension_numbers<[2], [0], [0, 1], [1], [0, 0, 0, 1, 1, 1], [], []>} : vector<3x5x32xbf16>, vector<32x32xbf16>, vector<3x5x32xf32> -> vector<3x5x32xf32>
    %117 = vector.extract_strided_slice %116 {offsets = [0, 2, 0], sizes = [3, 3, 32], strides = [1, 1, 1]} : vector<3x5x32xf32> to vector<3x3x32xf32>
    %118 = arith.addf %113, %117 : vector<3x3x32xf32>
    %119 = vector.extract_strided_slice %81 {offsets = [0, 2, 0, 0], sizes = [1, 3, 5, 32], strides = [1, 1, 1, 1]} : vector<1x5x5x32xbf16> to vector<1x3x5x32xbf16>
    %120 = vector.shape_cast %119 : vector<1x3x5x32xbf16> to vector<3x5x32xbf16>
    %c2_90 = arith.constant 2 : index
    %c0_91 = arith.constant 0 : index
    %c0_92 = arith.constant 0 : index
    %c0_93 = arith.constant 0 : index
    %121 = vector.load %arg6[%c2_90, %c0_91, %c0_92, %c0_93] : memref<3x3x32x32xbf16, #tpu.memory_space<vmem>>, vector<1x1x32x32xbf16>
    %122 = vector.shape_cast %121 : vector<1x1x32x32xbf16> to vector<32x32xbf16>
    %cst_94 = arith.constant dense<0.000000e+00> : vector<3x5x32xf32>
    %123 = tpu.matmul %120, %122, %cst_94 {dimension_numbers = #tpu.dot_dimension_numbers<[2], [0], [0, 1], [1], [0, 0, 0, 1, 1, 1], [], []>} : vector<3x5x32xbf16>, vector<32x32xbf16>, vector<3x5x32xf32> -> vector<3x5x32xf32>
    %124 = vector.extract_strided_slice %123 {offsets = [0, 0, 0], sizes = [3, 3, 32], strides = [1, 1, 1]} : vector<3x5x32xf32> to vector<3x3x32xf32>
    %125 = arith.addf %118, %124 : vector<3x3x32xf32>
    %c2_95 = arith.constant 2 : index
    %c1_96 = arith.constant 1 : index
    %c0_97 = arith.constant 0 : index
    %c0_98 = arith.constant 0 : index
    %126 = vector.load %arg6[%c2_95, %c1_96, %c0_97, %c0_98] : memref<3x3x32x32xbf16, #tpu.memory_space<vmem>>, vector<1x1x32x32xbf16>
    %127 = vector.shape_cast %126 : vector<1x1x32x32xbf16> to vector<32x32xbf16>
    %cst_99 = arith.constant dense<0.000000e+00> : vector<3x5x32xf32>
    %128 = tpu.matmul %120, %127, %cst_99 {dimension_numbers = #tpu.dot_dimension_numbers<[2], [0], [0, 1], [1], [0, 0, 0, 1, 1, 1], [], []>} : vector<3x5x32xbf16>, vector<32x32xbf16>, vector<3x5x32xf32> -> vector<3x5x32xf32>
    %129 = vector.extract_strided_slice %128 {offsets = [0, 1, 0], sizes = [3, 3, 32], strides = [1, 1, 1]} : vector<3x5x32xf32> to vector<3x3x32xf32>
    %130 = arith.addf %125, %129 : vector<3x3x32xf32>
    %c2_100 = arith.constant 2 : index
    %c2_101 = arith.constant 2 : index
    %c0_102 = arith.constant 0 : index
    %c0_103 = arith.constant 0 : index
    %131 = vector.load %arg6[%c2_100, %c2_101, %c0_102, %c0_103] : memref<3x3x32x32xbf16, #tpu.memory_space<vmem>>, vector<1x1x32x32xbf16>
    %132 = vector.shape_cast %131 : vector<1x1x32x32xbf16> to vector<32x32xbf16>
    %cst_104 = arith.constant dense<0.000000e+00> : vector<3x5x32xf32>
    %133 = tpu.matmul %120, %132, %cst_104 {dimension_numbers = #tpu.dot_dimension_numbers<[2], [0], [0, 1], [1], [0, 0, 0, 1, 1, 1], [], []>} : vector<3x5x32xbf16>, vector<32x32xbf16>, vector<3x5x32xf32> -> vector<3x5x32xf32>
    %134 = vector.extract_strided_slice %133 {offsets = [0, 2, 0], sizes = [3, 3, 32], strides = [1, 1, 1]} : vector<3x5x32xf32> to vector<3x3x32xf32>
    %135 = arith.addf %130, %134 : vector<3x3x32xf32>
    %cst_105 = arith.constant 5.000000e-01 : f32
    %136 = vector.broadcast %cst_105 : f32 to vector<3x3x32xf32>
    %137 = arith.mulf %136, %135 : vector<3x3x32xf32>
    %cst_106 = arith.constant 0.707106769 : f32
    %138 = vector.broadcast %cst_106 : f32 to vector<3x3x32xf32>
    %139 = arith.mulf %135, %138 : vector<3x3x32xf32>
    %140 = math.erf %139 : vector<3x3x32xf32>
    %cst_107 = arith.constant 1.000000e+00 : f32
    %141 = vector.broadcast %cst_107 : f32 to vector<3x3x32xf32>
    %142 = arith.addf %141, %140 : vector<3x3x32xf32>
    %143 = arith.mulf %137, %142 : vector<3x3x32xf32>
    %144 = arith.truncf %143 : vector<3x3x32xf32> to vector<3x3x32xbf16>
    %145 = vector.shape_cast %144 : vector<3x3x32xbf16> to vector<1x3x3x32xbf16>
    %c0_108 = arith.constant 0 : index
    %c0_109 = arith.constant 0 : index
    %146 = vector.load %arg9[%c0_108, %c0_109] : memref<1x32xf32, #tpu.memory_space<vmem>>, vector<1x32xf32>
    %147 = vector.extract_strided_slice %145 {offsets = [0, 0, 0, 0], sizes = [1, 1, 3, 32], strides = [1, 1, 1, 1]} : vector<1x3x3x32xbf16> to vector<1x1x3x32xbf16>
    %148 = vector.shape_cast %147 : vector<1x1x3x32xbf16> to vector<1x3x32xbf16>
    %c0_110 = arith.constant 0 : index
    %c0_111 = arith.constant 0 : index
    %c0_112 = arith.constant 0 : index
    %c0_113 = arith.constant 0 : index
    %149 = vector.load %arg8[%c0_110, %c0_111, %c0_112, %c0_113] : memref<3x3x32x32xbf16, #tpu.memory_space<vmem>>, vector<1x1x32x32xbf16>
    %150 = vector.shape_cast %149 : vector<1x1x32x32xbf16> to vector<32x32xbf16>
    %cst_114 = arith.constant dense<0.000000e+00> : vector<1x3x32xf32>
    %151 = tpu.matmul %148, %150, %cst_114 {dimension_numbers = #tpu.dot_dimension_numbers<[2], [0], [0, 1], [1], [0, 0, 0, 1, 1, 1], [], []>} : vector<1x3x32xbf16>, vector<32x32xbf16>, vector<1x3x32xf32> -> vector<1x3x32xf32>
    %152 = vector.extract_strided_slice %151 {offsets = [0, 0, 0], sizes = [1, 1, 32], strides = [1, 1, 1]} : vector<1x3x32xf32> to vector<1x1x32xf32>
    %153 = vector.shape_cast %146 : vector<1x32xf32> to vector<1x1x32xf32>
    %154 = arith.addf %153, %152 : vector<1x1x32xf32>
    %c0_115 = arith.constant 0 : index
    %c1_116 = arith.constant 1 : index
    %c0_117 = arith.constant 0 : index
    %c0_118 = arith.constant 0 : index
    %155 = vector.load %arg8[%c0_115, %c1_116, %c0_117, %c0_118] : memref<3x3x32x32xbf16, #tpu.memory_space<vmem>>, vector<1x1x32x32xbf16>
    %156 = vector.shape_cast %155 : vector<1x1x32x32xbf16> to vector<32x32xbf16>
    %cst_119 = arith.constant dense<0.000000e+00> : vector<1x3x32xf32>
    %157 = tpu.matmul %148, %156, %cst_119 {dimension_numbers = #tpu.dot_dimension_numbers<[2], [0], [0, 1], [1], [0, 0, 0, 1, 1, 1], [], []>} : vector<1x3x32xbf16>, vector<32x32xbf16>, vector<1x3x32xf32> -> vector<1x3x32xf32>
    %158 = vector.extract_strided_slice %157 {offsets = [0, 1, 0], sizes = [1, 1, 32], strides = [1, 1, 1]} : vector<1x3x32xf32> to vector<1x1x32xf32>
    %159 = arith.addf %154, %158 : vector<1x1x32xf32>
    %c0_120 = arith.constant 0 : index
    %c2_121 = arith.constant 2 : index
    %c0_122 = arith.constant 0 : index
    %c0_123 = arith.constant 0 : index
    %160 = vector.load %arg8[%c0_120, %c2_121, %c0_122, %c0_123] : memref<3x3x32x32xbf16, #tpu.memory_space<vmem>>, vector<1x1x32x32xbf16>
    %161 = vector.shape_cast %160 : vector<1x1x32x32xbf16> to vector<32x32xbf16>
    %cst_124 = arith.constant dense<0.000000e+00> : vector<1x3x32xf32>
    %162 = tpu.matmul %148, %161, %cst_124 {dimension_numbers = #tpu.dot_dimension_numbers<[2], [0], [0, 1], [1], [0, 0, 0, 1, 1, 1], [], []>} : vector<1x3x32xbf16>, vector<32x32xbf16>, vector<1x3x32xf32> -> vector<1x3x32xf32>
    %163 = vector.extract_strided_slice %162 {offsets = [0, 2, 0], sizes = [1, 1, 32], strides = [1, 1, 1]} : vector<1x3x32xf32> to vector<1x1x32xf32>
    %164 = arith.addf %159, %163 : vector<1x1x32xf32>
    %165 = vector.extract_strided_slice %145 {offsets = [0, 1, 0, 0], sizes = [1, 1, 3, 32], strides = [1, 1, 1, 1]} : vector<1x3x3x32xbf16> to vector<1x1x3x32xbf16>
    %166 = vector.shape_cast %165 : vector<1x1x3x32xbf16> to vector<1x3x32xbf16>
    %c1_125 = arith.constant 1 : index
    %c0_126 = arith.constant 0 : index
    %c0_127 = arith.constant 0 : index
    %c0_128 = arith.constant 0 : index
    %167 = vector.load %arg8[%c1_125, %c0_126, %c0_127, %c0_128] : memref<3x3x32x32xbf16, #tpu.memory_space<vmem>>, vector<1x1x32x32xbf16>
    %168 = vector.shape_cast %167 : vector<1x1x32x32xbf16> to vector<32x32xbf16>
    %cst_129 = arith.constant dense<0.000000e+00> : vector<1x3x32xf32>
    %169 = tpu.matmul %166, %168, %cst_129 {dimension_numbers = #tpu.dot_dimension_numbers<[2], [0], [0, 1], [1], [0, 0, 0, 1, 1, 1], [], []>} : vector<1x3x32xbf16>, vector<32x32xbf16>, vector<1x3x32xf32> -> vector<1x3x32xf32>
    %170 = vector.extract_strided_slice %169 {offsets = [0, 0, 0], sizes = [1, 1, 32], strides = [1, 1, 1]} : vector<1x3x32xf32> to vector<1x1x32xf32>
    %171 = arith.addf %164, %170 : vector<1x1x32xf32>
    %c1_130 = arith.constant 1 : index
    %c1_131 = arith.constant 1 : index
    %c0_132 = arith.constant 0 : index
    %c0_133 = arith.constant 0 : index
    %172 = vector.load %arg8[%c1_130, %c1_131, %c0_132, %c0_133] : memref<3x3x32x32xbf16, #tpu.memory_space<vmem>>, vector<1x1x32x32xbf16>
    %173 = vector.shape_cast %172 : vector<1x1x32x32xbf16> to vector<32x32xbf16>
    %cst_134 = arith.constant dense<0.000000e+00> : vector<1x3x32xf32>
    %174 = tpu.matmul %166, %173, %cst_134 {dimension_numbers = #tpu.dot_dimension_numbers<[2], [0], [0, 1], [1], [0, 0, 0, 1, 1, 1], [], []>} : vector<1x3x32xbf16>, vector<32x32xbf16>, vector<1x3x32xf32> -> vector<1x3x32xf32>
    %175 = vector.extract_strided_slice %174 {offsets = [0, 1, 0], sizes = [1, 1, 32], strides = [1, 1, 1]} : vector<1x3x32xf32> to vector<1x1x32xf32>
    %176 = arith.addf %171, %175 : vector<1x1x32xf32>
    %c1_135 = arith.constant 1 : index
    %c2_136 = arith.constant 2 : index
    %c0_137 = arith.constant 0 : index
    %c0_138 = arith.constant 0 : index
    %177 = vector.load %arg8[%c1_135, %c2_136, %c0_137, %c0_138] : memref<3x3x32x32xbf16, #tpu.memory_space<vmem>>, vector<1x1x32x32xbf16>
    %178 = vector.shape_cast %177 : vector<1x1x32x32xbf16> to vector<32x32xbf16>
    %cst_139 = arith.constant dense<0.000000e+00> : vector<1x3x32xf32>
    %179 = tpu.matmul %166, %178, %cst_139 {dimension_numbers = #tpu.dot_dimension_numbers<[2], [0], [0, 1], [1], [0, 0, 0, 1, 1, 1], [], []>} : vector<1x3x32xbf16>, vector<32x32xbf16>, vector<1x3x32xf32> -> vector<1x3x32xf32>
    %180 = vector.extract_strided_slice %179 {offsets = [0, 2, 0], sizes = [1, 1, 32], strides = [1, 1, 1]} : vector<1x3x32xf32> to vector<1x1x32xf32>
    %181 = arith.addf %176, %180 : vector<1x1x32xf32>
    %182 = vector.extract_strided_slice %145 {offsets = [0, 2, 0, 0], sizes = [1, 1, 3, 32], strides = [1, 1, 1, 1]} : vector<1x3x3x32xbf16> to vector<1x1x3x32xbf16>
    %183 = vector.shape_cast %182 : vector<1x1x3x32xbf16> to vector<1x3x32xbf16>
    %c2_140 = arith.constant 2 : index
    %c0_141 = arith.constant 0 : index
    %c0_142 = arith.constant 0 : index
    %c0_143 = arith.constant 0 : index
    %184 = vector.load %arg8[%c2_140, %c0_141, %c0_142, %c0_143] : memref<3x3x32x32xbf16, #tpu.memory_space<vmem>>, vector<1x1x32x32xbf16>
    %185 = vector.shape_cast %184 : vector<1x1x32x32xbf16> to vector<32x32xbf16>
    %cst_144 = arith.constant dense<0.000000e+00> : vector<1x3x32xf32>
    %186 = tpu.matmul %183, %185, %cst_144 {dimension_numbers = #tpu.dot_dimension_numbers<[2], [0], [0, 1], [1], [0, 0, 0, 1, 1, 1], [], []>} : vector<1x3x32xbf16>, vector<32x32xbf16>, vector<1x3x32xf32> -> vector<1x3x32xf32>
    %187 = vector.extract_strided_slice %186 {offsets = [0, 0, 0], sizes = [1, 1, 32], strides = [1, 1, 1]} : vector<1x3x32xf32> to vector<1x1x32xf32>
    %188 = arith.addf %181, %187 : vector<1x1x32xf32>
    %c2_145 = arith.constant 2 : index
    %c1_146 = arith.constant 1 : index
    %c0_147 = arith.constant 0 : index
    %c0_148 = arith.constant 0 : index
    %189 = vector.load %arg8[%c2_145, %c1_146, %c0_147, %c0_148] : memref<3x3x32x32xbf16, #tpu.memory_space<vmem>>, vector<1x1x32x32xbf16>
    %190 = vector.shape_cast %189 : vector<1x1x32x32xbf16> to vector<32x32xbf16>
    %cst_149 = arith.constant dense<0.000000e+00> : vector<1x3x32xf32>
    %191 = tpu.matmul %183, %190, %cst_149 {dimension_numbers = #tpu.dot_dimension_numbers<[2], [0], [0, 1], [1], [0, 0, 0, 1, 1, 1], [], []>} : vector<1x3x32xbf16>, vector<32x32xbf16>, vector<1x3x32xf32> -> vector<1x3x32xf32>
    %192 = vector.extract_strided_slice %191 {offsets = [0, 1, 0], sizes = [1, 1, 32], strides = [1, 1, 1]} : vector<1x3x32xf32> to vector<1x1x32xf32>
    %193 = arith.addf %188, %192 : vector<1x1x32xf32>
    %c2_150 = arith.constant 2 : index
    %c2_151 = arith.constant 2 : index
    %c0_152 = arith.constant 0 : index
    %c0_153 = arith.constant 0 : index
    %194 = vector.load %arg8[%c2_150, %c2_151, %c0_152, %c0_153] : memref<3x3x32x32xbf16, #tpu.memory_space<vmem>>, vector<1x1x32x32xbf16>
    %195 = vector.shape_cast %194 : vector<1x1x32x32xbf16> to vector<32x32xbf16>
    %cst_154 = arith.constant dense<0.000000e+00> : vector<1x3x32xf32>
    %196 = tpu.matmul %183, %195, %cst_154 {dimension_numbers = #tpu.dot_dimension_numbers<[2], [0], [0, 1], [1], [0, 0, 0, 1, 1, 1], [], []>} : vector<1x3x32xbf16>, vector<32x32xbf16>, vector<1x3x32xf32> -> vector<1x3x32xf32>
    %197 = vector.extract_strided_slice %196 {offsets = [0, 2, 0], sizes = [1, 1, 32], strides = [1, 1, 1]} : vector<1x3x32xf32> to vector<1x1x32xf32>
    %198 = arith.addf %193, %197 : vector<1x1x32xf32>
    %cst_155 = arith.constant 5.000000e-01 : f32
    %199 = vector.broadcast %cst_155 : f32 to vector<1x1x32xf32>
    %200 = arith.mulf %199, %198 : vector<1x1x32xf32>
    %cst_156 = arith.constant 0.707106769 : f32
    %201 = vector.broadcast %cst_156 : f32 to vector<1x1x32xf32>
    %202 = arith.mulf %198, %201 : vector<1x1x32xf32>
    %203 = math.erf %202 : vector<1x1x32xf32>
    %cst_157 = arith.constant 1.000000e+00 : f32
    %204 = vector.broadcast %cst_157 : f32 to vector<1x1x32xf32>
    %205 = arith.addf %204, %203 : vector<1x1x32xf32>
    %206 = arith.mulf %200, %205 : vector<1x1x32xf32>
    %207 = arith.truncf %206 : vector<1x1x32xf32> to vector<1x1x32xbf16>
    %208 = vector.shape_cast %207 : vector<1x1x32xbf16> to vector<1x1x1x32xbf16>
    %209 = vector.shape_cast %208 : vector<1x1x1x32xbf16> to vector<1x32xbf16>
    %210 = arith.extf %209 : vector<1x32xbf16> to vector<1x32xf32>
    %c0_158 = arith.constant 0 : index
    %c0_159 = arith.constant 0 : index
    %c0_160 = arith.constant 0 : index
    %211 = vector.load %arg10[%c0_158, %c0_159, %c0_160] : memref<1x1x32xf32, #tpu.memory_space<vmem>>, vector<1x1x32xf32>
    %212 = vector.shape_cast %211 : vector<1x1x32xf32> to vector<1x32xf32>
    %213 = vector.shape_cast %210 : vector<1x32xf32> to vector<1x1x32xf32>
    tpu.vector_store %arg10[%c0_158, %c0_159, %c0_160], %213 {strides = array<i32>} : memref<1x1x32xf32, #tpu.memory_space<vmem>>, vector<1x1x32xf32>,
    return
  }
  func.func @transform_0(%arg0: i32) -> (i32, i32, i32, i32) {
    %c0_i32 = arith.constant 0 : i32
    %c0_i32_0 = arith.constant 0 : i32
    %c0_i32_1 = arith.constant 0 : i32
    %c0_i32_2 = arith.constant 0 : i32
    return %arg0, %c0_i32, %c0_i32_0, %c0_i32_1 : i32, i32, i32, i32
  }
  func.func @transform_1(%arg0: i32) -> (i32, i32) {
    %c0_i32 = arith.constant 0 : i32
    %c0_i32_0 = arith.constant 0 : i32
    %c0_i32_1 = arith.constant 0 : i32
    return %c0_i32, %c0_i32_0 : i32, i32
  }
  func.func @transform_2(%arg0: i32) -> (i32, i32) {
    %c0_i32 = arith.constant 0 : i32
    %c0_i32_0 = arith.constant 0 : i32
    %c0_i32_1 = arith.constant 0 : i32
    return %c0_i32, %c0_i32_0 : i32, i32
  }
  func.func @transform_3(%arg0: i32) -> (i32, i32, i32, i32) {
    %c0_i32 = arith.constant 0 : i32
    %c0_i32_0 = arith.constant 0 : i32
    %c0_i32_1 = arith.constant 0 : i32
    %c0_i32_2 = arith.constant 0 : i32
    %c0_i32_3 = arith.constant 0 : i32
    return %c0_i32, %c0_i32_0, %c0_i32_1, %c0_i32_2 : i32, i32, i32, i32
  }
  func.func @transform_4(%arg0: i32) -> (i32, i32) {
    %c0_i32 = arith.constant 0 : i32
    %c0_i32_0 = arith.constant 0 : i32
    %c0_i32_1 = arith.constant 0 : i32
    return %c0_i32, %c0_i32_0 : i32, i32
  }
  func.func @transform_5(%arg0: i32) -> (i32, i32, i32, i32) {
    %c0_i32 = arith.constant 0 : i32
    %c0_i32_0 = arith.constant 0 : i32
    %c0_i32_1 = arith.constant 0 : i32
    %c0_i32_2 = arith.constant 0 : i32
    %c0_i32_3 = arith.constant 0 : i32
    return %c0_i32, %c0_i32_0, %c0_i32_1, %c0_i32_2 : i32, i32, i32, i32
  }
  func.func @transform_6(%arg0: i32) -> (i32, i32) {
    %c0_i32 = arith.constant 0 : i32
    %c0_i32_0 = arith.constant 0 : i32
    %c0_i32_1 = arith.constant 0 : i32
    return %c0_i32, %c0_i32_0 : i32, i32
  }
  func.func @transform_7(%arg0: i32) -> (i32, i32, i32, i32) {
    %c0_i32 = arith.constant 0 : i32
    %c0_i32_0 = arith.constant 0 : i32
    %c0_i32_1 = arith.constant 0 : i32
    %c0_i32_2 = arith.constant 0 : i32
    %c0_i32_3 = arith.constant 0 : i32
    return %c0_i32, %c0_i32_0, %c0_i32_1, %c0_i32_2 : i32, i32, i32, i32
  }
  func.func @transform_8(%arg0: i32) -> (i32, i32) {
    %c0_i32 = arith.constant 0 : i32
    %c0_i32_0 = arith.constant 0 : i32
    %c0_i32_1 = arith.constant 0 : i32
    return %c0_i32, %c0_i32_0 : i32, i32
  }
  func.func @transform_9(%arg0: i32) -> (i32, i32, i32) {
    %c0_i32 = arith.constant 0 : i32
    %c0_i32_0 = arith.constant 0 : i32
    %c0_i32_1 = arith.constant 0 : i32
    return %arg0, %c0_i32, %c0_i32_0 : i32, i32, i32
  }
}

</mosaic_0001>

<bundles_post_ra>
// kernel: encoder_forward.1
= control target key start
LH: loop header
LB: loop body
LE: loop exit
PB: predicated region body
PF: predicated region fallthrough
CT: control target
= control target key end

     0   :  { %14 = vsyncpa [#allocation3], 0  ;;  %s12678_s0 = inlined_call_operand.vmem [shape: bf16[2,7,7,36], index: 0, kind: input, shape index: {}]   ;;  %s12679_s1 = inlined_call_operand.vmem [shape: bf16[36,32], index: 1, kind: input, shape index: {}]   ;;  %s12680_s2 = inlined_call_operand.vmem [shape: f32[1,32], index: 2, kind: input, shape index: {}]   ;;  %s12681_s3 = inlined_call_operand.vmem [shape: bf16[3,3,32,32], index: 3, kind: input, shape index: {}]   ;;  %s12682_s4 = inlined_call_operand.vmem [shape: f32[1,32], index: 4, kind: input, shape index: {}]   ;;  %s12683_s5 = inlined_call_operand.vmem [shape: bf16[3,3,32,32], index: 5, kind: input, shape index: {}]   ;;  %s12684_s6 = inlined_call_operand.vmem [shape: f32[1,32], index: 6, kind: input, shape index: {}]   ;;  %s12685_s7 = inlined_call_operand.vmem [shape: bf16[3,3,32,32], index: 7, kind: input, shape index: {}]   ;;  %s12686_s8 = inlined_call_operand.vmem [shape: f32[1,32], index: 8, kind: input, shape index: {}]   ;;  %s12687_s9 = inlined_call_operand.hbm [shape: f32[2,1,32], index: 9, kind: output, shape index: {}]  }
   0x1   :  { %16 = vsyncpa [#allocation3 + $0x1], 0  ;;  %s10745_s30 = smov 0   ;;  %s10747_s10 = smov 0  }
   0x2   :  { %s10749_s11 = smov 0   ;;  %s10751_s12 = smov 0  }
   0x3 LB: > { %s10766_s13 = sadd.s32 4294967295, %s10689_s12   ;;  %s9786_s14 = sadd.s32 4294967294, %s10689_s12   ;;  %s10689_s12 = sphi %s10751_s12, %s12693_s12   ;;  %s10685_s11 = sphi %s10749_s11, %s12692_s11   ;;  %s10681_s10 = sphi %s10747_s10, %s12691_s10   ;;  %s10677_s30 = sphi %s10745_s30, %s12690_s30  }
   0x4   : > { %s10770_s15 = sadd.s32 1, %s10689_s12   ;;  %s223_s16 = sadd.s32 1, %s10685_s11 }
   0x5   : > { %s220_s17 = ssub.s32 %s10689_s12, %s10770_s15  ;;  %p233_p0 = scmp.ne.s32.totalorder %s10685_s11, %s10681_s10 }
   0x6   : > { %p221_p1 = scmp.eq.s32.totalorder %s220_s17, 0  ;;  %p234_p2 = scmp.eq.s32.totalorder %s10766_s13, 1 }
   0x7   : > { %p239_p3 = scmp.ne.s32.totalorder %s10681_s10, %s10677_s30  ;;  %p240_p4 = scmp.eq.s32.totalorder %s9786_s14, 1 }
   0x8   : > { %s10781_s18 = scalar_select %p221_p1, %s10685_s11, %s223_s16  }
   0x9   : > { %p10783_p5 = por %p234_p2, %p233_p0  ;;  %p10787_p6 = por %p240_p4, %p239_p3 }
   0xa   : > { %p9789_p7 = scmp.ge.s32.totalorder %s10689_s12, 1  ;;  %p290_p8 = scmp.lt.s32.totalorder %s10689_s12, 3 }
   0xc   : > { %p291_p9 = pnand %p9789_p7, %p290_p8 }
   0xd   : > { %v10538_v0 = vld [vmem:[%s12679_s1] sm:$0xff] (!%p291_p9)   ;;  %v362_v1 = vlaneseq (!%p291_p9)  ;;  %v10539_v2 = vld [vmem:[%s12679_s1 + $0x8] sm:$0xff] (!%p291_p9)   ;;  %p325_p10 = scmp.lt.s32.totalorder (!%p291_p9), %s10766_s13, 1  ;;  %v10540_v3 = vld [vmem:[%s12679_s1 + $0x10] ss:$0 sps:$4 sm:$0x33] (!%p291_p9)  }
   0xe   : > { %294 = sbr.rel (%p291_p9) target bundleno = 1410 (0x582), region = 56  ;;  %10192 = vmatprep.subr.bf16.mxu0 (!%p291_p9), %v10538_v0  ;;  %vm782_vm0 = vcmask (!%p291_p9), 1041408   ;;  %v10691_v4 = vmov (!%p291_p9), 1966171168   ;;  %vm769_vm1 = vcmask (!%p291_p9), 293888   ;;  %vm10693_vm2 = vmmov (!%p291_p9), 0  }
   0xf   : > { %10193 = vmatpush3.bf16.msra.mxu0 (!%p291_p9), %v10538_v0  ;;  %v360_v5 = vunpack.c.l.s4 (!%p291_p9), %v10691_v4  ;;  %v363_v6 = vshrl.u32 (!%p291_p9), %v362_v1, 7  ;;  %v784_v7 = vsel (!%p291_p9), %vm782_vm0, %v10540_v3, 0  ;;  %vm1871_vm3 = vcmask (!%p291_p9), 261120   ;;  %s10083_s29 = sshll.u32 (!%p291_p9), %s10766_s13, 4 }
  0x10   : > { %10194 = vmatprep.subr.bf16.mxu0 (!%p291_p9), %v10539_v2  ;;  %vm9716_vm4 = vcmask (!%p291_p9), 253952   ;;  %s12636_s22 = scalar_lea.hbm (!%p291_p9), %s12687_s9, %s10083_s29 }
  0x11   : > { %v361_v8 = vunpack.c.0.s8 (!%p291_p9), %v360_v5 }
  0x13   : > { %10195 = vmatpush3.bf16.msra.mxu0 (!%p291_p9), %v10539_v2  ;;  %v10810_v10 = vsub.s32 (!%p291_p9), %v361_v8, %v363_v6 }
  0x14   : > { %10494 = vmatprep.subr.msk.bf16.mxu0 (!%p291_p9), %vm782_vm0, %v10540_v3 }
  0x15   : > { %s326_s27 = scalar_select %p325_p10, %s10766_s13, 1 }
  0x16   : > { %s10694_s13 = smov [#allocation2]  }
  0x17   : > { %s10495_s28 = smul.u32 28, %s326_s27  ;;  %10197 = vmatpush3.bf16.msra.mxu0 %v784_v7  ;;  %s10631_s25 = sshll.u32 %s10694_s13, 4  ;;  %s10632_s25 = int_to_ptr.vmem [resolvable:$false] %s10631_s25 }
  0x18   : > { %s10633_s26 = scalar_lea.vmem %s10632_s25, 32 }
  0x19   : > { %s10807_s16 = scalar_lea.vmem %s12678_s0, %s10495_s28  ;;  %s323_s28 = sand.u32 1, %s10681_s10  }
  0x1a   : > { %v9791_v9 = vld.sshfl [vmem:[%s10807_s16] sm:$0x33 pattern:$0x75316420]  ;;  %s324_s14 = scalar_lea.vmem [#allocation2], %s323_s28  ;;  %s9719_s23 = scalar_lea.sflag [#allocation3], %s323_s28 }
  0x1b   : > { %v9792_v11 = vld.sshfl [vmem:[%s10807_s16 + $0x4] sm:$0x33 pattern:$0x75316420]  ;;  %v358_v12 = vcombine.high %v9791_v9, %v9791_v9  ;;  %v365_v14 = vrot.slane %v9791_v9, %v10810_v10 }
  0x1c   : > { %v9793_v13 = vld.sshfl [vmem:[%s10807_s16 + $0x8] sm:$0x33 pattern:$0x75316420]  ;;  %v382_v15 = vcombine.high %v9792_v11, %v9792_v11  ;;  %v389_v16 = vrot.slane %v9792_v11, %v10810_v10 }
  0x1d   : > { %v372_v17 = vrot.slane %v358_v12, %v10810_v10  ;;  %v406_v18 = vcombine.high %v9793_v13, %v9793_v13  ;;  %v413_v19 = vrot.slane %v9793_v13, %v10810_v10  ;;  %v373_v20 = vcombine.high %v365_v14, %v365_v14  ;;  %v9794_v24 = vld.sshfl [vmem:[%s10807_s16 + $0xc] sm:$0x33 pattern:$0x75316420] }
  0x1e   : > { %v396_v21 = vrot.slane %v382_v15, %v10810_v10  ;;  %v397_v22 = vcombine.high %v389_v16, %v389_v16  ;;  %v527_v23 = vunpack.i.h.s16 %v389_v16  ;;  %v9795_v29 = vld.sshfl [vmem:[%s10807_s16 + $0x10] sm:$0x33 pattern:$0x75316420]  ;;  %v430_v37 = vcombine.high %v9794_v24, %v9794_v24 }
  0x1f   : > { %v374_v25 = vcombine.high %v372_v17, %v372_v17  ;;  %v420_v26 = vrot.slane %v406_v18, %v10810_v10  ;;  %v421_v27 = vcombine.high %v413_v19, %v413_v19  ;;  %v593_v28 = vcombine.low %v365_v14, %v372_v17  ;;  %v9796_v54 = vld.sshfl [vmem:[%s10807_s16 + $0x14] sm:$0x33 pattern:$0x75316420] }
  0x20   : > { %v398_v30 = vcombine.high %v396_v21, %v396_v21  ;;  %v529_v31 = vunpack.i.h.s16 %v396_v21  ;;  %v531_v32 = vunpack.i.h.s16 %v397_v22  ;;  %v9799_v33 = vpack.i.b16 %v396_v21, %v527_v23  ;;  %v9797_v59 = vld.sshfl [vmem:[%s10807_s16 + $0x18] sm:$0x33 pattern:$0x75316420]  ;;  %s9731_s16 = sshll.u32 %s324_s14, 4  ;;  %s12638_s16 = int_to_ptr.vmem [resolvable:$true] %s9731_s16 }
  0x21   : > { %v422_v34 = vcombine.high %v420_v26, %v420_v26  ;;  %v9798_v35 = vpack.i.b16 %v389_v16, %v374_v25  ;;  %v603_v36 = vrot.slane %v593_v28, %v10810_v10  ;;  %v437_v40 = vrot.slane %v9794_v24, %v10810_v10  ;;  %s10627_s24 = scalar_lea.vmem %s12638_s16, 16  ;;  %p10634_p0 = scmp.lt.s32.totalorder %s12638_s16, %s10632_s25 }
  0x22   : > { %v9800_v38 = vpack.i.b16 %v397_v22, %v529_v31  ;;  %v9801_v39 = vpack.i.b16 %v398_v30, %v531_v32  ;;  %v454_v41 = vcombine.high %v9795_v29, %v9795_v29  ;;  %v444_v43 = vrot.slane %v430_v37, %v10810_v10  ;;  %p10628_p11 = scmp.ne.s32.totalorder %s12638_s16, %s10627_s24  ;;  %p10635_p1 = scmp.lt.s32.totalorder %s10633_s26, %s10627_s24 }
  0x23   : > { %v594_v42 = vcombine.low %v373_v20, %v9798_v35  ;;  %v461_v44 = vrot.slane %v9795_v29, %v10810_v10  ;;  %v642_v45 = vcombine.low %v420_v26, %v421_v27  ;;  %v445_v48 = vcombine.high %v437_v40, %v437_v40 }
  0x24   : > { %v595_v46 = vcombine.low %v9799_v33, %v9800_v38  ;;  %v596_v47 = vcombine.low %v9801_v39, %v413_v19  ;;  %v468_v49 = vrot.slane %v454_v41, %v10810_v10  ;;  %v446_v51 = vcombine.high %v444_v43, %v444_v43  ;;  %p10629_p12 = pnand %p10628_p11, %p10783_p5  ;;  %p10636_p2 = por %p10635_p1, %p10634_p0 }
  0x25   : > { %v610_v50 = vrot.slane %v594_v42, %v10810_v10  ;;  %v541_v52 = vunpack.i.h.s16 %v437_v40  ;;  %v543_v53 = vunpack.i.h.s16 %v444_v43  ;;  %v545_v57 = vunpack.i.h.s16 %v445_v48 }
  0x26   : > { %v617_v55 = vrot.slane %v595_v46, %v10810_v10  ;;  %v624_v56 = vrot.slane %v596_v47, %v10810_v10  ;;  %v9802_v58 = vpack.i.b16 %v437_v40, %v422_v34  ;;  %v645_v63 = vcombine.low %v461_v44, %v468_v49  ;;  %p10630_p13 = pneg %p10629_p12 }
  0x27   : > { %v625_v60 = vcombine.low %v603_v36, %v610_v50  ;;  %v9803_v61 = vpack.i.b16 %v444_v43, %v541_v52  ;;  %v9804_v62 = vpack.i.b16 %v445_v48, %v543_v53  ;;  %v9805_v1 = vpack.i.b16 %v446_v51, %v545_v57  ;;  %v10541_v52 = vld [vmem:[%s12681_s3] sm:$0xff]   ;;  %v10542_v53 = vld [vmem:[%s12681_s3 + $0x10] sm:$0xff]  }
  0x28   : > { %v626_v0 = vcombine.low %v617_v55, %v624_v56  ;;  %v652_v2 = vrot.slane %v642_v45, %v10810_v10  ;;  %v673_v5 = vrot.slane %v645_v63, %v10810_v10  ;;  %v469_v6 = vcombine.high %v461_v44, %v461_v44  ;;  %v10543_v55 = vld [vmem:[%s12681_s3 + $0x8] sm:$0xff]   ;;  %v10544_v56 = vld [vmem:[%s12681_s3 + $0x18] sm:$0xff]   ;;  %p10637_p3 = pnand %p10636_p2, %p10630_p13 }
  0x29   : > { %v633_v3 = vrot.slane %v625_v60, %v10810_v10  ;;  %v643_v4 = vcombine.low %v9802_v58, %v9803_v61  ;;  %v644_v8 = vcombine.low %v9804_v62, %v9805_v1  ;;  %v478_v9 = vcombine.high %v9796_v54, %v9796_v54 }
  0x2a   : > { %v640_v7 = vrot.slane %v626_v0, %v10810_v10  ;;  %v485_v11 = vrot.slane %v9796_v54, %v10810_v10  ;;  %v470_v13 = vcombine.high %v468_v49, %v468_v49  ;;  %v502_v14 = vcombine.high %v9797_v59, %v9797_v59 }
  0x2b   : > { %v659_v12 = vrot.slane %v643_v4, %v10810_v10  ;;  %v509_v15 = vrot.slane %v9797_v59, %v10810_v10  ;;  %v666_v17 = vrot.slane %v644_v8, %v10810_v10  ;;  %v492_v18 = vrot.slane %v478_v9, %v10810_v10 }
  0x2c   : > { %v641_v16 = vcombine.low %v633_v3, %v640_v7  ;;  %v493_v19 = vcombine.high %v485_v11, %v485_v11  ;;  %v516_v21 = vrot.slane %v502_v14, %v10810_v10  ;;  %v555_v23 = vunpack.i.h.s16 %v485_v11 }
  0x2d   : > { %v674_v20 = vcombine.low %v652_v2, %v659_v12  ;;  %v517_v22 = vcombine.high %v509_v15, %v509_v15  ;;  %v675_v24 = vcombine.low %v666_v17, %v673_v5  ;;  %v494_v25 = vcombine.high %v492_v18, %v492_v18 }
  0x2e   : > { %10198 = vmatprep.mubr.msk.bf16.mxu0 %vm769_vm1, %v641_v16  ;;  %v557_v26 = vunpack.i.h.s16 %v492_v18  ;;  %v559_v27 = vunpack.i.h.s16 %v493_v19  ;;  %v9806_v29 = vpack.i.b16 %v485_v11, %v470_v13  ;;  %v9807_v30 = vpack.i.b16 %v492_v18, %v555_v23 }
  0x2f   : > { %v682_v28 = vrot.slane %v674_v20, %v10810_v10  ;;  %v694_v31 = vcombine.low %v516_v21, %v517_v22  ;;  %v689_v32 = vrot.slane %v675_v24, %v10810_v10  ;;  %v518_v35 = vcombine.high %v516_v21, %v516_v21 }
  0x30   : > { %v9808_v33 = vpack.i.b16 %v493_v19, %v557_v26  ;;  %v9809_v34 = vpack.i.b16 %v494_v25, %v559_v27  ;;  %v691_v36 = vcombine.low %v469_v6, %v9806_v29  ;;  %v10692_v54 = vmov 0.0  }
  0x31   : > { %v722_v37 = vrot.slane %v694_v31, %v10810_v10  ;;  %v690_v38 = vcombine.low %v682_v28, %v689_v32  ;;  %v567_v41 = vunpack.i.l.s16 %v518_v35  ;;  %10206 = vmatprep.subr.bf16.mxu1 %v10692_v54  ;;  %10222 = vmatprep.subr.bf16.mxu0 %v10692_v54 }
  0x32   : > { %v692_v39 = vcombine.low %v9807_v30, %v9808_v33  ;;  %v693_v40 = vcombine.low %v9809_v34, %v509_v15  ;;  %v701_v42 = vrot.slane %v691_v36, %v10810_v10  ;;  %10207 = vmatpush3.bf16.msra.mxu1 %v10541_v52  ;;  %10210 = vmatprep.mubr.msk.bf16.mxu1 %vm10693_vm2, %v10692_v54 }
  0x33   : > { %10199 = vmatmul.mubr.msk.bf16.vlgmr.msra.gmra.mrb[0].mxu0 %vm769_vm1, %v690_v38  ;;  %v746_v45 = vrot.slane %v567_v41, %v10810_v10  ;;  %10208 = vmatprep.subr.bf16.mxu1 %v10692_v54 }
  0x34   : > { %v708_v43 = vrot.slane %v692_v39, %v10810_v10  ;;  %v715_v44 = vrot.slane %v693_v40, %v10810_v10  ;;  %10223 = vmatpush3.bf16.msra.mxu0 %v10542_v53 }
  0x35   : > { %v753_v50 = vrot.slane %v746_v45, %v10810_v10  ;;  %10224 = vmatprep.subr.bf16.mxu0 %v10692_v54 }
  0x36   : > { %v723_v46 = vcombine.low %v701_v42, %v708_v43  ;;  %v724_v47 = vcombine.low %v715_v44, %v722_v37  ;;  %10209 = vmatpush3.bf16.msra.mxu1 %v10543_v55 }
  0x37   : > { %10238 = vmatprep.subr.bf16.mxu1 %v10692_v54 }
  0x38   : > { %v731_v48 = vrot.slane %v723_v46, %v10810_v10  ;;  %v738_v49 = vrot.slane %v724_v47, %v10810_v10  ;;  %10225 = vmatpush3.bf16.msra.mxu0 %v10544_v56 }
  0x39   : > { %10254 = vmatprep.subr.bf16.mxu0 %v10692_v54 }
  0x3a   : > { %v739_v51 = vcombine.low %v731_v48, %v738_v49 }
  0x3c   : > { %10202 = vmatprep.mubr.msk.bf16.mxu0 %vm769_vm1, %v739_v51 }
  0x3d   : > { %10203 = vmatmul.mubr.msk.bf16.gmra.mrb[4].mxu0 %vm769_vm1, %v753_v50 }
  0x3e   : > { %10226 = vmatprep.mubr.msk.bf16.mxu0 %vm10693_vm2, %v10692_v54 }
 0x106   : > { %v10200_v57 = vpop.f32.mrb[0].mxu0 }
 0x107   : > { %v955_v58 = vcombine.high %v10200_v57, %v10200_v57  ;;  %v962_v59 = vrot.slane %v10200_v57, %v10810_v10  ;;  %v820_v60 = vpop.f32.mrb[1].mxu0 }
 0x108   : > { %v857_v61 = vcombine.high %v820_v60, %v820_v60  ;;  %v864_v62 = vrot.slane %v820_v60, %v10810_v10  ;;  %v10201_v63 = vpop.f32.mrb[2].mxu0  ;;  %v10925_v60 = vld [vmem:[%s12680_s2] ss:$0 sm:$0xff] }
 0x109   : > { %v969_v0 = vrot.slane %v955_v58, %v10810_v10  ;;  %v970_v1 = vcombine.high %v962_v59, %v962_v59  ;;  %v1004_v2 = vcombine.high %v10201_v63, %v10201_v63  ;;  %v10881_v3 = vpop.f32.mrb[3].mxu0  ;;  %v1011_v6 = vrot.slane %v10201_v63, %v10810_v10 }
 0x10a   : > { %v871_v4 = vrot.slane %v857_v61, %v10810_v10  ;;  %v872_v5 = vcombine.high %v864_v62, %v864_v62  ;;  %v978_v8 = vrot.slane %v962_v59, %v10810_v10  ;;  %v880_v13 = vrot.slane %v864_v62, %v10810_v10 }
 0x10b   : > { %v971_v7 = vcombine.high %v969_v0, %v969_v0  ;;  %v985_v9 = vrot.slane %v969_v0, %v10810_v10  ;;  %v992_v11 = vrot.slane %v970_v1, %v10810_v10  ;;  %v1018_v19 = vrot.slane %v1004_v2, %v10810_v10 }
 0x10c   : > { %v873_v12 = vcombine.high %v871_v4, %v871_v4  ;;  %v887_v14 = vrot.slane %v871_v4, %v10810_v10  ;;  %v894_v15 = vrot.slane %v872_v5, %v10810_v10  ;;  %v1019_v23 = vcombine.high %v1011_v6, %v1011_v6 }
 0x10d   : > { %v999_v16 = vrot.slane %v971_v7, %v10810_v10  ;;  %v1001_v17 = vcombine.high %v985_v9, %v985_v9  ;;  %v9820_v18 = vcombine.high %v978_v8, %v992_v11  ;;  %v1297_v25 = vrot.slane %v985_v9, %v10810_v10 }
 0x10e   : > { %v10894_v20 = vrot.slane %v873_v12, %v10810_v10  ;;  %v903_v21 = vcombine.high %v887_v14, %v887_v14  ;;  %v1171_v22 = vcombine.low %v880_v13, %v894_v15  ;;  %v9818_v26 = vcombine.high %v880_v13, %v894_v15 }
 0x10f   : > { %v1290_v24 = vrot.slane %v9820_v18, %v10810_v10  ;;  %v1315_v28 = vcombine.low %v999_v16, %v1001_v17  ;;  %v1003_v31 = vcombine.high %v999_v16, %v999_v16  ;;  %v1268_v33 = vcombine.low %v978_v8, %v992_v11 }
 0x110   : > { %v10898_v27 = vpop.f32.mrb[4].mxu0  ;;  %v1173_v29 = vcombine.low %v887_v14, %v10894_v20  ;;  %v1180_v30 = vrot.slane %v1171_v22, %v10810_v10  ;;  %v1187_v34 = vrot.slane %v9818_v26, %v10810_v10  ;;  %v1020_v35 = vcombine.high %v1018_v19, %v1018_v19 }
 0x111   : > { %v10902_v32 = vpop.f32.mrb[5].mxu0  ;;  %v1027_v36 = vrot.slane %v1011_v6, %v10810_v10  ;;  %v10906_v38 = vcombine.low %v1290_v24, %v1297_v25  ;;  %v1201_v40 = vrot.slane %v903_v21, %v10810_v10  ;;  %v1041_v41 = vrot.slane %v1019_v23, %v10810_v10 }
 0x112   : > { %v10205_v37 = vpop.f32.mrb[6].mxu0  ;;  %v1194_v39 = vrot.slane %v1173_v29, %v10810_v10  ;;  %v1202_v43 = vcombine.low %v1180_v30, %v1187_v34  ;;  %v1034_v44 = vrot.slane %v1018_v19, %v10810_v10  ;;  %v1048_v45 = vrot.slane %v1020_v35, %v10810_v10 }
 0x113   : > { %v10911_v42 = vpop.f32.mrb[7].mxu0  ;;  %v1049_v46 = vcombine.high %v1027_v36, %v1027_v36  ;;  %v1051_v48 = vcombine.high %v1041_v41, %v1041_v41  ;;  %v1316_v49 = vcombine.low %v1003_v31, %v1027_v36  ;;  %v1324_v50 = vrot.slane %v1315_v28, %v10810_v10 }
 0x114   : > { %v1203_v47 = vcombine.low %v1194_v39, %v1201_v40  ;;  %v1210_v51 = vrot.slane %v1202_v43, %v10810_v10  ;;  %v1363_v53 = vcombine.low %v1034_v44, %v1048_v45  ;;  %v9821_v55 = vcombine.high %v1034_v44, %v1048_v45 }
 0x115   : > { %v1317_v52 = vcombine.low %v1041_v41, %v1049_v46  ;;  %v1331_v57 = vrot.slane %v1316_v49, %v10810_v10  ;;  %v1345_v58 = vrot.slane %v1051_v48, %v10810_v10  ;;  %v906_v59 = vcombine.high %v10881_v3, %v10881_v3 }
 0x116   : > { %v1217_v56 = vrot.slane %v1203_v47, %v10810_v10  ;;  %v1372_v62 = vrot.slane %v1363_v53, %v10810_v10  ;;  %v1379_v63 = vrot.slane %v9821_v55, %v10810_v10  ;;  %v913_v0 = vrot.slane %v10881_v3, %v10810_v10 }
 0x117   : > { %v1338_v61 = vrot.slane %v1317_v52, %v10810_v10  ;;  %v1346_v2 = vcombine.low %v1324_v50, %v1331_v57  ;;  %v905_v4 = vcombine.high %v10894_v20, %v10894_v20  ;;  %v920_v5 = vrot.slane %v906_v59, %v10810_v10 }
 0x118   : > { %v1218_v1 = vcombine.low %v1210_v51, %v1217_v56  ;;  %v1283_v6 = vrot.slane %v1268_v33, %v10810_v10  ;;  %v921_v8 = vcombine.high %v913_v0, %v913_v0  ;;  %v929_v9 = vrot.slane %v913_v0, %v10810_v10 }
 0x119   : > { %v1347_v7 = vcombine.low %v1338_v61, %v1345_v58  ;;  %v1354_v12 = vrot.slane %v1346_v2, %v10810_v10  ;;  %v1394_v13 = vcombine.low %v1372_v62, %v1379_v63  ;;  %v922_v14 = vcombine.high %v920_v5, %v920_v5 }
 0x11a   : > { %v1514_v11 = vadd.f32 %v10925_v60, %v1218_v1  ;;  %v1313_v3 = vrot.slane %v10906_v38, %v10810_v10  ;;  %v943_v16 = vrot.slane %v921_v8, %v10810_v10  ;;  %v951_v17 = vcombine.high %v929_v9, %v929_v9 }
 0x11b   : > { %v1361_v15 = vrot.slane %v1347_v7, %v10810_v10  ;;  %v936_v19 = vrot.slane %v920_v5, %v10810_v10  ;;  %v950_v20 = vrot.slane %v922_v14, %v10810_v10  ;;  %v1219_v21 = vcombine.low %v905_v4, %v929_v9 }
 0x11c   : > { %v1528_v18 = vmul.f32 0.70710677, %v1514_v11  ;;  %v953_v23 = vcombine.high %v943_v16, %v943_v16  ;;  %v1220_v24 = vcombine.low %v943_v16, %v951_v17  ;;  %v1157_v25 = vrot.slane %v10898_v27, %v10810_v10 }
 0x11d   : > { %v1362_v22 = vcombine.low %v1354_v12, %v1361_v15  ;;  %v10948_v26 = vrot.slane %v1394_v13, %v10810_v10  ;;  %v1228_v28 = vrot.slane %v1219_v21, %v10810_v10  ;;  %v9819_v29 = vcombine.high %v936_v19, %v950_v20 }
 0x11e   : > { %10595 = verf.f32 %v1528_v18  ;;  %v1521_v30 = vmul.f32 0.5, %v1514_v11  ;;  %v1221_v33 = vcombine.low %v953_v23, %v936_v19  ;;  %v1235_v34 = vrot.slane %v1220_v24, %v10810_v10 }
 0x11f   : > { %v1517_v31 = vadd.f32 %v10925_v60, %v1362_v22  ;;  %v1249_v35 = vrot.slane %v950_v20, %v10810_v10  ;;  %v1276_v36 = vrot.slane %v9819_v29, %v10810_v10  ;;  %v1053_v27 = vcombine.high %v10902_v32, %v10902_v32 }
 0x120   : > { %v1060_v37 = vrot.slane %v10902_v32, %v10810_v10  ;;  %v1242_v39 = vrot.slane %v1221_v33, %v10810_v10  ;;  %v1250_v40 = vcombine.low %v1228_v28, %v1235_v34  ;;  %v1102_v41 = vcombine.high %v10911_v42, %v10911_v42 }
 0x121   : > { %v1531_v38 = vmul.f32 0.70710677, %v1517_v31  ;;  %v1298_v43 = vcombine.low %v1276_v36, %v1283_v6  ;;  %v1067_v44 = vrot.slane %v1053_v27, %v10810_v10  ;;  %v1109_v32 = vrot.slane %v10911_v42, %v10810_v10 }
 0x122   : > { %v1068_v45 = vcombine.high %v1060_v37, %v1060_v37  ;;  %v1076_v46 = vrot.slane %v1060_v37, %v10810_v10  ;;  %v1251_v47 = vcombine.low %v1242_v39, %v1249_v35  ;;  %v1258_v48 = vrot.slane %v1250_v40, %v10810_v10 }
 0x123   : > { %10597 = verf.f32 %v1531_v38  ;;  %v1306_v49 = vrot.slane %v1298_v43, %v10810_v10  ;;  %v1069_v50 = vcombine.high %v1067_v44, %v1067_v44  ;;  %v1083_v51 = vrot.slane %v1067_v44, %v10810_v10 }
 0x124   : > { %v1090_v52 = vrot.slane %v1068_v45, %v10810_v10  ;;  %v1265_v53 = vrot.slane %v1251_v47, %v10810_v10  ;;  %v1164_v55 = vrot.slane %v1157_v25, %v10810_v10  ;;  %v1098_v56 = vcombine.high %v1076_v46, %v1076_v46 }
 0x125   : > { %v1116_v57 = vrot.slane %v1102_v41, %v10810_v10  ;;  %v1314_v58 = vcombine.low %v1306_v49, %v1313_v3  ;;  %v1097_v59 = vrot.slane %v1069_v50, %v10810_v10  ;;  %v1099_v61 = vcombine.high %v1083_v51, %v1083_v51 }
 0x126   : > { %v1100_v62 = vcombine.high %v1090_v52, %v1090_v52  ;;  %v1266_v42 = vcombine.low %v1258_v48, %v1265_v53  ;;  %v1365_v63 = vcombine.low %v1076_v46, %v1090_v52  ;;  %v1393_v0 = vrot.slane %v1098_v56, %v10810_v10 }
 0x127   : > { %v1117_v1 = vcombine.high %v1109_v32, %v1109_v32  ;;  %v1516_v4 = vadd.f32 %v10925_v60, %v1314_v58  ;;  %v1412_v6 = vcombine.low %v1097_v59, %v1099_v61  ;;  %v1118_v7 = vcombine.high %v1116_v57, %v1116_v57 }
 0x128   : > { %v10596_v2 = vpop.eup %10595  ;;  %v1411_v5 = vcombine.low %v1100_v62, %v1083_v51  ;;  %v1515_v9 = vadd.f32 %v10925_v60, %v1266_v42  ;;  %v1386_v11 = vrot.slane %v1365_v63, %v10810_v10  ;;  %v1101_v12 = vcombine.high %v1097_v59, %v1097_v59 }
 0x129   : > { %v1542_v8 = vadd.f32 1.0, %v10596_v2  ;;  %v1530_v13 = vmul.f32 0.70710677, %v1516_v4  ;;  %v1427_v3 = vrot.slane %v1412_v6, %v10810_v10  ;;  %v1125_v15 = vrot.slane %v1109_v32, %v10810_v10 }
 0x12a   : > { %v1420_v14 = vrot.slane %v1411_v5, %v10810_v10  ;;  %v1529_v17 = vmul.f32 0.70710677, %v1515_v9  ;;  %v1489_v18 = vrot.slane %v1164_v55, %v10810_v10  ;;  %v1395_v19 = vcombine.low %v1386_v11, %v1393_v0 }
 0x12b   : > { %v1549_v16 = vmul.f32 %v1542_v8, %v1521_v30  ;;  %v1524_v20 = vmul.f32 0.5, %v1517_v31  ;;  %10599 = verf.f32 %v1530_v13  ;;  %v1132_v21 = vrot.slane %v1116_v57, %v10810_v10 }
 0x12c   : > { %v1139_v22 = vrot.slane %v1117_v1, %v10810_v10  ;;  %10601 = verf.f32 %v1529_v17  ;;  %v1409_v25 = vrot.slane %v1395_v19, %v10810_v10  ;;  %v1146_v28 = vrot.slane %v1118_v7, %v10810_v10 }
 0x12d   : > { %v10598_v23 = vpop.eup %10597  ;;  %v1556_v24 = vpack.c.bf16 %v1549_v16, %v1549_v16  ;;  %v1442_v33 = vcombine.low %v1420_v14, %v1427_v3  ;;  %v1413_v30 = vcombine.low %v1101_v12, %v1125_v15  ;;  %v1523_v52 = vmul.f32 0.5, %v1516_v4 }
 0x12e   : > { %v1545_v29 = vadd.f32 1.0, %v10598_v23  ;;  %v1441_v34 = vrot.slane %v1139_v22, %v10810_v10  ;;  %v1410_v35 = vcombine.low %v10948_v26, %v1409_v25  ;;  %v9822_v31 = vcombine.high %v1125_v15, %v1139_v22 }
 0x12f   : > { %v1460_v36 = vcombine.low %v1132_v21, %v1146_v28  ;;  %v9823_v27 = vcombine.high %v1132_v21, %v1146_v28  ;;  %v1434_v38 = vrot.slane %v1413_v30, %v10810_v10  ;;  %v1579_v39 = vrot.slane %v1556_v24, %v10810_v10 }
 0x130   : > { %v1552_v37 = vmul.f32 %v1545_v29, %v1524_v20  ;;  %v1518_v40 = vadd.f32 %v10925_v60, %v1410_v35  ;;  %v1468_v41 = vrot.slane %v9822_v31, %v10810_v10  ;;  %v1450_v46 = vrot.slane %v1442_v33, %v10810_v10 }
 0x131   : > { %v1475_v43 = vrot.slane %v1460_v36, %v10810_v10  ;;  %v1482_v44 = vrot.slane %v9823_v27, %v10810_v10  ;;  %v1443_v26 = vcombine.low %v1434_v38, %v1441_v34  ;;  %v1580_v47 = vcombine.high %v1579_v39, %v1579_v39 }
 0x132   : > { %v1559_v45 = vpack.c.bf16 %v1552_v37, %v1552_v37  ;;  %v1532_v48 = vmul.f32 0.70710677, %v1518_v40  ;;  %v1522_v42 = vmul.f32 0.5, %v1515_v9  ;;  %v1587_v1 = vrot.slane %v1579_v39, %v10810_v10 }
 0x133   : > { %v1490_v32 = vcombine.low %v1468_v41, %v1475_v43  ;;  %v1491_v49 = vcombine.low %v1482_v44, %v1489_v18  ;;  %v1457_v51 = vrot.slane %v1443_v26, %v10810_v10  ;;  %v1594_v61 = vrot.slane %v1580_v47, %v10810_v10 }
 0x134   : > { %v1651_v50 = vrot.slane %v1559_v45, %v10810_v10  ;;  %10603 = verf.f32 %v1532_v48  ;;  %v1525_v3 = vmul.f32 0.5, %v1518_v40  ;;  %v1595_v23 = vcombine.high %v1587_v1, %v1587_v1 }
 0x135   : > { %v1498_v53 = vrot.slane %v1490_v32, %v10810_v10  ;;  %v1505_v55 = vrot.slane %v1491_v49, %v10810_v10  ;;  %v10600_v56 = vpop.eup %10599  ;;  %v1458_v59 = vcombine.low %v1450_v46, %v1457_v51  ;;  %v1746_v9 = vcombine.low %v1587_v1, %v1594_v61 }
 0x136   : > { %v1652_v57 = vcombine.high %v1651_v50, %v1651_v50  ;;  %v11000_v58 = vrot.slane %v1651_v50, %v10810_v10  ;;  %v10602_v62 = vpop.eup %10601  ;;  %v1544_v63 = vadd.f32 1.0, %v10600_v56  ;;  %v1596_v24 = vcombine.high %v1594_v61, %v1594_v61 }
 0x137   : > { %v1506_v0 = vcombine.low %v1498_v53, %v1505_v55  ;;  %v1543_v2 = vadd.f32 1.0, %v10602_v62  ;;  %v1519_v4 = vadd.f32 %v10925_v60, %v1458_v59  ;;  %v1756_v25 = vrot.slane %v1746_v9, %v10810_v10 }
 0x138   : > { %v1666_v5 = vrot.slane %v1652_v57, %v10810_v10  ;;  %v1667_v6 = vcombine.high %v11000_v58, %v11000_v58  ;;  %v1551_v7 = vmul.f32 %v1544_v63, %v1523_v52  ;;  %v1715_v11 = vunpack.i.h.s16 %v11000_v58 }
 0x139   : > { %v1520_v8 = vadd.f32 %v10925_v60, %v1506_v0  ;;  %v1550_v12 = vmul.f32 %v1543_v2, %v1522_v42  ;;  %v1533_v13 = vmul.f32 0.70710677, %v1519_v4  ;;  %v1526_v27 = vmul.f32 0.5, %v1519_v4 }
 0x13a   : > { %v1558_v14 = vpack.c.bf16 %v1551_v7, %v1551_v7  ;;  %v1717_v16 = vunpack.i.h.s16 %v1666_v5  ;;  %v11010_v18 = vcombine.high %v1666_v5, %v1666_v5  ;;  %v1719_v19 = vunpack.i.h.s16 %v1667_v6 }
 0x13b   : > { %v1534_v15 = vmul.f32 0.70710677, %v1520_v8  ;;  %v1557_v17 = vpack.c.bf16 %v1550_v12, %v1550_v12  ;;  %10605 = verf.f32 %v1533_v13  ;;  %v11013_v21 = vpack.i.b16 %v1666_v5, %v1715_v11 }
 0x13c   : > { %v1627_v20 = vrot.slane %v1558_v14, %v10810_v10  ;;  %v11015_v60 = vpack.i.b16 %v1667_v6, %v1717_v16  ;;  %v3458_v34 = vcombine.low %v1666_v5, %v1667_v6  ;;  %v1527_v37 = vmul.f32 0.5, %v1520_v8 }
 0x13d   : > { %10607 = verf.f32 %v1534_v15  ;;  %v1603_v22 = vrot.slane %v1557_v17, %v10810_v10  ;;  %v11035_v40 = vpack.i.b16 %v11010_v18, %v1719_v19 }
 0x13e   : > { %v10604_v28 = vpop.eup %10603  ;;  %v1628_v29 = vcombine.high %v1627_v20, %v1627_v20  ;;  %v11020_v33 = vrot.slane %v1627_v20, %v10810_v10  ;;  %v5057_v30 = vcombine.low %v11013_v21, %v11015_v60  ;;  %v11049_v48 = vrot.slane %v3458_v34, %v10810_v10 }
 0x13f   : > { %v1604_v35 = vcombine.high %v1603_v22, %v1603_v22  ;;  %v11025_v31 = vrot.slane %v1603_v22, %v10810_v10  ;;  %v1546_v36 = vadd.f32 1.0, %v10604_v28  ;;  %v1797_v56 = vcombine.low %v11015_v60, %v11035_v40 }
 0x140   : > { %v11028_v38 = vrot.slane %v1628_v29, %v10810_v10  ;;  %v11032_v39 = vcombine.high %v11020_v33, %v11020_v33  ;;  %v1708_v22 = vunpack.i.h.s16 %v11020_v33 }
 0x141   : > { %v1553_v41 = vmul.f32 %v1546_v36, %v1525_v3  ;;  %v11038_v43 = vrot.slane %v1604_v35, %v10810_v10  ;;  %v1619_v44 = vcombine.high %v11025_v31, %v11025_v31  ;;  %v1701_v45 = vunpack.i.h.s16 %v11025_v31 }
 0x142   : > { %v9824_v46 = vpack.i.b16 %v11025_v31, %v1596_v24  ;;  %v1644_v26 = vcombine.high %v11028_v38, %v11028_v38  ;;  %v1795_v47 = vcombine.low %v11028_v38, %v11032_v39  ;;  %v1712_v2 = vunpack.i.h.s16 %v11032_v39 }
 0x143   : > { %v1560_v32 = vpack.c.bf16 %v1553_v41, %v1553_v41  ;;  %v1620_v49 = vcombine.high %v11038_v43, %v11038_v43  ;;  %v1703_v50 = vunpack.i.h.s16 %v11038_v43  ;;  %v1705_v51 = vunpack.i.h.s16 %v1619_v44 }
 0x144   : > { %v9825_v52 = vpack.i.b16 %v11038_v43, %v1701_v45  ;;  %v1747_v53 = vcombine.low %v1595_v23, %v9824_v46  ;;  %v11056_v55 = vpack.i.b16 %v11000_v58, %v1644_v26  ;;  %v1805_v8 = vrot.slane %v1795_v47, %v10810_v10  ;;  %v10545_v47 = vld [vmem:[%s12681_s3 + $0x20] sm:$0xff]  }
 0x145   : > { %v10606_v57 = vpop.eup %10605  ;;  %v1675_v59 = vrot.slane %v1560_v32, %v10810_v10  ;;  %v9826_v61 = vpack.i.b16 %v1619_v44, %v1703_v50  ;;  %v9827_v62 = vpack.i.b16 %v1620_v49, %v1705_v51  ;;  %v9868_v42 = vpack.i.b16 %v11020_v33, %v1620_v49 }
 0x146   : > { %v1547_v0 = vadd.f32 1.0, %v10606_v57  ;;  %v1763_v1 = vrot.slane %v1747_v53, %v10810_v10  ;;  %v1796_v4 = vcombine.low %v11056_v55, %v11013_v21  ;;  %v9871_v20 = vpack.i.b16 %v1644_v26, %v1712_v2  ;;  %v10547_v53 = vld [vmem:[%s12681_s3 + $0x30] sm:$0xff]  }
 0x147   : > { %v10608_v63 = vpop.eup %10607  ;;  %v1676_v5 = vcombine.high %v1675_v59, %v1675_v59  ;;  %v11067_v6 = vrot.slane %v1675_v59, %v10810_v10  ;;  %v1748_v7 = vcombine.low %v9825_v52, %v9826_v61  ;;  %v1749_v12 = vcombine.low %v9827_v62, %v11020_v33  ;;  %v10546_v62 = vld [vmem:[%s12681_s3 + $0x28] sm:$0xff]  }
 0x148   : > { %v1554_v11 = vmul.f32 %v1547_v0, %v1526_v27  ;;  %v1778_v13 = vcombine.low %v1756_v25, %v1763_v1  ;;  %v3410_v9 = vcombine.low %v1619_v44, %v9868_v42  ;;  %v1548_v3 = vadd.f32 1.0, %v10608_v63 }
 0x149   : > { %v11072_v14 = vrot.slane %v1676_v5, %v10810_v10  ;;  %v1770_v15 = vrot.slane %v1748_v7, %v10810_v10  ;;  %v1812_v16 = vrot.slane %v1796_v4, %v10810_v10  ;;  %v1777_v19 = vrot.slane %v1749_v12, %v10810_v10  ;;  %v10548_v5 = vld [vmem:[%s12681_s3 + $0x38] sm:$0xff]  }
 0x14a   : > { %v1561_v17 = vpack.c.bf16 %v1554_v11, %v1554_v11  ;;  %v1819_v24 = vrot.slane %v1797_v56, %v10810_v10  ;;  %v5056_v28 = vcombine.low %v11032_v39, %v11056_v55  ;;  %v3412_v35 = vcombine.low %v9871_v20, %v11000_v58 }
 0x14b   : > { %v1798_v23 = vcombine.low %v11067_v6, %v11072_v14  ;;  %v1827_v25 = vcombine.low %v1805_v8, %v1812_v16  ;;  %v1779_v34 = vcombine.low %v1770_v15, %v1777_v19  ;;  %v5058_v36 = vcombine.low %v11035_v40, %v11067_v6 }
 0x14c   : > { %v3366_v29 = vrot.slane %v1561_v17, %v10810_v10  ;;  %v11087_v27 = vmul.f32 %v1548_v3, %v1527_v37  ;;  %v1786_v41 = vrot.slane %v1778_v13, %v10810_v10  ;;  %v11095_v45 = vrot.slane %v5057_v30, %v10810_v10 }
 0x14d   : > { %v1826_v44 = vrot.slane %v1798_v23, %v10810_v10  ;;  %v1793_v46 = vrot.slane %v1779_v34, %v10810_v10  ;;  %v1835_v26 = vrot.slane %v1827_v25, %v10810_v10  ;;  %v11101_v58 = vcombine.high %v11067_v6, %v11067_v6 }
 0x14e   : > { %v11105_v37 = vcombine.high %v11072_v14, %v11072_v14  ;;  %v3367_v40 = vcombine.high %v3366_v29, %v3366_v29  ;;  %v1710_v60 = vunpack.i.h.s16 %v11028_v38  ;;  %v3409_v30 = vcombine.low %v11025_v31, %v11038_v43 }
 0x14f   : > { %v1828_v21 = vcombine.low %v1819_v24, %v1826_v44  ;;  %v11113_v32 = vcombine.low %v1786_v41, %v1793_v46  ;;  %v9869_v50 = vpack.i.b16 %v11028_v38, %v1708_v22  ;;  %v3426_v51 = vrot.slane %v3410_v9, %v10810_v10 }
 0x150   : > { %v1727_v49 = vunpack.i.l.s16 %v11105_v37  ;;  %v9870_v55 = vpack.i.b16 %v11032_v39, %v1710_v60  ;;  %v3419_v56 = vrot.slane %v3409_v30, %v10810_v10  ;;  %v1722_v31 = vunpack.i.h.s16 %v11067_v6 }
 0x151   : > { %v1842_v52 = vrot.slane %v1828_v21, %v10810_v10  ;;  %10211 = vmatmul.mubr.msk.bf16.vlgmr.msra.gmra.mrb[0].mxu1 %vm1871_vm3, %v11113_v32  ;;  %10227 = vmatmul.mubr.msk.bf16.vlgmr.msra.gmra.mrb[8].mxu0 %vm1871_vm3, %v11113_v32  ;;  %v3440_v43 = vrot.slane %v3412_v35, %v10810_v10  ;;  %v1724_v57 = vunpack.i.h.s16 %v11072_v14  ;;  %v1726_v59 = vunpack.i.h.s16 %v11101_v58 }
 0x152   : > { %v11133_v61 = vrot.slane %v3366_v29, %v10810_v10  ;;  %10239 = vmatpush3.bf16.msra.mxu1 %v10545_v47  ;;  %10214 = vmatprep.mubr.msk.bf16.mxu1 %vm10693_vm2, %v10692_v54  ;;  %v3411_v42 = vcombine.low %v9869_v50, %v9870_v55  ;;  %v3441_v63 = vcombine.low %v3419_v56, %v3426_v51 }
 0x153   : > { %v11137_v39 = vcombine.low %v1835_v26, %v1842_v52  ;;  %10230 = vmatprep.mubr.msk.bf16.mxu0 %vm10693_vm2, %v10692_v54  ;;  %v5086_v0 = vrot.slane %v5058_v36, %v10810_v10  ;;  %10240 = vmatprep.subr.bf16.mxu1 %v10692_v54  ;;  %v3381_v1 = vrot.slane %v3367_v40, %v10810_v10 }
 0x154   : > { %v9872_v2 = vpack.i.b16 %v11067_v6, %v11010_v18  ;;  %v1844_v4 = vcombine.low %v11101_v58, %v1727_v49  ;;  %10255 = vmatpush3.bf16.msra.mxu0 %v10547_v53  ;;  %v3433_v7 = vrot.slane %v3411_v42, %v10810_v10  ;;  %v9873_v8 = vpack.i.b16 %v11072_v14, %v1722_v31  ;;  %v10549_v42 = vld [vmem:[%s12681_s3 + $0x40] sm:$0xff]  }
 0x155   : > { %v9874_v11 = vpack.i.b16 %v11101_v58, %v1724_v57  ;;  %v1562_v12 = vpack.c.bf16 %v11087_v27, %v11087_v27  ;;  %10256 = vmatprep.subr.bf16.mxu0 %v10692_v54  ;;  %v3449_v18 = vrot.slane %v3441_v63, %v10810_v10  ;;  %v9875_v6 = vpack.i.b16 %v11105_v37, %v1726_v59 }
 0x156   : > { %v3461_v13 = vcombine.low %v11133_v61, %v3381_v1  ;;  %10241 = vmatpush3.bf16.msra.mxu1 %v10546_v62  ;;  %v3442_v9 = vcombine.low %v3433_v7, %v3440_v43  ;;  %v3459_v3 = vcombine.low %v9872_v2, %v9873_v8  ;;  %v11164_v15 = vcombine.high %v11133_v61, %v11133_v61 }
 0x157   : > { %v5055_v16 = vcombine.low %v11020_v33, %v11028_v38  ;;  %v5072_v17 = vrot.slane %v5056_v28, %v10810_v10  ;;  %10270 = vmatprep.subr.bf16.mxu1 %v10692_v54  ;;  %v3460_v19 = vcombine.low %v9874_v11, %v9875_v6  ;;  %v5088_v22 = vcombine.low %v11095_v45, %v5086_v0  ;;  %v10556_v6 = vld [vmem:[%s12681_s3 + $0x78] sm:$0xff]  }
 0x158   : > { %v3489_v20 = vrot.slane %v3461_v13, %v10810_v10  ;;  %v1851_v23 = vrot.slane %v1844_v4, %v10810_v10  ;;  %10257 = vmatpush3.bf16.msra.mxu0 %v10548_v5  ;;  %v3456_v24 = vrot.slane %v3442_v9, %v10810_v10  ;;  %v3475_v25 = vrot.slane %v3459_v3, %v10810_v10  ;;  %v10550_v4 = vld [vmem:[%s12681_s3 + $0x48] sm:$0xff]   ;;  %v10557_v13 = vld [vmem:[%s12681_s3 + $0x80] sm:$0xff]  }
 0x159   : > { %v3385_v29 = vunpack.i.h.s16 %v11133_v61  ;;  %10215 = vmatmul.mubr.msk.bf16.gmra.mrb[4].mxu1 %vm1871_vm3, %v11137_v39  ;;  %10231 = vmatmul.mubr.msk.bf16.gmra.mrb[12].mxu0 %vm1871_vm3, %v11137_v39  ;;  %v3482_v33 = vrot.slane %v3460_v19, %v10810_v10  ;;  %v5065_v38 = vrot.slane %v5055_v16, %v10810_v10  ;;  %v3387_v28 = vunpack.i.h.s16 %v3381_v1  ;;  %v10558_v3 = vld [vmem:[%s12681_s3 + $0x88] sm:$0xff]  }
 0x15a   : > { %v5022_v34 = vrot.slane %v1562_v12, %v10810_v10  ;;  %10218 = vmatprep.mubr.msk.bf16.mxu1 %vm10693_vm2, %v10692_v54  ;;  %10234 = vmatprep.mubr.msk.bf16.mxu0 %vm10693_vm2, %v10692_v54  ;;  %v11187_v35 = vcombine.low %v3449_v18, %v3456_v24  ;;  %v3490_v36 = vcombine.low %v11049_v48, %v3475_v25  ;;  %v3389_v41 = vunpack.i.h.s16 %v11164_v15  ;;  %v10555_v12 = vld [vmem:[%s12681_s3 + $0x70] sm:$0xff]   ;;  %v10554_v18 = vld [vmem:[%s12681_s3 + $0x68] sm:$0xff]  }
 0x15b   : > { %v3383_v27 = vcombine.high %v3381_v1, %v3381_v1  ;;  %v3491_v44 = vcombine.low %v3482_v33, %v3489_v20  ;;  %10286 = vmatprep.subr.bf16.mxu0 %v10692_v54  ;;  %v5087_v45 = vcombine.low %v5065_v38, %v5072_v17  ;;  %v5102_v46 = vrot.slane %v5088_v22, %v10810_v10 }
 0x15c   : > { %v5023_v26 = vcombine.high %v5022_v34, %v5022_v34  ;;  %v3498_v40 = vrot.slane %v3490_v36, %v10810_v10  ;;  %v11195_v47 = vrot.slane %v5022_v34, %v10810_v10  ;;  %v9911_v21 = vpack.i.b16 %v11133_v61, %v11105_v37 }
 0x15d   : > { %v9912_v60 = vpack.i.b16 %v3381_v1, %v3385_v29  ;;  %v3505_v48 = vrot.slane %v3491_v44, %v10810_v10  ;;  %v5095_v30 = vrot.slane %v5087_v45, %v10810_v10  ;;  %v9913_v50 = vpack.i.b16 %v11164_v15, %v3387_v28  ;;  %v10551_v1 = vld [vmem:[%s12681_s3 + $0x50] sm:$0xff]  }
 0x15e   : > { %v11202_v49 = vrot.slane %v5023_v26, %v10810_v10  ;;  %v9914_v51 = vpack.i.b16 %v3383_v27, %v3389_v41  ;;  %v5104_v52 = vcombine.low %v11072_v14, %v11101_v58  ;;  %v1858_v55 = vrot.slane %v1851_v23, %v10810_v10 }
 0x15f   : > { %v5105_v53 = vcombine.low %v9911_v21, %v9912_v60  ;;  %v3506_v56 = vcombine.low %v3498_v40, %v3505_v48  ;;  %v11208_v31 = vcombine.low %v5095_v30, %v5102_v46  ;;  %v3390_v5 = vunpack.i.l.s16 %v3383_v27 }
 0x160   : > { %v5107_v37 = vcombine.low %v11195_v47, %v11202_v49  ;;  %v5106_v43 = vcombine.low %v9913_v50, %v9914_v51  ;;  %v5114_v57 = vrot.slane %v5104_v52, %v10810_v10  ;;  %v5039_v9 = vcombine.high %v11202_v49, %v11202_v49 }
 0x161   : > { %v5121_v59 = vrot.slane %v5105_v53, %v10810_v10  ;;  %10219 = vmatmul.mubr.msk.bf16.gmra.mrb[8].mxu1 %vm1871_vm3, %v1858_v55  ;;  %10235 = vmatmul.mubr.msk.bf16.gmra.mrb[16].mxu0 %vm1871_vm3, %v1858_v55  ;;  %v3507_v7 = vcombine.low %v11164_v15, %v3390_v5  ;;  %v5038_v16 = vcombine.high %v11195_v47, %v11195_v47 }
 0x162   : > { %10242 = vmatprep.mubr.msk.bf16.mxu1 %vm10693_vm2, %v10692_v54  ;;  %10258 = vmatprep.mubr.msk.bf16.mxu0 %vm10693_vm2, %v10692_v54  ;;  %v5128_v14 = vrot.slane %v5106_v43, %v10810_v10  ;;  %v5135_v58 = vrot.slane %v5107_v37, %v10810_v10  ;;  %v5046_v15 = vunpack.i.l.s16 %v5039_v9 }
 0x163   : > { %v5136_v61 = vcombine.low %v5114_v57, %v5121_v59  ;;  %v3514_v8 = vrot.slane %v3507_v7, %v10810_v10 }
 0x164   : > { %v5137_v62 = vcombine.low %v5128_v14, %v5135_v58  ;;  %v5153_v17 = vcombine.low %v5038_v16, %v5046_v15 }
 0x165   : > { %v5144_v63 = vrot.slane %v5136_v61, %v10810_v10  ;;  %v3521_v11 = vrot.slane %v3514_v8, %v10810_v10 }
 0x166   : > { %v5151_v0 = vrot.slane %v5137_v62, %v10810_v10  ;;  %v5160_v19 = vrot.slane %v5153_v17, %v10810_v10 }
 0x168   : > { %v11230_v2 = vcombine.low %v5144_v63, %v5151_v0  ;;  %v5167_v20 = vrot.slane %v5160_v19, %v10810_v10 }
 0x169   : > { %10243 = vmatmul.mubr.msk.bf16.vlgmr.msra.gmra.mrb[12].mxu1 %vm1871_vm3, %v11113_v32  ;;  %10259 = vmatmul.mubr.msk.bf16.vlgmr.msra.gmra.mrb[20].mxu0 %vm1871_vm3, %v11187_v35  ;;  %v10552_v32 = vld [vmem:[%s12681_s3 + $0x58] sm:$0xff]  }
 0x16a   : > { %10271 = vmatpush3.bf16.msra.mxu1 %v10549_v42  ;;  %10246 = vmatprep.mubr.msk.bf16.mxu1 %vm10693_vm2, %v10692_v54 }
 0x16b   : > { %10262 = vmatprep.mubr.msk.bf16.mxu0 %vm10693_vm2, %v10692_v54  ;;  %10272 = vmatprep.subr.bf16.mxu1 %v10692_v54 }
 0x16c   : > { %10287 = vmatpush3.bf16.msra.mxu0 %v10551_v1 }
 0x16d   : > { %10288 = vmatprep.subr.bf16.mxu0 %v10692_v54 }
 0x16e   : > { %10273 = vmatpush3.bf16.msra.mxu1 %v10550_v4 }
 0x16f   : > { %10302 = vmatprep.subr.bf16.mxu1 %v10692_v54 }
 0x170   : > { %10289 = vmatpush3.bf16.msra.mxu0 %v10552_v32 }
 0x171   : > { %10247 = vmatmul.mubr.msk.bf16.gmra.mrb[16].mxu1 %vm1871_vm3, %v11137_v39  ;;  %10263 = vmatmul.mubr.msk.bf16.gmra.mrb[24].mxu0 %vm1871_vm3, %v3506_v56  ;;  %v10553_v39 = vld [vmem:[%s12681_s3 + $0x60] sm:$0xff]  }
 0x172   : > { %10250 = vmatprep.mubr.msk.bf16.mxu1 %vm10693_vm2, %v10692_v54  ;;  %10266 = vmatprep.mubr.msk.bf16.mxu0 %vm10693_vm2, %v10692_v54 }
 0x173   : > { %10318 = vmatprep.subr.bf16.mxu0 %v10692_v54 }
 0x179   : > { %10251 = vmatmul.mubr.msk.bf16.gmra.mrb[20].mxu1 %vm1871_vm3, %v1858_v55  ;;  %10267 = vmatmul.mubr.msk.bf16.gmra.mrb[28].mxu0 %vm1871_vm3, %v3521_v11 }
 0x17a   : > { %10274 = vmatprep.mubr.msk.bf16.mxu1 %vm10693_vm2, %v10692_v54  ;;  %10290 = vmatprep.mubr.msk.bf16.mxu0 %vm10693_vm2, %v10692_v54 }
 0x181   : > { %10275 = vmatmul.mubr.msk.bf16.vlgmr.msra.gmra.mrb[24].mxu1 %vm1871_vm3, %v11187_v35  ;;  %10291 = vmatmul.mubr.msk.bf16.vlgmr.msra.gmra.mrb[32].mxu0 %vm1871_vm3, %v11187_v35 }
 0x182   : > { %10303 = vmatpush3.bf16.msra.mxu1 %v10553_v39  ;;  %10278 = vmatprep.mubr.msk.bf16.mxu1 %vm10693_vm2, %v10692_v54 }
 0x183   : > { %10294 = vmatprep.mubr.msk.bf16.mxu0 %vm10693_vm2, %v10692_v54  ;;  %10304 = vmatprep.subr.bf16.mxu1 %v10692_v54 }
 0x184   : > { %10319 = vmatpush3.bf16.msra.mxu0 %v10555_v12 }
 0x185   : > { %10320 = vmatprep.subr.bf16.mxu0 %v10692_v54 }
 0x186   : > { %10305 = vmatpush3.bf16.msra.mxu1 %v10554_v18 }
 0x187   : > { %10334 = vmatprep.subr.bf16.mxu1 %v10692_v54 }
 0x188   : > { %10321 = vmatpush3.bf16.msra.mxu0 %v10556_v6 }
 0x189   : > { %10279 = vmatmul.mubr.msk.bf16.gmra.mrb[28].mxu1 %vm1871_vm3, %v3506_v56  ;;  %10295 = vmatmul.mubr.msk.bf16.gmra.mrb[36].mxu0 %vm1871_vm3, %v3506_v56 }
 0x18a   : > { %10282 = vmatprep.mubr.msk.bf16.mxu1 %vm10693_vm2, %v10692_v54  ;;  %10298 = vmatprep.mubr.msk.bf16.mxu0 %vm10693_vm2, %v10692_v54 }
 0x18b   : > { %10350 = vmatprep.subr.bf16.mxu0 %v10692_v54 }
 0x191   : > { %10283 = vmatmul.mubr.msk.bf16.gmra.mrb[32].mxu1 %vm1871_vm3, %v3521_v11  ;;  %10299 = vmatmul.mubr.msk.bf16.gmra.mrb[40].mxu0 %vm1871_vm3, %v3521_v11 }
 0x192   : > { %10306 = vmatprep.mubr.msk.bf16.mxu1 %vm10693_vm2, %v10692_v54  ;;  %10322 = vmatprep.mubr.msk.bf16.mxu0 %vm10693_vm2, %v10692_v54 }
 0x199   : > { %10307 = vmatmul.mubr.msk.bf16.vlgmr.msra.gmra.mrb[36].mxu1 %vm1871_vm3, %v11208_v31  ;;  %10323 = vmatmul.mubr.msk.bf16.vlgmr.msra.gmra.mrb[44].mxu0 %vm1871_vm3, %v11208_v31 }
 0x19a   : > { %10335 = vmatpush3.bf16.msra.mxu1 %v10557_v13  ;;  %10310 = vmatprep.mubr.msk.bf16.mxu1 %vm10693_vm2, %v10692_v54 }
 0x19b   : > { %10326 = vmatprep.mubr.msk.bf16.mxu0 %vm10693_vm2, %v10692_v54  ;;  %10336 = vmatprep.subr.bf16.mxu1 %v10692_v54 }
 0x19e   : > { %10337 = vmatpush3.bf16.msra.mxu1 %v10558_v3 }
 0x19f   : > { %10358 = vmatprep.subr.bf16.mxu1 %v10692_v54 }
 0x1a1   : > { %10311 = vmatmul.mubr.msk.bf16.gmra.mrb[40].mxu1 %vm1871_vm3, %v11230_v2  ;;  %10327 = vmatmul.mubr.msk.bf16.gmra.mrb[48].mxu0 %vm1871_vm3, %v11230_v2 }
 0x1a2   : > { %10314 = vmatprep.mubr.msk.bf16.mxu1 %vm10693_vm2, %v10692_v54  ;;  %10330 = vmatprep.mubr.msk.bf16.mxu0 %vm10693_vm2, %v10692_v54 }
 0x1a9   : > { %10315 = vmatmul.mubr.msk.bf16.gmra.mrb[44].mxu1 %vm1871_vm3, %v5167_v20  ;;  %10331 = vmatmul.mubr.msk.bf16.gmra.mrb[52].mxu0 %vm1871_vm3, %v5167_v20 }
 0x1aa   : > { %10338 = vmatprep.mubr.msk.bf16.mxu1 %vm10693_vm2, %v10692_v54  ;;  %10354 = vmatprep.mubr.msk.bf16.mxu0 %vm10693_vm2, %v10692_v54 }
 0x1b1   : > { %10339 = vmatmul.mubr.msk.bf16.vlgmr.msra.gmra.mrb[48].mxu1 %vm1871_vm3, %v11208_v31 }
 0x1b2   : > { %10342 = vmatprep.mubr.msk.bf16.mxu1 %vm10693_vm2, %v10692_v54 }
 0x1b9   : > { %10343 = vmatmul.mubr.msk.bf16.gmra.mrb[52].mxu1 %vm1871_vm3, %v11230_v2 }
 0x1ba   : > { %10346 = vmatprep.mubr.msk.bf16.mxu1 %vm10693_vm2, %v10692_v54 }
 0x1c1   : > { %10347 = vmatmul.mubr.msk.bf16.gmra.mrb[56].mxu1 %vm1871_vm3, %v5167_v20 }
 0x1c2   : > { %10362 = vmatprep.mubr.msk.bf16.mxu1 %vm10693_vm2, %v10692_v54 }
 0x224   : > { %v1915_v22 = vpop.f32.mrb[0].mxu1  ;;  %v2410_v23 = vpop.f32.mrb[8].mxu0 }
 0x225   : > { %v1942_v24 = vcombine.high %v1915_v22, %v1915_v22  ;;  %v1949_v25 = vrot.slane %v1915_v22, %v10810_v10  ;;  %v2437_v29 = vcombine.high %v2410_v23, %v2410_v23  ;;  %v2444_v33 = vrot.slane %v2410_v23, %v10810_v10  ;;  %v10212_v38 = vpop.f32.mrb[1].mxu1  ;;  %v10228_v28 = vpop.f32.mrb[9].mxu0 }
 0x226   : > { %v1918_v34 = vpop.f32.mrb[2].mxu1  ;;  %v2413_v35 = vpop.f32.mrb[10].mxu0 }
 0x227   : > { %v1956_v36 = vrot.slane %v1942_v24, %v10810_v10  ;;  %v1957_v27 = vcombine.high %v1949_v25, %v1949_v25  ;;  %v1965_v41 = vrot.slane %v1949_v25, %v10810_v10  ;;  %v2451_v44 = vrot.slane %v2437_v29, %v10810_v10  ;;  %v10213_v45 = vpop.f32.mrb[3].mxu1  ;;  %v10229_v46 = vpop.f32.mrb[11].mxu0  ;;  %v11387_v24 = vld [vmem:[%s12682_s4] ss:$0 sm:$0xff] }
 0x228   : > { %v2452_v26 = vcombine.high %v2444_v33, %v2444_v33  ;;  %v2460_v40 = vrot.slane %v2444_v33, %v10810_v10  ;;  %v1990_v47 = vcombine.high %v1918_v34, %v1918_v34  ;;  %v1997_v21 = vrot.slane %v1918_v34, %v10810_v10 }
 0x229   : > { %v1958_v60 = vcombine.high %v1956_v36, %v1956_v36  ;;  %v1972_v48 = vrot.slane %v1956_v36, %v10810_v10  ;;  %v1979_v30 = vrot.slane %v1957_v27, %v10810_v10  ;;  %v2453_v49 = vcombine.high %v2451_v44, %v2451_v44 }
 0x22a   : > { %v2467_v50 = vrot.slane %v2451_v44, %v10810_v10  ;;  %v2474_v51 = vrot.slane %v2452_v26, %v10810_v10  ;;  %v2482_v52 = vcombine.high %v2460_v40, %v2460_v40  ;;  %v2004_v53 = vrot.slane %v1990_v47, %v10810_v10 }
 0x22b   : > { %v1986_v55 = vrot.slane %v1958_v60, %v10810_v10  ;;  %v2154_v56 = vcombine.low %v1965_v41, %v1979_v30  ;;  %v9838_v31 = vcombine.high %v1965_v41, %v1979_v30  ;;  %v2176_v37 = vrot.slane %v1972_v48, %v10810_v10 }
 0x22c   : > { %v2481_v43 = vrot.slane %v2453_v49, %v10810_v10  ;;  %v2483_v57 = vcombine.high %v2474_v51, %v2474_v51  ;;  %v2651_v59 = vcombine.low %v2474_v51, %v2482_v52  ;;  %v2005_v14 = vcombine.high %v1997_v21, %v1997_v21  ;;  %v11364_v58 = vpop.f32.mrb[4].mxu1  ;;  %v11366_v61 = vpop.f32.mrb[12].mxu0 }
 0x22d   : > { %v2162_v62 = vrot.slane %v2154_v56, %v10810_v10  ;;  %v2169_v42 = vrot.slane %v9838_v31, %v10810_v10  ;;  %v2191_v63 = vrot.slane %v2176_v37, %v10810_v10  ;;  %v1989_v0 = vcombine.high %v1986_v55, %v1986_v55  ;;  %v10216_v1 = vpop.f32.mrb[5].mxu1  ;;  %v10232_v2 = vpop.f32.mrb[13].mxu0 }
 0x22e   : > { %v2652_v4 = vcombine.low %v2483_v57, %v2467_v50  ;;  %v2659_v5 = vrot.slane %v2651_v59, %v10810_v10  ;;  %v2673_v32 = vrot.slane %v2481_v43, %v10810_v10  ;;  %v2006_v7 = vcombine.high %v2004_v53, %v2004_v53  ;;  %v11373_v8 = vpop.f32.mrb[6].mxu1  ;;  %v11375_v11 = vpop.f32.mrb[14].mxu0 }
 0x22f   : > { %v2177_v39 = vcombine.low %v2162_v62, %v2169_v42  ;;  %v2013_v12 = vrot.slane %v1997_v21, %v10810_v10  ;;  %v2020_v18 = vrot.slane %v2004_v53, %v10810_v10  ;;  %v2027_v6 = vrot.slane %v2005_v14, %v10810_v10  ;;  %v10217_v13 = vpop.f32.mrb[7].mxu1  ;;  %v10233_v9 = vpop.f32.mrb[15].mxu0 }
 0x230   : > { %v2666_v3 = vrot.slane %v2652_v4, %v10810_v10  ;;  %v2688_v15 = vrot.slane %v2673_v32, %v10810_v10  ;;  %v2034_v16 = vrot.slane %v2006_v7, %v10810_v10  ;;  %v2484_v17 = vcombine.high %v2413_v35, %v2413_v35 }
 0x231   : > { %v2184_v19 = vrot.slane %v2177_v39, %v10810_v10  ;;  %v2035_v20 = vcombine.high %v2013_v12, %v2013_v12  ;;  %v2037_v22 = vcombine.high %v2027_v6, %v2027_v6  ;;  %v2193_v23 = vcombine.low %v1989_v0, %v2013_v12 }
 0x232   : > { %v2674_v25 = vcombine.low %v2659_v5, %v2666_v3  ;;  %v11389_v29 = vcombine.high %v2020_v18, %v2034_v16  ;;  %v2491_v33 = vrot.slane %v2413_v35, %v10810_v10  ;;  %v2498_v38 = vrot.slane %v2484_v17, %v10810_v10 }
 0x233   : > { %v2192_v28 = vcombine.low %v2184_v19, %v2191_v63  ;;  %v2194_v34 = vcombine.low %v2027_v6, %v2035_v20  ;;  %v2201_v36 = vrot.slane %v2193_v23, %v10810_v10  ;;  %v2215_v27 = vrot.slane %v2037_v22, %v10810_v10 }
 0x234   : > { %v2681_v41 = vrot.slane %v2674_v25, %v10810_v10  ;;  %v2240_v44 = vrot.slane %v11389_v29, %v10810_v10  ;;  %v2499_v45 = vcombine.high %v2491_v33, %v2491_v33  ;;  %v2500_v46 = vcombine.high %v2498_v38, %v2498_v38  ;;  %v11398_v26 = vpop.f32.mrb[8].mxu1  ;;  %v11400_v40 = vpop.f32.mrb[16].mxu0 }
 0x235   : > { %v2354_v35 = vadd.f32 %v11387_v24, %v2192_v28  ;;  %v2208_v47 = vrot.slane %v2194_v34, %v10810_v10  ;;  %v2230_v21 = vrot.slane %v2215_v27, %v10810_v10  ;;  %v2507_v60 = vrot.slane %v2491_v33, %v10810_v10  ;;  %v10220_v48 = vpop.f32.mrb[9].mxu1  ;;  %v10236_v30 = vpop.f32.mrb[17].mxu0 }
 0x236   : > { %v2689_v49 = vcombine.low %v2681_v41, %v2688_v15  ;;  %v2514_v50 = vrot.slane %v2498_v38, %v10810_v10  ;;  %v2521_v51 = vrot.slane %v2499_v45, %v10810_v10  ;;  %v2528_v52 = vrot.slane %v2500_v46, %v10810_v10  ;;  %v1934_v53 = vpop.f32.mrb[10].mxu1  ;;  %v2429_v55 = vpop.f32.mrb[18].mxu0 }
 0x237   : > { %v2216_v56 = vcombine.low %v2201_v36, %v2208_v47  ;;  %v2039_v31 = vcombine.high %v11364_v58, %v11364_v58  ;;  %v2046_v37 = vrot.slane %v11364_v58, %v10810_v10  ;;  %v2532_v43 = vcombine.high %v11366_v61, %v11366_v61  ;;  %v10221_v57 = vpop.f32.mrb[11].mxu1  ;;  %v10237_v59 = vpop.f32.mrb[19].mxu0 }
 0x238   : > { %v11415_v14 = vadd.f32 %v2689_v49, %v2354_v35  ;;  %v2690_v62 = vcombine.low %v2507_v60, %v2521_v51  ;;  %v9850_v42 = vcombine.high %v2507_v60, %v2521_v51  ;;  %v2712_v63 = vrot.slane %v2514_v50, %v10810_v10 }
 0x239   : > { %v2223_v0 = vrot.slane %v2216_v56, %v10810_v10  ;;  %v2053_v1 = vrot.slane %v2039_v31, %v10810_v10  ;;  %v2054_v2 = vcombine.high %v2046_v37, %v2046_v37  ;;  %v2062_v4 = vrot.slane %v2046_v37, %v10810_v10 }
 0x23a   : > { %v2698_v58 = vrot.slane %v2690_v62, %v10810_v10  ;;  %v2705_v5 = vrot.slane %v9850_v42, %v10810_v10  ;;  %v2727_v32 = vrot.slane %v2712_v63, %v10810_v10  ;;  %v2531_v7 = vcombine.high %v2528_v52, %v2528_v52 }
 0x23b   : > { %v2231_v39 = vcombine.low %v2223_v0, %v2230_v21  ;;  %v2055_v12 = vcombine.high %v2053_v1, %v2053_v1  ;;  %v2069_v18 = vrot.slane %v2053_v1, %v10810_v10  ;;  %v2076_v6 = vrot.slane %v2054_v2, %v10810_v10 }
 0x23c   : > { %v2713_v13 = vcombine.low %v2698_v58, %v2705_v5  ;;  %v2084_v9 = vcombine.high %v2062_v4, %v2062_v4  ;;  %v2539_v3 = vrot.slane %v11366_v61, %v10810_v10  ;;  %v2546_v15 = vrot.slane %v2532_v43, %v10810_v10  ;;  %v11429_v16 = vpop.f32.mrb[12].mxu1  ;;  %v11431_v17 = vpop.f32.mrb[20].mxu0 }
 0x23d   : > { %v2355_v19 = vadd.f32 %v11387_v24, %v2231_v39  ;;  %v2083_v20 = vrot.slane %v2055_v12, %v10810_v10  ;;  %v2085_v22 = vcombine.high %v2069_v18, %v2069_v18  ;;  %v2233_v23 = vcombine.low %v2062_v4, %v2076_v6  ;;  %v10244_v25 = vpop.f32.mrb[13].mxu1  ;;  %v10260_v33 = vpop.f32.mrb[21].mxu0 }
 0x23e   : > { %v2720_v38 = vrot.slane %v2713_v13, %v10810_v10  ;;  %v2254_v28 = vrot.slane %v2084_v9, %v10810_v10  ;;  %v2547_v34 = vcombine.high %v2539_v3, %v2539_v3  ;;  %v2548_v61 = vcombine.high %v2546_v15, %v2546_v15  ;;  %v11437_v36 = vpop.f32.mrb[14].mxu1  ;;  %v11439_v27 = vpop.f32.mrb[22].mxu0 }
 0x23f   : > { %v2247_v41 = vrot.slane %v2233_v23, %v10810_v10  ;;  %v2271_v45 = vcombine.low %v2083_v20, %v2085_v22  ;;  %v2555_v46 = vrot.slane %v2539_v3, %v10810_v10  ;;  %v2562_v35 = vrot.slane %v2546_v15, %v10810_v10  ;;  %v10245_v47 = vpop.f32.mrb[15].mxu1  ;;  %v10261_v21 = vpop.f32.mrb[23].mxu0 }
 0x240   : > { %v2728_v60 = vcombine.low %v2720_v38, %v2727_v32  ;;  %v2269_v48 = vrot.slane %v2254_v28, %v10810_v10  ;;  %v2569_v30 = vrot.slane %v2547_v34, %v10810_v10  ;;  %v2576_v49 = vrot.slane %v2548_v61, %v10810_v10 }
 0x241   : > { %v2255_v50 = vcombine.low %v2240_v44, %v2247_v41  ;;  %v2279_v51 = vrot.slane %v2271_v45, %v10810_v10  ;;  %v2577_v52 = vcombine.high %v2555_v46, %v2555_v46  ;;  %v2729_v53 = vcombine.low %v2531_v7, %v2555_v46 }
 0x242   : > { %v11451_v55 = vadd.f32 %v2728_v60, %v2355_v19  ;;  %v2579_v56 = vcombine.high %v2569_v30, %v2569_v30  ;;  %v11453_v31 = vcombine.high %v2562_v35, %v2576_v49  ;;  %v2086_v37 = vcombine.high %v2083_v20, %v2083_v20 }
 0x243   : > { %v2262_v43 = vrot.slane %v2255_v50, %v10810_v10  ;;  %v2730_v57 = vcombine.low %v2569_v30, %v2577_v52  ;;  %v2737_v59 = vrot.slane %v2729_v53, %v10810_v10  ;;  %v2087_v62 = vcombine.high %v11373_v8, %v11373_v8 }
 0x244   : > { %v2751_v29 = vrot.slane %v2579_v56, %v10810_v10  ;;  %v2776_v44 = vrot.slane %v11453_v31, %v10810_v10  ;;  %v2094_v42 = vrot.slane %v11373_v8, %v10810_v10  ;;  %v2581_v63 = vcombine.high %v11375_v11, %v11375_v11  ;;  %v11466_v0 = vpop.f32.mrb[16].mxu1  ;;  %v11468_v1 = vpop.f32.mrb[24].mxu0 }
 0x245   : > { %v2270_v2 = vcombine.low %v2262_v43, %v2269_v48  ;;  %v2744_v4 = vrot.slane %v2730_v57, %v10810_v10  ;;  %v2101_v58 = vrot.slane %v2087_v62, %v10810_v10  ;;  %v2588_v5 = vrot.slane %v11375_v11, %v10810_v10  ;;  %v10248_v32 = vpop.f32.mrb[17].mxu1  ;;  %v10264_v7 = vpop.f32.mrb[25].mxu0 }
 0x246   : > { %v2766_v39 = vrot.slane %v2751_v29, %v10810_v10  ;;  %v2102_v8 = vcombine.high %v2094_v42, %v2094_v42  ;;  %v2110_v12 = vrot.slane %v2094_v42, %v10810_v10  ;;  %v2595_v18 = vrot.slane %v2581_v63, %v10810_v10  ;;  %v11477_v6 = vpop.f32.mrb[18].mxu1  ;;  %v11479_v13 = vpop.f32.mrb[26].mxu0 }
 0x247   : > { %v11482_v9 = vadd.f32 %v11387_v24, %v2270_v2  ;;  %v2752_v3 = vcombine.low %v2737_v59, %v2744_v4  ;;  %v2103_v15 = vcombine.high %v2101_v58, %v2101_v58  ;;  %v2117_v11 = vrot.slane %v2101_v58, %v10810_v10  ;;  %v10249_v19 = vpop.f32.mrb[19].mxu1  ;;  %v10265_v20 = vpop.f32.mrb[27].mxu0 }
 0x248   : > { %v2124_v22 = vrot.slane %v2102_v8, %v10810_v10  ;;  %v2272_v23 = vcombine.low %v2086_v37, %v2110_v12  ;;  %v2596_v25 = vcombine.high %v2588_v5, %v2588_v5  ;;  %v2597_v33 = vcombine.high %v2595_v18, %v2595_v18 }
 0x249   : > { %v2759_v38 = vrot.slane %v2752_v3, %v10810_v10  ;;  %v2131_v28 = vrot.slane %v2103_v15, %v10810_v10  ;;  %v2604_v34 = vrot.slane %v2588_v5, %v10810_v10  ;;  %v2611_v61 = vrot.slane %v2595_v18, %v10810_v10 }
 0x24a   : > { %v2286_v41 = vrot.slane %v2272_v23, %v10810_v10  ;;  %v2293_v45 = vrot.slane %v2124_v22, %v10810_v10  ;;  %v2618_v46 = vrot.slane %v2596_v25, %v10810_v10  ;;  %v2625_v35 = vrot.slane %v2597_v33, %v10810_v10 }
 0x24b   : > { %v11494_v47 = vcombine.low %v2759_v38, %v2766_v39  ;;  %v2310_v21 = vcombine.low %v2117_v11, %v2131_v28  ;;  %v9840_v60 = vcombine.high %v2117_v11, %v2131_v28  ;;  %v2626_v48 = vcombine.high %v2604_v34, %v2604_v34 }
 0x24c   : > { %v2294_v30 = vcombine.low %v2279_v51, %v2286_v41  ;;  %v2308_v49 = vrot.slane %v2293_v45, %v10810_v10  ;;  %v2627_v50 = vcombine.high %v2611_v61, %v2611_v61  ;;  %v2769_v52 = vcombine.low %v2604_v34, %v2618_v46  ;;  %v11497_v53 = vpop.f32.mrb[20].mxu1  ;;  %v11499_v56 = vpop.f32.mrb[28].mxu0 }
 0x24d   : > { %v2318_v37 = vrot.slane %v2310_v21, %v10810_v10  ;;  %v2325_v43 = vrot.slane %v9840_v60, %v10810_v10  ;;  %v2790_v57 = vrot.slane %v2626_v48, %v10810_v10  ;;  %v2140_v59 = vrot.slane %v11398_v26, %v10810_v10  ;;  %v10252_v62 = vpop.f32.mrb[21].mxu1  ;;  %v10268_v29 = vpop.f32.mrb[29].mxu0 }
 0x24e   : > { %v2301_v51 = vrot.slane %v2294_v30, %v10810_v10  ;;  %v2783_v42 = vrot.slane %v2769_v52, %v10810_v10  ;;  %v2807_v63 = vcombine.low %v2625_v35, %v2627_v50  ;;  %v2628_v2 = vcombine.high %v2625_v35, %v2625_v35  ;;  %v2926_v4 = vpop.f32.mrb[22].mxu1  ;;  %v3596_v58 = vpop.f32.mrb[30].mxu0 }
 0x24f   : > { %v2333_v5 = vcombine.low %v2318_v37, %v2325_v43  ;;  %v2805_v32 = vrot.slane %v2790_v57, %v10810_v10  ;;  %v2147_v7 = vrot.slane %v2140_v59, %v10810_v10  ;;  %v2635_v39 = vrot.slane %v11400_v40, %v10810_v10  ;;  %v10253_v8 = vpop.f32.mrb[23].mxu1  ;;  %v10269_v26 = vpop.f32.mrb[31].mxu0 }
 0x250   : > { %v2309_v12 = vcombine.low %v2301_v51, %v2308_v49  ;;  %v2791_v18 = vcombine.low %v2776_v44, %v2783_v42  ;;  %v2815_v3 = vrot.slane %v2807_v63, %v10810_v10  ;;  %v2934_v15 = vcombine.high %v11429_v16, %v11429_v16 }
 0x251   : > { %v2332_v11 = vrot.slane %v2147_v7, %v10810_v10  ;;  %v2340_v19 = vrot.slane %v2333_v5, %v10810_v10  ;;  %v2636_v20 = vcombine.high %v2635_v39, %v2635_v39  ;;  %v2643_v22 = vrot.slane %v2635_v39, %v10810_v10 }
 0x252   : > { %v2357_v40 = vadd.f32 %v11387_v24, %v2309_v12  ;;  %v2798_v23 = vrot.slane %v2791_v18, %v10810_v10  ;;  %v2941_v31 = vrot.slane %v11429_v16, %v10810_v10  ;;  %v2948_v44 = vrot.slane %v2934_v15, %v10810_v10 }
 0x253   : > { %v2347_v25 = vrot.slane %v2332_v11, %v10810_v10  ;;  %v2650_v33 = vrot.slane %v2636_v20, %v10810_v10  ;;  %v2808_v38 = vcombine.low %v2628_v2, %v2643_v22  ;;  %v3604_v28 = vcombine.high %v11431_v17, %v11431_v17 }
 0x254   : > { %v2806_v34 = vcombine.low %v2798_v23, %v2805_v32  ;;  %v2949_v61 = vcombine.high %v2941_v31, %v2941_v31  ;;  %v2950_v41 = vcombine.high %v2948_v44, %v2948_v44  ;;  %v2957_v45 = vrot.slane %v2941_v31, %v10810_v10  ;;  %v11531_v46 = vpop.f32.mrb[24].mxu1  ;;  %v11533_v35 = vpop.f32.mrb[32].mxu0 }
 0x255   : > { %v2348_v16 = vcombine.low %v2340_v19, %v2347_v25  ;;  %v2822_v21 = vrot.slane %v2808_v38, %v10810_v10  ;;  %v2829_v60 = vrot.slane %v2650_v33, %v10810_v10  ;;  %v2964_v48 = vrot.slane %v2948_v44, %v10810_v10  ;;  %v10276_v30 = vpop.f32.mrb[25].mxu1  ;;  %v10292_v49 = vpop.f32.mrb[33].mxu0 }
 0x256   : > { %v11538_v50 = vadd.f32 %v2806_v34, %v2357_v40  ;;  %v2971_v52 = vrot.slane %v2949_v61, %v10810_v10  ;;  %v2978_v37 = vrot.slane %v2950_v41, %v10810_v10  ;;  %v3611_v43 = vrot.slane %v11431_v17, %v10810_v10  ;;  %v11544_v57 = vpop.f32.mrb[26].mxu1  ;;  %v11546_v59 = vpop.f32.mrb[34].mxu0 }
 0x257   : > { %v2358_v62 = vadd.f32 %v11387_v24, %v2348_v16  ;;  %v2830_v29 = vcombine.low %v2815_v3, %v2822_v21  ;;  %v2844_v51 = vrot.slane %v2829_v60, %v10810_v10  ;;  %v2980_v42 = vcombine.high %v2964_v48, %v2964_v48  ;;  %v10277_v63 = vpop.f32.mrb[27].mxu1  ;;  %v10293_v2 = vpop.f32.mrb[35].mxu0 }
 0x258   : > { %v9861_v4 = vcombine.high %v2957_v45, %v2971_v52  ;;  %v3150_v58 = vcombine.low %v2964_v48, %v2978_v37  ;;  %v3618_v5 = vrot.slane %v3604_v28, %v10810_v10  ;;  %v3619_v32 = vcombine.high %v3611_v43, %v3611_v43 }
 0x259   : > { %v2837_v7 = vrot.slane %v2830_v29, %v10810_v10  ;;  %v3171_v17 = vrot.slane %v2980_v42, %v10810_v10  ;;  %v3627_v39 = vrot.slane %v3611_v43, %v10810_v10  ;;  %v2982_v24 = vcombine.high %v11437_v36, %v11437_v36 }
 0x25a   : > { %v3157_v8 = vrot.slane %v9861_v4, %v10810_v10  ;;  %v3164_v26 = vrot.slane %v3150_v58, %v10810_v10  ;;  %v3620_v12 = vcombine.high %v3618_v5, %v3618_v5  ;;  %v3634_v18 = vrot.slane %v3618_v5, %v10810_v10 }
 0x25b   : > { %v2845_v3 = vcombine.low %v2837_v7, %v2844_v51  ;;  %v3186_v15 = vrot.slane %v3171_v17, %v10810_v10  ;;  %v3641_v11 = vrot.slane %v3619_v32, %v10810_v10  ;;  %v2989_v19 = vrot.slane %v11437_v36, %v10810_v10 }
 0x25c   : > { %v3172_v20 = vcombine.low %v3157_v8, %v3164_v26  ;;  %v3648_v22 = vrot.slane %v3620_v12, %v10810_v10  ;;  %v3832_v40 = vrot.slane %v3634_v18, %v10810_v10  ;;  %v2996_v23 = vrot.slane %v2982_v24, %v10810_v10  ;;  %v11566_v31 = vpop.f32.mrb[28].mxu1  ;;  %v11568_v44 = vpop.f32.mrb[36].mxu0 }
 0x25d   : > { %v11570_v25 = vadd.f32 %v2845_v3, %v2358_v62  ;;  %v3810_v33 = vcombine.low %v3627_v39, %v3641_v11  ;;  %v9881_v38 = vcombine.high %v3627_v39, %v3641_v11  ;;  %v2997_v28 = vcombine.high %v2989_v19, %v2989_v19  ;;  %v10280_v34 = vpop.f32.mrb[29].mxu1  ;;  %v10296_v61 = vpop.f32.mrb[37].mxu0 }
 0x25e   : > { %v3179_v36 = vrot.slane %v3172_v20, %v10810_v10  ;;  %v3847_v41 = vrot.slane %v3832_v40, %v10810_v10  ;;  %v2998_v45 = vcombine.high %v2996_v23, %v2996_v23  ;;  %v3005_v16 = vrot.slane %v2989_v19, %v10810_v10  ;;  %v11575_v21 = vpop.f32.mrb[30].mxu1  ;;  %v11577_v60 = vpop.f32.mrb[38].mxu0 }
 0x25f   : > { %v3818_v48 = vrot.slane %v3810_v33, %v10810_v10  ;;  %v3825_v30 = vrot.slane %v9881_v38, %v10810_v10  ;;  %v3012_v49 = vrot.slane %v2996_v23, %v10810_v10  ;;  %v3019_v52 = vrot.slane %v2997_v28, %v10810_v10  ;;  %v10281_v37 = vpop.f32.mrb[31].mxu1  ;;  %v10297_v43 = vpop.f32.mrb[39].mxu0 }
 0x260   : > { %v3187_v62 = vcombine.low %v3179_v36, %v3186_v15  ;;  %v3026_v29 = vrot.slane %v2998_v45, %v10810_v10  ;;  %v3027_v51 = vcombine.high %v3005_v16, %v3005_v16  ;;  %v3651_v42 = vcombine.high %v3648_v22, %v3648_v22 }
 0x261   : > { %v3833_v63 = vcombine.low %v3818_v48, %v3825_v30  ;;  %v3028_v2 = vcombine.high %v3019_v52, %v3019_v52  ;;  %v3652_v4 = vcombine.high %v11439_v27, %v11439_v27  ;;  %v3659_v58 = vrot.slane %v11439_v27, %v10810_v10 }
 0x262   : > { %v3349_v5 = vadd.f32 %v3187_v62, %v11415_v14  ;;  %v3188_v32 = vcombine.low %v3019_v52, %v3027_v51  ;;  %v3210_v7 = vrot.slane %v3026_v29, %v10810_v10  ;;  %v11592_v17 = vadd.f32 %v11494_v47, %v11482_v9 }
 0x263   : > { %v3840_v39 = vrot.slane %v3833_v63, %v10810_v10  ;;  %v3189_v24 = vcombine.low %v3028_v2, %v3012_v49  ;;  %v3666_v8 = vrot.slane %v3652_v4, %v10810_v10  ;;  %v3667_v26 = vcombine.high %v3659_v58, %v3659_v58 }
 0x264   : > { %v3196_v12 = vrot.slane %v3188_v32, %v10810_v10  ;;  %v3225_v18 = vrot.slane %v3210_v7, %v10810_v10  ;;  %v3675_v27 = vrot.slane %v3659_v58, %v10810_v10  ;;  %v3029_v14 = vcombine.high %v11466_v0, %v11466_v0  ;;  %v11601_v3 = vpop.f32.mrb[32].mxu1  ;;  %v11603_v15 = vpop.f32.mrb[40].mxu0 }
 0x265   : > { %v3848_v9 = vcombine.low %v3840_v39, %v3847_v41  ;;  %v3203_v47 = vrot.slane %v3189_v24, %v10810_v10  ;;  %v3668_v11 = vcombine.high %v3666_v8, %v3666_v8  ;;  %v3682_v19 = vrot.slane %v3666_v8, %v10810_v10  ;;  %v10284_v20 = vpop.f32.mrb[33].mxu1  ;;  %v10300_v22 = vpop.f32.mrb[41].mxu0 }
 0x266   : > { %v3689_v40 = vrot.slane %v3667_v26, %v10810_v10  ;;  %v3697_v23 = vcombine.high %v3675_v27, %v3675_v27  ;;  %v3849_v33 = vcombine.low %v3651_v42, %v3675_v27  ;;  %v3036_v38 = vrot.slane %v11466_v0, %v10810_v10  ;;  %v4085_v28 = vpop.f32.mrb[34].mxu1  ;;  %v4582_v34 = vpop.f32.mrb[42].mxu0 }
 0x267   : > { %v11610_v61 = vadd.f32 %v3848_v9, %v3349_v5  ;;  %v3211_v36 = vcombine.low %v3196_v12, %v3203_v47  ;;  %v3696_v41 = vrot.slane %v3668_v11, %v10810_v10  ;;  %v3043_v45 = vrot.slane %v3029_v14, %v10810_v10  ;;  %v10285_v16 = vpop.f32.mrb[35].mxu1  ;;  %v10301_v48 = vpop.f32.mrb[43].mxu0 }
 0x268   : > { %v3699_v30 = vcombine.high %v3689_v40, %v3689_v40  ;;  %v3850_v49 = vcombine.low %v3689_v40, %v3697_v23  ;;  %v3857_v52 = vrot.slane %v3849_v33, %v10810_v10  ;;  %v3044_v37 = vcombine.high %v3036_v38, %v3036_v38 }
 0x269   : > { %v3218_v43 = vrot.slane %v3211_v36, %v10810_v10  ;;  %v11616_v62 = vcombine.high %v3682_v19, %v3696_v41  ;;  %v3045_v0 = vcombine.high %v3043_v45, %v3043_v45  ;;  %v3052_v29 = vrot.slane %v3036_v38, %v10810_v10 }
 0x26a   : > { %v3864_v51 = vrot.slane %v3850_v49, %v10810_v10  ;;  %v3871_v42 = vrot.slane %v3699_v30, %v10810_v10  ;;  %v3059_v63 = vrot.slane %v3043_v45, %v10810_v10  ;;  %v3066_v2 = vrot.slane %v3044_v37, %v10810_v10 }
 0x26b   : > { %v3226_v4 = vcombine.low %v3218_v43, %v3225_v18  ;;  %v3896_v58 = vrot.slane %v11616_v62, %v10810_v10  ;;  %v3073_v5 = vrot.slane %v3045_v0, %v10810_v10  ;;  %v3701_v32 = vcombine.high %v11468_v1, %v11468_v1 }
 0x26c   : > { %v3872_v7 = vcombine.low %v3857_v52, %v3864_v51  ;;  %v3886_v39 = vrot.slane %v3871_v42, %v10810_v10  ;;  %v3227_v24 = vcombine.low %v3052_v29, %v3066_v2  ;;  %v9862_v8 = vcombine.high %v3052_v29, %v3066_v2  ;;  %v11629_v26 = vpop.f32.mrb[36].mxu1  ;;  %v11631_v12 = vpop.f32.mrb[44].mxu0 }
 0x26d   : > { %v11634_v27 = vadd.f32 %v3226_v4, %v11451_v55  ;;  %v3249_v18 = vrot.slane %v3059_v63, %v10810_v10  ;;  %v3708_v14 = vrot.slane %v11468_v1, %v10810_v10  ;;  %v3715_v9 = vrot.slane %v3701_v32, %v10810_v10  ;;  %v10308_v47 = vpop.f32.mrb[37].mxu1  ;;  %v10324_v11 = vpop.f32.mrb[45].mxu0 }
 0x26e   : > { %v3879_v19 = vrot.slane %v3872_v7, %v10810_v10  ;;  %v3235_v20 = vrot.slane %v3227_v24, %v10810_v10  ;;  %v3242_v22 = vrot.slane %v9862_v8, %v10810_v10  ;;  %v3076_v40 = vcombine.high %v3073_v5, %v3073_v5  ;;  %v11643_v23 = vpop.f32.mrb[38].mxu1  ;;  %v11645_v55 = vpop.f32.mrb[46].mxu0 }
 0x26f   : > { %v3264_v33 = vrot.slane %v3249_v18, %v10810_v10  ;;  %v3716_v38 = vcombine.high %v3708_v14, %v3708_v14  ;;  %v3717_v28 = vcombine.high %v3715_v9, %v3715_v9  ;;  %v3724_v1 = vrot.slane %v3708_v14, %v10810_v10  ;;  %v10309_v34 = vpop.f32.mrb[39].mxu1  ;;  %v10325_v36 = vpop.f32.mrb[47].mxu0 }
 0x270   : > { %v11649_v41 = vcombine.low %v3879_v19, %v3886_v39  ;;  %v3250_v45 = vcombine.low %v3235_v20, %v3242_v22  ;;  %v3731_v16 = vrot.slane %v3715_v9, %v10810_v10  ;;  %v3077_v48 = vcombine.high %v11477_v6, %v11477_v6 }
 0x271   : > { %v3738_v30 = vrot.slane %v3716_v38, %v10810_v10  ;;  %v3745_v49 = vrot.slane %v3717_v28, %v10810_v10  ;;  %v3746_v52 = vcombine.high %v3724_v1, %v3724_v1  ;;  %v3084_v37 = vrot.slane %v11477_v6, %v10810_v10 }
 0x272   : > { %v3257_v43 = vrot.slane %v3250_v45, %v10810_v10  ;;  %v3747_v62 = vcombine.high %v3731_v16, %v3731_v16  ;;  %v3091_v0 = vrot.slane %v3077_v48, %v10810_v10  ;;  %v3749_v29 = vcombine.high %v11479_v13, %v11479_v13 }
 0x273   : > { %v3889_v51 = vcombine.low %v3724_v1, %v3738_v30  ;;  %v3910_v42 = vrot.slane %v3746_v52, %v10810_v10  ;;  %v3092_v63 = vcombine.high %v3084_v37, %v3084_v37  ;;  %v3100_v2 = vrot.slane %v3084_v37, %v10810_v10 }
 0x274   : > { %v3265_v4 = vcombine.low %v3257_v43, %v3264_v33  ;;  %v11664_v5 = vcombine.low %v3745_v49, %v3747_v62  ;;  %v3093_v32 = vcombine.high %v3091_v0, %v3091_v0  ;;  %v3107_v6 = vrot.slane %v3091_v0, %v10810_v10  ;;  %v11667_v7 = vpop.f32.mrb[40].mxu1  ;;  %v11669_v39 = vpop.f32.mrb[48].mxu0 }
 0x275   : > { %v3903_v24 = vrot.slane %v3889_v51, %v10810_v10  ;;  %v3925_v8 = vrot.slane %v3910_v42, %v10810_v10  ;;  %v3114_v18 = vrot.slane %v3092_v63, %v10810_v10  ;;  %v3122_v14 = vcombine.high %v3100_v2, %v3100_v2  ;;  %v10312_v9 = vpop.f32.mrb[41].mxu1  ;;  %v10328_v47 = vpop.f32.mrb[49].mxu0 }
 0x276   : > { %v3351_v11 = vadd.f32 %v3265_v4, %v11592_v17  ;;  %v3935_v19 = vrot.slane %v11664_v5, %v10810_v10  ;;  %v3121_v20 = vrot.slane %v3093_v32, %v10810_v10  ;;  %v3266_v22 = vcombine.low %v3076_v40, %v3100_v2  ;;  %v11678_v33 = vpop.f32.mrb[42].mxu1  ;;  %v11680_v38 = vpop.f32.mrb[50].mxu0 }
 0x277   : > { %v3911_v28 = vcombine.low %v3896_v58, %v3903_v24  ;;  %v3124_v1 = vcombine.high %v3114_v18, %v3114_v18  ;;  %v3267_v34 = vcombine.low %v3114_v18, %v3122_v14  ;;  %v3748_v36 = vcombine.high %v3745_v49, %v3745_v49  ;;  %v10313_v45 = vpop.f32.mrb[43].mxu1  ;;  %v10329_v16 = vpop.f32.mrb[51].mxu0 }
 0x278   : > { %v3274_v48 = vrot.slane %v3266_v22, %v10810_v10  ;;  %v9863_v30 = vcombine.high %v3107_v6, %v3121_v20  ;;  %v3756_v17 = vrot.slane %v11479_v13, %v10810_v10  ;;  %v3763_v52 = vrot.slane %v3749_v29, %v10810_v10 }
 0x279   : > { %v3918_v40 = vrot.slane %v3911_v28, %v10810_v10  ;;  %v3281_v37 = vrot.slane %v3267_v34, %v10810_v10  ;;  %v3288_v43 = vrot.slane %v3124_v1, %v10810_v10  ;;  %v3132_v58 = vrot.slane %v11497_v53, %v10810_v10 }
 0x27a   : > { %v3313_v49 = vrot.slane %v9863_v30, %v10810_v10  ;;  %v3764_v62 = vcombine.high %v3756_v17, %v3756_v17  ;;  %v3765_v0 = vcombine.high %v3763_v52, %v3763_v52  ;;  %v3772_v51 = vrot.slane %v3756_v17, %v10810_v10 }
 0x27b   : > { %v3926_v42 = vcombine.low %v3918_v40, %v3925_v8  ;;  %v3289_v63 = vcombine.low %v3274_v48, %v3281_v37  ;;  %v3303_v13 = vrot.slane %v3288_v43, %v10810_v10  ;;  %v3779_v29 = vrot.slane %v3763_v52, %v10810_v10 }
 0x27c   : > { %v3786_v2 = vrot.slane %v3764_v62, %v10810_v10  ;;  %v3793_v4 = vrot.slane %v3765_v0, %v10810_v10  ;;  %v3928_v5 = vcombine.low %v3748_v36, %v3772_v51  ;;  %v3133_v32 = vcombine.high %v3132_v58, %v3132_v58  ;;  %v11697_v6 = vpop.f32.mrb[44].mxu1  ;;  %v11699_v53 = vpop.f32.mrb[52].mxu0 }
 0x27d   : > { %v11701_v24 = vadd.f32 %v3926_v42, %v3351_v11  ;;  %v3296_v18 = vrot.slane %v3289_v63, %v10810_v10  ;;  %v3140_v8 = vrot.slane %v3132_v58, %v10810_v10  ;;  %v3802_v14 = vrot.slane %v11499_v56, %v10810_v10  ;;  %v10316_v9 = vpop.f32.mrb[45].mxu1  ;;  %v10332_v47 = vpop.f32.mrb[53].mxu0 }
 0x27e   : > { %v3942_v20 = vrot.slane %v3928_v5, %v10810_v10  ;;  %v3949_v22 = vrot.slane %v3786_v2, %v10810_v10  ;;  %v3966_v28 = vcombine.low %v3779_v29, %v3793_v4  ;;  %v9883_v1 = vcombine.high %v3779_v29, %v3793_v4  ;;  %v5242_v34 = vpop.f32.mrb[46].mxu1  ;;  %v5731_v36 = vpop.f32.mrb[54].mxu0 }
 0x27f   : > { %v3304_v45 = vcombine.low %v3296_v18, %v3303_v13  ;;  %v3147_v11 = vrot.slane %v3133_v32, %v10810_v10  ;;  %v3148_v16 = vcombine.high %v3140_v8, %v3140_v8  ;;  %v3809_v48 = vrot.slane %v3802_v14, %v10810_v10  ;;  %v10317_v30 = vpop.f32.mrb[47].mxu1  ;;  %v10333_v17 = vpop.f32.mrb[55].mxu0 }
 0x280   : > { %v3950_v52 = vcombine.low %v3935_v19, %v3942_v20  ;;  %v3964_v56 = vrot.slane %v3949_v22, %v10810_v10  ;;  %v3974_v40 = vrot.slane %v3966_v28, %v10810_v10  ;;  %v3981_v37 = vrot.slane %v9883_v1, %v10810_v10 }
 0x281   : > { %v3352_v43 = vadd.f32 %v3304_v45, %v11538_v50  ;;  %v3306_v58 = vcombine.low %v3140_v8, %v3147_v11  ;;  %v3327_v62 = vrot.slane %v3148_v16, %v10810_v10  ;;  %v3988_v0 = vrot.slane %v3809_v48, %v10810_v10 }
 0x282   : > { %v3957_v51 = vrot.slane %v3950_v52, %v10810_v10  ;;  %v3989_v42 = vcombine.low %v3974_v40, %v3981_v37  ;;  %v4093_v63 = vcombine.high %v11531_v46, %v11531_v46  ;;  %v4100_v19 = vrot.slane %v11531_v46, %v10810_v10 }
 0x283   : > { %v3320_v13 = vrot.slane %v3306_v58, %v10810_v10  ;;  %v3342_v29 = vrot.slane %v3327_v62, %v10810_v10  ;;  %v4003_v50 = vrot.slane %v3988_v0, %v10810_v10  ;;  %v4590_v2 = vcombine.high %v11533_v35, %v11533_v35 }
 0x284   : > { %v3965_v4 = vcombine.low %v3957_v51, %v3964_v56  ;;  %v3996_v5 = vrot.slane %v3989_v42, %v10810_v10  ;;  %v4107_v32 = vrot.slane %v4093_v63, %v10810_v10  ;;  %v4108_v18 = vcombine.high %v4100_v19, %v4100_v19  ;;  %v11729_v8 = vpop.f32.mrb[48].mxu1 }
 0x285   : > { %v3328_v14 = vcombine.low %v3313_v49, %v3320_v13  ;;  %v4116_v46 = vrot.slane %v4100_v19, %v10810_v10  ;;  %v4597_v9 = vrot.slane %v11533_v35, %v10810_v10  ;;  %v4604_v47 = vrot.slane %v4590_v2, %v10810_v10  ;;  %v10340_v20 = vpop.f32.mrb[49].mxu1 }
 0x286   : > { %v11735_v22 = vadd.f32 %v3965_v4, %v3352_v43  ;;  %v4004_v28 = vcombine.low %v3996_v5, %v4003_v50  ;;  %v4109_v1 = vcombine.high %v4107_v32, %v4107_v32  ;;  %v4123_v34 = vrot.slane %v4107_v32, %v10810_v10  ;;  %v11738_v36 = vpop.f32.mrb[50].mxu1 }
 0x287   : > { %v3335_v45 = vrot.slane %v3328_v14, %v10810_v10  ;;  %v4130_v49 = vrot.slane %v4108_v18, %v10810_v10  ;;  %v4138_v11 = vcombine.high %v4116_v46, %v4116_v46  ;;  %v4605_v16 = vcombine.high %v4597_v9, %v4597_v9  ;;  %v10341_v48 = vpop.f32.mrb[51].mxu1 }
 0x288   : > { %v4137_v35 = vrot.slane %v4109_v1, %v10810_v10  ;;  %v4606_v30 = vcombine.high %v4604_v47, %v4604_v47  ;;  %v4613_v17 = vrot.slane %v4597_v9, %v10810_v10  ;;  %v4620_v52 = vrot.slane %v4604_v47, %v10810_v10 }
 0x289   : > { %v3343_v56 = vcombine.low %v3335_v45, %v3342_v29  ;;  %v4139_v40 = vcombine.high %v4130_v49, %v4130_v49  ;;  %v4307_v37 = vcombine.low %v4130_v49, %v4138_v11  ;;  %v4627_v43 = vrot.slane %v4605_v16, %v10810_v10 }
 0x28a   : > { %v4329_v58 = vrot.slane %v4137_v35, %v10810_v10  ;;  %v4634_v62 = vrot.slane %v4606_v30, %v10810_v10  ;;  %v4636_v0 = vcombine.high %v4620_v52, %v4620_v52  ;;  %v11750_v51 = vadd.f32 %v11649_v41, %v11634_v27 }
 0x28b   : > { %v3353_v42 = vadd.f32 %v3343_v56, %v11570_v25  ;;  %v4308_v63 = vcombine.low %v4139_v40, %v4123_v34  ;;  %v4315_v19 = vrot.slane %v4307_v37, %v10810_v10  ;;  %v9904_v13 = vcombine.high %v4613_v17, %v4627_v43 }
 0x28c   : > { %v4344_v29 = vrot.slane %v4329_v58, %v10810_v10  ;;  %v4806_v50 = vcombine.low %v4620_v52, %v4634_v62  ;;  %v4827_v2 = vrot.slane %v4636_v0, %v10810_v10  ;;  %v4140_v4 = vcombine.high %v11544_v57, %v11544_v57  ;;  %v11758_v5 = vpop.f32.mrb[52].mxu1 }
 0x28d   : > { %v11760_v32 = vadd.f32 %v4004_v28, %v3353_v42  ;;  %v4322_v27 = vrot.slane %v4308_v63, %v10810_v10  ;;  %v4813_v25 = vrot.slane %v9904_v13, %v10810_v10  ;;  %v4147_v41 = vrot.slane %v11544_v57, %v10810_v10  ;;  %v10344_v18 = vpop.f32.mrb[53].mxu1 }
 0x28e   : > { %v4820_v14 = vrot.slane %v4806_v50, %v10810_v10  ;;  %v4842_v46 = vrot.slane %v4827_v2, %v10810_v10  ;;  %v4154_v9 = vrot.slane %v4140_v4, %v10810_v10  ;;  %v4638_v47 = vcombine.high %v11546_v59, %v11546_v59  ;;  %v11771_v20 = vpop.f32.mrb[54].mxu1 }
 0x28f   : > { %v4330_v28 = vcombine.low %v4315_v19, %v4322_v27  ;;  %v4155_v1 = vcombine.high %v4147_v41, %v4147_v41  ;;  %v4163_v34 = vrot.slane %v4147_v41, %v10810_v10  ;;  %v4645_v45 = vrot.slane %v11546_v59, %v10810_v10  ;;  %v10345_v57 = vpop.f32.mrb[55].mxu1 }
 0x290   : > { %v4828_v49 = vcombine.low %v4813_v25, %v4820_v14  ;;  %v4156_v11 = vcombine.high %v4154_v9, %v4154_v9  ;;  %v4170_v16 = vrot.slane %v4154_v9, %v10810_v10  ;;  %v4652_v48 = vrot.slane %v4638_v47, %v10810_v10 }
 0x291   : > { %v4337_v35 = vrot.slane %v4330_v28, %v10810_v10  ;;  %v4177_v30 = vrot.slane %v4155_v1, %v10810_v10  ;;  %v4653_v17 = vcombine.high %v4645_v45, %v4645_v45  ;;  %v4661_v52 = vrot.slane %v4645_v45, %v10810_v10 }
 0x292   : > { %v4835_v56 = vrot.slane %v4828_v49, %v10810_v10  ;;  %v4184_v40 = vrot.slane %v4156_v11, %v10810_v10  ;;  %v4368_v59 = vrot.slane %v4170_v16, %v10810_v10  ;;  %v4654_v37 = vcombine.high %v4652_v48, %v4652_v48 }
 0x293   : > { %v4345_v43 = vcombine.low %v4337_v35, %v4344_v29  ;;  %v4346_v58 = vcombine.low %v4163_v34, %v4177_v30  ;;  %v9893_v62 = vcombine.high %v4163_v34, %v4177_v30  ;;  %v4668_v0 = vrot.slane %v4652_v48, %v10810_v10 }
 0x294   : > { %v11785_v42 = vcombine.low %v4835_v56, %v4842_v46  ;;  %v4383_v63 = vrot.slane %v4368_v59, %v10810_v10  ;;  %v4675_v19 = vrot.slane %v4653_v17, %v10810_v10  ;;  %v4682_v13 = vrot.slane %v4654_v37, %v10810_v10  ;;  %v11790_v50 = vpop.f32.mrb[56].mxu1 }
 0x295   : > { %v11793_v2 = vadd.f32 %v4345_v43, %v11610_v61  ;;  %v4354_v4 = vrot.slane %v4346_v58, %v10810_v10  ;;  %v4361_v29 = vrot.slane %v9893_v62, %v10810_v10  ;;  %v4683_v27 = vcombine.high %v4661_v52, %v4661_v52  ;;  %v10348_v25 = vpop.f32.mrb[57].mxu1 }
 0x296   : > { %v4684_v41 = vcombine.high %v4675_v19, %v4675_v19  ;;  %v4866_v18 = vrot.slane %v4682_v13, %v10810_v10  ;;  %v4187_v14 = vcombine.high %v4184_v40, %v4184_v40  ;;  %v4188_v46 = vcombine.high %v11566_v31, %v11566_v31  ;;  %v6228_v9 = vpop.f32.mrb[58].mxu1 }
 0x297   : > { %v4369_v47 = vcombine.low %v4354_v4, %v4361_v29  ;;  %v4844_v28 = vcombine.low %v4675_v19, %v4683_v27  ;;  %v4195_v61 = vrot.slane %v11566_v31, %v10810_v10  ;;  %v4685_v1 = vcombine.high %v11568_v44, %v11568_v44  ;;  %v10349_v34 = vpop.f32.mrb[59].mxu1  ;;  %v10559_v9 = vld [vmem:[%s12683_s5] sm:$0xff]  }
 0x298   : > { %v4845_v45 = vcombine.low %v4684_v41, %v4668_v0  ;;  %v4881_v57 = vrot.slane %v4866_v18, %v10810_v10  ;;  %v4202_v49 = vrot.slane %v4188_v46, %v10810_v10  ;;  %v4692_v11 = vrot.slane %v11568_v44, %v10810_v10  ;;  %10351 = vmatpush3.bf16.msra.mxu0 %v10559_v9 }
 0x299   : > { %v4376_v16 = vrot.slane %v4369_v47, %v10810_v10  ;;  %v4852_v48 = vrot.slane %v4844_v28, %v10810_v10  ;;  %v4203_v35 = vcombine.high %v4195_v61, %v4195_v61  ;;  %v4211_v30 = vrot.slane %v4195_v61, %v10810_v10  ;;  %v10560_v47 = vld [vmem:[%s12683_s5 + $0x10] sm:$0xff]   ;;  %10352 = vmatprep.subr.bf16.mxu0 %v10692_v54 }
 0x29a   : > { %v4859_v31 = vrot.slane %v4845_v45, %v10810_v10  ;;  %v4204_v17 = vcombine.high %v4202_v49, %v4202_v49  ;;  %v4218_v52 = vrot.slane %v4202_v49, %v10810_v10  ;;  %v4699_v56 = vrot.slane %v4685_v1, %v10810_v10  ;;  %10359 = vmatpush3.bf16.msra.mxu1 %v10560_v47 }
 0x29b   : > { %v4384_v40 = vcombine.low %v4376_v16, %v4383_v63  ;;  %v4225_v59 = vrot.slane %v4203_v35, %v10810_v10  ;;  %v4233_v37 = vcombine.high %v4211_v30, %v4211_v30  ;;  %v4385_v43 = vcombine.low %v4187_v14, %v4211_v30  ;;  %10360 = vmatprep.subr.bf16.mxu1 %v10692_v54 }
 0x29c   : > { %v4867_v44 = vcombine.low %v4852_v48, %v4859_v31  ;;  %v4232_v58 = vrot.slane %v4204_v17, %v10810_v10  ;;  %v4700_v62 = vcombine.high %v4692_v11, %v4692_v11  ;;  %v4701_v0 = vcombine.high %v4699_v56, %v4699_v56  ;;  %v10561_v48 = vld [vmem:[%s12683_s5 + $0x8] sm:$0xff]   ;;  %v10562_v17 = vld [vmem:[%s12683_s5 + $0x18] sm:$0xff]  }
 0x29d   : > { %v4508_v19 = vadd.f32 %v4384_v40, %v11750_v51  ;;  %v4235_v13 = vcombine.high %v4225_v59, %v4225_v59  ;;  %v4386_v4 = vcombine.low %v4225_v59, %v4233_v37  ;;  %v4393_v29 = vrot.slane %v4385_v43, %v10810_v10  ;;  %10353 = vmatpush3.bf16.msra.mxu0 %v10561_v48 }
 0x29e   : > { %v4874_v27 = vrot.slane %v4867_v44, %v10810_v10  ;;  %v11819_v25 = vcombine.high %v4218_v52, %v4232_v58  ;;  %v4708_v63 = vrot.slane %v4692_v11, %v10810_v10  ;;  %v4715_v41 = vrot.slane %v4699_v56, %v10810_v10  ;;  %10361 = vmatpush3.bf16.msra.mxu1 %v10562_v17 }
 0x29f   : > { %v4400_v18 = vrot.slane %v4386_v4, %v10810_v10  ;;  %v4407_v14 = vrot.slane %v4235_v13, %v10810_v10  ;;  %v4722_v46 = vrot.slane %v4700_v62, %v10810_v10  ;;  %v4729_v51 = vrot.slane %v4701_v0, %v10810_v10  ;;  %10366 = vmatprep.subr.bf16.mxu0 %v10692_v54 }
 0x2a0   : > { %v4882_v28 = vcombine.low %v4874_v27, %v4881_v57  ;;  %v4432_v61 = vrot.slane %v11819_v25, %v10810_v10  ;;  %v4905_v1 = vrot.slane %v4715_v41, %v10810_v10  ;;  %v4237_v34 = vcombine.high %v11575_v21, %v11575_v21  ;;  %10374 = vmatprep.subr.bf16.mxu1 %v10692_v54 }
 0x2a1   : > { %v4408_v45 = vcombine.low %v4393_v29, %v4400_v18  ;;  %v4422_v49 = vrot.slane %v4407_v14, %v10810_v10  ;;  %v4883_v11 = vcombine.low %v4708_v63, %v4722_v46  ;;  %v9905_v16 = vcombine.high %v4708_v63, %v4722_v46 }
 0x2a2   : > { %v11842_v35 = vadd.f32 %v4882_v28, %v4508_v19  ;;  %v4920_v57 = vrot.slane %v4905_v1, %v10810_v10  ;;  %v4244_v30 = vrot.slane %v11575_v21, %v10810_v10  ;;  %v4251_v31 = vrot.slane %v4237_v34, %v10810_v10 }
 0x2a3   : > { %v4415_v52 = vrot.slane %v4408_v45, %v10810_v10  ;;  %v4891_v56 = vrot.slane %v4883_v11, %v10810_v10  ;;  %v4898_v40 = vrot.slane %v9905_v16, %v10810_v10  ;;  %v4732_v59 = vcombine.high %v4729_v51, %v4729_v51 }
 0x2a4   : > { %v4252_v37 = vcombine.high %v4244_v30, %v4244_v30  ;;  %v4253_v43 = vcombine.high %v4251_v31, %v4251_v31  ;;  %v4260_v21 = vrot.slane %v4244_v30, %v10810_v10  ;;  %v4267_v44 = vrot.slane %v4251_v31, %v10810_v10 }
 0x2a5   : > { %v4423_v58 = vcombine.low %v4415_v52, %v4422_v49  ;;  %v4906_v62 = vcombine.low %v4891_v56, %v4898_v40  ;;  %v4733_v0 = vcombine.high %v11577_v60, %v11577_v60  ;;  %v4740_v19 = vrot.slane %v11577_v60, %v10810_v10 }
 0x2a6   : > { %v4274_v13 = vrot.slane %v4252_v37, %v10810_v10  ;;  %v4281_v4 = vrot.slane %v4253_v43, %v10810_v10  ;;  %v4282_v29 = vcombine.high %v4260_v21, %v4260_v21  ;;  %v4283_v27 = vcombine.high %v4267_v44, %v4267_v44 }
 0x2a7   : > { %v4509_v25 = vadd.f32 %v4423_v58, %v11701_v24  ;;  %v4913_v63 = vrot.slane %v4906_v62, %v10810_v10  ;;  %v4747_v41 = vrot.slane %v4733_v0, %v10810_v10  ;;  %v4748_v18 = vcombine.high %v4740_v19, %v4740_v19 }
 0x2a8   : > { %v4425_v14 = vcombine.low %v4260_v21, %v4274_v13  ;;  %v4446_v60 = vrot.slane %v4282_v29, %v10810_v10  ;;  %v4463_v46 = vcombine.low %v4281_v4, %v4283_v27  ;;  %v4756_v51 = vrot.slane %v4740_v19, %v10810_v10 }
 0x2a9   : > { %v4921_v9 = vcombine.low %v4913_v63, %v4920_v57  ;;  %v4749_v47 = vcombine.high %v4747_v41, %v4747_v41  ;;  %v4763_v28 = vrot.slane %v4747_v41, %v10810_v10  ;;  %v4770_v24 = vrot.slane %v4748_v18, %v10810_v10 }
 0x2aa   : > { %v4439_v1 = vrot.slane %v4425_v14, %v10810_v10  ;;  %v4461_v34 = vrot.slane %v4446_v60, %v10810_v10  ;;  %v4471_v45 = vrot.slane %v4463_v46, %v10810_v10  ;;  %v4778_v49 = vcombine.high %v4756_v51, %v4756_v51 }
 0x2ab   : > { %v11876_v11 = vadd.f32 %v4921_v9, %v4509_v25  ;;  %v4777_v16 = vrot.slane %v4749_v47, %v10810_v10  ;;  %v4780_v48 = vcombine.high %v4770_v24, %v4770_v24  ;;  %v4922_v30 = vcombine.low %v4732_v59, %v4756_v51 }
 0x2ac   : > { %v4447_v31 = vcombine.low %v4432_v61, %v4439_v1  ;;  %v4923_v57 = vcombine.low %v4770_v24, %v4778_v49  ;;  %v4284_v17 = vcombine.high %v4281_v4, %v4281_v4  ;;  %v4291_v52 = vrot.slane %v11601_v3, %v10810_v10 }
 0x2ad   : > { %v4930_v56 = vrot.slane %v4922_v30, %v10810_v10  ;;  %v4944_v40 = vrot.slane %v4780_v48, %v10810_v10  ;;  %v9906_v37 = vcombine.high %v4763_v28, %v4777_v16  ;;  %v4788_v43 = vrot.slane %v11603_v15, %v10810_v10 }
 0x2ae   : > { %v4454_v21 = vrot.slane %v4447_v31, %v10810_v10  ;;  %v4937_v44 = vrot.slane %v4923_v57, %v10810_v10  ;;  %v4292_v58 = vcombine.high %v4291_v52, %v4291_v52  ;;  %v4299_v61 = vrot.slane %v4291_v52, %v10810_v10 }
 0x2af   : > { %v4959_v59 = vrot.slane %v4944_v40, %v10810_v10  ;;  %v4969_v62 = vrot.slane %v9906_v37, %v10810_v10  ;;  %v4789_v3 = vcombine.high %v4788_v43, %v4788_v43  ;;  %v4796_v0 = vrot.slane %v4788_v43, %v10810_v10 }
 0x2b0   : > { %v4462_v19 = vcombine.low %v4454_v21, %v4461_v34  ;;  %v4945_v13 = vcombine.low %v4930_v56, %v4937_v44  ;;  %v4306_v4 = vrot.slane %v4292_v58, %v10810_v10  ;;  %v4464_v29 = vcombine.low %v4284_v17, %v4299_v61 }
 0x2b1   : > { %v4803_v15 = vrot.slane %v4789_v3, %v10810_v10  ;;  %v4804_v27 = vcombine.high %v4796_v0, %v4796_v0  ;;  %v11895_v25 = vadd.f32 %v11785_v42, %v11793_v2  ;;  %v5250_v63 = vcombine.high %v11629_v26, %v11629_v26 }
 0x2b2   : > { %v11900_v41 = vadd.f32 %v4462_v19, %v11735_v22  ;;  %v4952_v18 = vrot.slane %v4945_v13, %v10810_v10  ;;  %v4478_v14 = vrot.slane %v4464_v29, %v10810_v10  ;;  %v4485_v60 = vrot.slane %v4306_v4, %v10810_v10 }
 0x2b3   : > { %v4962_v46 = vcombine.low %v4796_v0, %v4803_v15  ;;  %v4983_v51 = vrot.slane %v4804_v27, %v10810_v10  ;;  %v5257_v9 = vrot.slane %v11629_v26, %v10810_v10  ;;  %v5264_v42 = vrot.slane %v5250_v63, %v10810_v10 }
 0x2b4   : > { %v11909_v2 = vcombine.low %v4952_v18, %v4959_v59  ;;  %v4486_v47 = vcombine.low %v4471_v45, %v4478_v14  ;;  %v4500_v22 = vrot.slane %v4485_v60, %v10810_v10  ;;  %v5739_v28 = vcombine.high %v11631_v12, %v11631_v12 }
 0x2b5   : > { %v4976_v24 = vrot.slane %v4962_v46, %v10810_v10  ;;  %v4998_v1 = vrot.slane %v4983_v51, %v10810_v10  ;;  %v5265_v34 = vcombine.high %v5257_v9, %v5257_v9  ;;  %v5266_v49 = vcombine.high %v5264_v42, %v5264_v42 }
 0x2b6   : > { %v4493_v16 = vrot.slane %v4486_v47, %v10810_v10  ;;  %v5273_v26 = vrot.slane %v5257_v9, %v10810_v10  ;;  %v5280_v48 = vrot.slane %v5264_v42, %v10810_v10  ;;  %v5746_v45 = vrot.slane %v11631_v12, %v10810_v10 }
 0x2b7   : > { %v4984_v30 = vcombine.low %v4969_v62, %v4976_v24  ;;  %v5287_v31 = vrot.slane %v5265_v34, %v10810_v10  ;;  %v5294_v57 = vrot.slane %v5266_v49, %v10810_v10  ;;  %v5753_v17 = vrot.slane %v5739_v28, %v10810_v10 }
 0x2b8   : > { %v4501_v52 = vcombine.low %v4493_v16, %v4500_v22  ;;  %v5478_v56 = vrot.slane %v5280_v48, %v10810_v10  ;;  %v5754_v40 = vcombine.high %v5746_v45, %v5746_v45  ;;  %v5762_v37 = vrot.slane %v5746_v45, %v10810_v10 }
 0x2b9   : > { %v4991_v43 = vrot.slane %v4984_v30, %v10810_v10  ;;  %v5456_v21 = vcombine.low %v5273_v26, %v5287_v31  ;;  %v9920_v44 = vcombine.high %v5273_v26, %v5287_v31  ;;  %v5755_v58 = vcombine.high %v5753_v17, %v5753_v17 }
 0x2ba   : > { %v11928_v12 = vadd.f32 %v4501_v52, %v11760_v32  ;;  %v5493_v61 = vrot.slane %v5478_v56, %v10810_v10  ;;  %v5769_v59 = vrot.slane %v5753_v17, %v10810_v10  ;;  %v5776_v62 = vrot.slane %v5754_v40, %v10810_v10 }
 0x2bb   : > { %v11933_v3 = vcombine.low %v4991_v43, %v4998_v1  ;;  %v5464_v0 = vrot.slane %v5456_v21, %v10810_v10  ;;  %v5471_v19 = vrot.slane %v9920_v44, %v10810_v10  ;;  %v5783_v13 = vrot.slane %v5755_v58, %v10810_v10 }
 0x2bc   : > { %v5784_v4 = vcombine.high %v5762_v37, %v5762_v37  ;;  %v5785_v29 = vcombine.high %v5776_v62, %v5776_v62  ;;  %v5297_v15 = vcombine.high %v5294_v57, %v5294_v57  ;;  %v5298_v32 = vcombine.high %v11643_v23, %v11643_v23 }
 0x2bd   : > { %v5479_v27 = vcombine.low %v5464_v0, %v5471_v19  ;;  %v5975_v63 = vrot.slane %v5783_v13, %v10810_v10  ;;  %v5305_v18 = vrot.slane %v11643_v23, %v10810_v10  ;;  %v5786_v14 = vcombine.high %v11645_v55, %v11645_v55 }
 0x2be   : > { %v5953_v60 = vcombine.low %v5776_v62, %v5784_v4  ;;  %v5954_v46 = vcombine.low %v5785_v29, %v5769_v59  ;;  %v5312_v51 = vrot.slane %v5298_v32, %v10810_v10  ;;  %v5793_v9 = vrot.slane %v11645_v55, %v10810_v10 }
 0x2bf   : > { %v5486_v42 = vrot.slane %v5479_v27, %v10810_v10  ;;  %v5990_v47 = vrot.slane %v5975_v63, %v10810_v10  ;;  %v5313_v22 = vcombine.high %v5305_v18, %v5305_v18  ;;  %v5321_v28 = vrot.slane %v5305_v18, %v10810_v10 }
 0x2c0   : > { %v5961_v24 = vrot.slane %v5953_v60, %v10810_v10  ;;  %v5968_v23 = vrot.slane %v5954_v46, %v10810_v10  ;;  %v5314_v1 = vcombine.high %v5312_v51, %v5312_v51  ;;  %v5328_v34 = vrot.slane %v5312_v51, %v10810_v10 }
 0x2c1   : > { %v5494_v49 = vcombine.low %v5486_v42, %v5493_v61  ;;  %v5335_v16 = vrot.slane %v5313_v22, %v10810_v10  ;;  %v5343_v26 = vcombine.high %v5321_v28, %v5321_v28  ;;  %v5495_v48 = vcombine.low %v5297_v15, %v5321_v28 }
 0x2c2   : > { %v5976_v55 = vcombine.low %v5961_v24, %v5968_v23  ;;  %v5342_v45 = vrot.slane %v5314_v1, %v10810_v10  ;;  %v5800_v30 = vrot.slane %v5786_v14, %v10810_v10  ;;  %v5801_v31 = vcombine.high %v5793_v9, %v5793_v9 }
 0x2c3   : > { %v5656_v57 = vadd.f32 %v5494_v49, %v11895_v25  ;;  %v5345_v17 = vcombine.high %v5335_v16, %v5335_v16  ;;  %v5496_v52 = vcombine.low %v5335_v16, %v5343_v26  ;;  %v5503_v56 = vrot.slane %v5495_v48, %v10810_v10 }
 0x2c4   : > { %v5983_v40 = vrot.slane %v5976_v55, %v10810_v10  ;;  %v9921_v37 = vcombine.high %v5328_v34, %v5342_v45  ;;  %v5802_v43 = vcombine.high %v5800_v30, %v5800_v30  ;;  %v5809_v21 = vrot.slane %v5793_v9, %v10810_v10 }
 0x2c5   : > { %v5510_v44 = vrot.slane %v5496_v52, %v10810_v10  ;;  %v5517_v58 = vrot.slane %v5345_v17, %v10810_v10  ;;  %v5816_v61 = vrot.slane %v5800_v30, %v10810_v10  ;;  %v5823_v59 = vrot.slane %v5801_v31, %v10810_v10 }
 0x2c6   : > { %v5991_v62 = vcombine.low %v5983_v40, %v5990_v47  ;;  %v5542_v25 = vrot.slane %v9921_v37, %v10810_v10  ;;  %v5830_v0 = vrot.slane %v5802_v43, %v10810_v10  ;;  %v5347_v19 = vcombine.high %v11667_v7, %v11667_v7 }
 0x2c7   : > { %v5518_v13 = vcombine.low %v5503_v56, %v5510_v44  ;;  %v5532_v4 = vrot.slane %v5517_v58, %v10810_v10  ;;  %v5992_v29 = vcombine.low %v5809_v21, %v5823_v59  ;;  %v9932_v15 = vcombine.high %v5809_v21, %v5823_v59 }
 0x2c8   : > { %v11970_v32 = vadd.f32 %v5991_v62, %v5656_v57  ;;  %v6014_v27 = vrot.slane %v5816_v61, %v10810_v10  ;;  %v5354_v63 = vrot.slane %v11667_v7, %v10810_v10  ;;  %v5361_v18 = vrot.slane %v5347_v19, %v10810_v10 }
 0x2c9   : > { %v5525_v14 = vrot.slane %v5518_v13, %v10810_v10  ;;  %v6000_v60 = vrot.slane %v5992_v29, %v10810_v10  ;;  %v6007_v46 = vrot.slane %v9932_v15, %v10810_v10  ;;  %v5833_v51 = vcombine.high %v5830_v0, %v5830_v0 }
 0x2ca   : > { %v6029_v9 = vrot.slane %v6014_v27, %v10810_v10  ;;  %v5362_v42 = vcombine.high %v5354_v63, %v5354_v63  ;;  %v5363_v47 = vcombine.high %v5361_v18, %v5361_v18  ;;  %v5370_v22 = vrot.slane %v5354_v63, %v10810_v10 }
 0x2cb   : > { %v5533_v28 = vcombine.low %v5525_v14, %v5532_v4  ;;  %v6015_v24 = vcombine.low %v6000_v60, %v6007_v46  ;;  %v5377_v23 = vrot.slane %v5361_v18, %v10810_v10  ;;  %v5834_v7 = vcombine.high %v11669_v39, %v11669_v39 }
 0x2cc   : > { %v5384_v1 = vrot.slane %v5362_v42, %v10810_v10  ;;  %v5391_v34 = vrot.slane %v5363_v47, %v10810_v10  ;;  %v5392_v49 = vcombine.high %v5370_v22, %v5370_v22  ;;  %v5841_v16 = vrot.slane %v11669_v39, %v10810_v10 }
 0x2cd   : > { %v5657_v26 = vadd.f32 %v5533_v28, %v11842_v35  ;;  %v6022_v48 = vrot.slane %v6015_v24, %v10810_v10  ;;  %v5393_v55 = vcombine.high %v5377_v23, %v5377_v23  ;;  %v5848_v45 = vrot.slane %v5834_v7, %v10810_v10 }
 0x2ce   : > { %v5535_v30 = vcombine.low %v5370_v22, %v5384_v1  ;;  %v5556_v31 = vrot.slane %v5392_v49, %v10810_v10  ;;  %v5849_v57 = vcombine.high %v5841_v16, %v5841_v16  ;;  %v5857_v17 = vrot.slane %v5841_v16, %v10810_v10 }
 0x2cf   : > { %v6030_v52 = vcombine.low %v6022_v48, %v6029_v9  ;;  %v5573_v56 = vcombine.low %v5391_v34, %v5393_v55  ;;  %v5850_v40 = vcombine.high %v5848_v45, %v5848_v45  ;;  %v5864_v37 = vrot.slane %v5848_v45, %v10810_v10 }
 0x2d0   : > { %v5549_v39 = vrot.slane %v5535_v30, %v10810_v10  ;;  %v5571_v35 = vrot.slane %v5556_v31, %v10810_v10  ;;  %v5871_v43 = vrot.slane %v5849_v57, %v10810_v10  ;;  %v5879_v21 = vcombine.high %v5857_v17, %v5857_v17 }
 0x2d1   : > { %v11997_v44 = vadd.f32 %v6030_v52, %v5657_v26  ;;  %v5581_v58 = vrot.slane %v5573_v56, %v10810_v10  ;;  %v5878_v61 = vrot.slane %v5850_v40, %v10810_v10  ;;  %v6031_v59 = vcombine.low %v5833_v51, %v5857_v17 }
 0x2d2   : > { %v5557_v62 = vcombine.low %v5542_v25, %v5549_v39  ;;  %v5881_v0 = vcombine.high %v5871_v43, %v5871_v43  ;;  %v6032_v19 = vcombine.low %v5871_v43, %v5879_v21  ;;  %v12003_v13 = vadd.f32 %v11909_v2, %v11900_v41 }
 0x2d3   : > { %v6039_v4 = vrot.slane %v6031_v59, %v10810_v10  ;;  %v9933_v29 = vcombine.high %v5864_v37, %v5878_v61  ;;  %v5394_v15 = vcombine.high %v5391_v34, %v5391_v34  ;;  %v5395_v27 = vcombine.high %v11678_v33, %v11678_v33 }
 0x2d4   : > { %v5564_v63 = vrot.slane %v5557_v62, %v10810_v10  ;;  %v6046_v18 = vrot.slane %v6032_v19, %v10810_v10  ;;  %v6053_v14 = vrot.slane %v5881_v0, %v10810_v10  ;;  %v5402_v25 = vrot.slane %v11678_v33, %v10810_v10 }
 0x2d5   : > { %v6078_v60 = vrot.slane %v9933_v29, %v10810_v10  ;;  %v5409_v41 = vrot.slane %v5395_v27, %v10810_v10  ;;  %v5883_v2 = vcombine.high %v11680_v38, %v11680_v38  ;;  %v5890_v46 = vrot.slane %v11680_v38, %v10810_v10 }
 0x2d6   : > { %v5572_v51 = vcombine.low %v5564_v63, %v5571_v35  ;;  %v6054_v9 = vcombine.low %v6039_v4, %v6046_v18  ;;  %v6068_v42 = vrot.slane %v6053_v14, %v10810_v10  ;;  %v5410_v47 = vcombine.high %v5402_v25, %v5402_v25 }
 0x2d7   : > { %v5411_v22 = vcombine.high %v5409_v41, %v5409_v41  ;;  %v5418_v28 = vrot.slane %v5402_v25, %v10810_v10  ;;  %v5425_v33 = vrot.slane %v5409_v41, %v10810_v10  ;;  %v5897_v24 = vrot.slane %v5883_v2, %v10810_v10 }
 0x2d8   : > { %v12024_v23 = vadd.f32 %v5572_v51, %v11876_v11  ;;  %v6061_v7 = vrot.slane %v6054_v9, %v10810_v10  ;;  %v5432_v1 = vrot.slane %v5410_v47, %v10810_v10  ;;  %v5898_v38 = vcombine.high %v5890_v46, %v5890_v46 }
 0x2d9   : > { %v5439_v34 = vrot.slane %v5411_v22, %v10810_v10  ;;  %v5574_v49 = vcombine.low %v5394_v15, %v5418_v28  ;;  %v5899_v16 = vcombine.high %v5897_v24, %v5897_v24  ;;  %v5906_v26 = vrot.slane %v5890_v46, %v10810_v10 }
 0x2da   : > { %v12030_v48 = vcombine.low %v6061_v7, %v6068_v42  ;;  %v5595_v55 = vrot.slane %v5432_v1, %v10810_v10  ;;  %v5913_v45 = vrot.slane %v5897_v24, %v10810_v10  ;;  %v5920_v11 = vrot.slane %v5898_v38, %v10810_v10 }
 0x2db   : > { %v5588_v30 = vrot.slane %v5574_v49, %v10810_v10  ;;  %v5612_v31 = vcombine.low %v5425_v33, %v5439_v34  ;;  %v9922_v57 = vcombine.high %v5425_v33, %v5439_v34  ;;  %v5927_v17 = vrot.slane %v5899_v16, %v10810_v10 }
 0x2dc   : > { %v5610_v52 = vrot.slane %v5595_v55, %v10810_v10  ;;  %v5928_v56 = vcombine.high %v5906_v26, %v5906_v26  ;;  %v5929_v40 = vcombine.high %v5913_v45, %v5913_v45  ;;  %v6071_v37 = vcombine.low %v5906_v26, %v5920_v11 }
 0x2dd   : > { %v5596_v39 = vcombine.low %v5581_v58, %v5588_v30  ;;  %v5620_v35 = vrot.slane %v5612_v31, %v10810_v10  ;;  %v5627_v43 = vrot.slane %v9922_v57, %v10810_v10  ;;  %v5009_v21 = vadd.f32 %v11933_v3, %v11928_v12 }
 0x2de   : > { %v6085_v61 = vrot.slane %v6071_v37, %v10810_v10  ;;  %v6092_v59 = vrot.slane %v5928_v56, %v10810_v10  ;;  %v6109_v62 = vcombine.low %v5927_v17, %v5929_v40  ;;  %v5448_v0 = vrot.slane %v11697_v6, %v10810_v10 }
 0x2df   : > { %v5603_v19 = vrot.slane %v5596_v39, %v10810_v10  ;;  %v5635_v4 = vcombine.low %v5620_v35, %v5627_v43  ;;  %v5930_v29 = vcombine.high %v5927_v17, %v5927_v17  ;;  %v5937_v58 = vrot.slane %v11699_v53, %v10810_v10 }
 0x2e0   : > { %v6093_v15 = vcombine.low %v6078_v60, %v6085_v61  ;;  %v6107_v27 = vrot.slane %v6092_v59, %v10810_v10  ;;  %v6117_v12 = vrot.slane %v6109_v62, %v10810_v10  ;;  %v5455_v3 = vrot.slane %v5448_v0, %v10810_v10 }
 0x2e1   : > { %v5611_v63 = vcombine.low %v5603_v19, %v5610_v52  ;;  %v5642_v18 = vrot.slane %v5635_v4, %v10810_v10  ;;  %v5938_v14 = vcombine.high %v5937_v58, %v5937_v58  ;;  %v5945_v6 = vrot.slane %v5937_v58, %v10810_v10 }
 0x2e2   : > { %v6100_v25 = vrot.slane %v6093_v15, %v10810_v10  ;;  %v5634_v41 = vrot.slane %v5455_v3, %v10810_v10  ;;  %v6236_v53 = vcombine.high %v11729_v8, %v11729_v8  ;;  %v6243_v60 = vrot.slane %v11729_v8, %v10810_v10 }
 0x2e3   : > { %v5659_v2 = vadd.f32 %v5611_v63, %v12003_v13  ;;  %v5952_v46 = vrot.slane %v5938_v14, %v10810_v10  ;;  %v6110_v51 = vcombine.low %v5930_v29, %v5945_v6  ;;  %v6284_v9 = vcombine.high %v11738_v36, %v11738_v36 }
 0x2e4   : > { %v6108_v42 = vcombine.low %v6100_v25, %v6107_v27  ;;  %v5649_v47 = vrot.slane %v5634_v41, %v10810_v10  ;;  %v6250_v22 = vrot.slane %v6236_v53, %v10810_v10  ;;  %v6251_v28 = vcombine.high %v6243_v60, %v6243_v60 }
 0x2e5   : > { %v6124_v33 = vrot.slane %v6110_v51, %v10810_v10  ;;  %v6131_v24 = vrot.slane %v5952_v46, %v10810_v10  ;;  %v6259_v8 = vrot.slane %v6243_v60, %v10810_v10  ;;  %v6291_v13 = vrot.slane %v11738_v36, %v10810_v10 }
 0x2e6   : > { %v12071_v7 = vadd.f32 %v6108_v42, %v5659_v2  ;;  %v5650_v1 = vcombine.low %v5642_v18, %v5649_v47  ;;  %v6252_v38 = vcombine.high %v6250_v22, %v6250_v22  ;;  %v6266_v34 = vrot.slane %v6250_v22, %v10810_v10 }
 0x2e7   : > { %v6132_v49 = vcombine.low %v6117_v12, %v6124_v33  ;;  %v6146_v16 = vrot.slane %v6131_v24, %v10810_v10  ;;  %v6273_v26 = vrot.slane %v6251_v28, %v10810_v10  ;;  %v6298_v55 = vrot.slane %v6284_v9, %v10810_v10 }
 0x2e8   : > { %v5660_v45 = vadd.f32 %v5650_v1, %v5009_v21  ;;  %v6280_v11 = vrot.slane %v6252_v38, %v10810_v10  ;;  %v6282_v30 = vcombine.high %v6266_v34, %v6266_v34  ;;  %v6299_v31 = vcombine.high %v6291_v13, %v6291_v13 }
 0x2e9   : > { %v6139_v36 = vrot.slane %v6132_v49, %v10810_v10  ;;  %v9943_v57 = vcombine.high %v6259_v8, %v6273_v26  ;;  %v6300_v17 = vcombine.high %v6298_v55, %v6298_v55  ;;  %v6307_v52 = vrot.slane %v6291_v13, %v10810_v10 }
 0x2ea   : > { %v6452_v56 = vcombine.low %v6266_v34, %v6280_v11  ;;  %v6473_v40 = vrot.slane %v6282_v30, %v10810_v10  ;;  %v6321_v37 = vrot.slane %v6299_v31, %v10810_v10  ;;  %v6314_v35 = vrot.slane %v6298_v55, %v10810_v10 }
 0x2eb   : > { %v6147_v39 = vcombine.low %v6139_v36, %v6146_v16  ;;  %v6328_v43 = vrot.slane %v6300_v17, %v10810_v10  ;;  %v6329_v21 = vcombine.high %v6307_v52, %v6307_v52  ;;  %v6459_v61 = vrot.slane %v9943_v57, %v10810_v10 }
 0x2ec   : > { %v6466_v59 = vrot.slane %v6452_v56, %v10810_v10  ;;  %v6330_v62 = vcombine.high %v6321_v37, %v6321_v37  ;;  %v12088_v0 = vadd.f32 %v12030_v48, %v12024_v23  ;;  %v6331_v29 = vcombine.high %v11758_v5, %v11758_v5 }
 0x2ed   : > { %v12090_v19 = vadd.f32 %v6147_v39, %v5660_v45  ;;  %v6490_v4 = vcombine.low %v6321_v37, %v6329_v21  ;;  %v6338_v27 = vrot.slane %v11758_v5, %v10810_v10  ;;  %v6379_v12 = vcombine.high %v11771_v20, %v11771_v20 }
 0x2ee   : > { %v6474_v58 = vcombine.low %v6459_v61, %v6466_v59  ;;  %v6491_v15 = vcombine.low %v6330_v62, %v6314_v35  ;;  %v6488_v3 = vrot.slane %v6473_v40, %v10810_v10  ;;  %v6512_v63 = vrot.slane %v6328_v43, %v10810_v10 }
 0x2ef   : > { %v6345_v23 = vrot.slane %v6331_v29, %v10810_v10  ;;  %v6386_v48 = vrot.slane %v11771_v20, %v10810_v10  ;;  %v6498_v14 = vrot.slane %v6490_v4, %v10810_v10  ;;  %v6346_v25 = vcombine.high %v6338_v27, %v6338_v27 }
 0x2f0   : > { %v6481_v18 = vrot.slane %v6474_v58, %v10810_v10  ;;  %v6505_v6 = vrot.slane %v6491_v15, %v10810_v10  ;;  %v6354_v41 = vrot.slane %v6338_v27, %v10810_v10  ;;  %v6393_v53 = vrot.slane %v6379_v12, %v10810_v10 }
 0x2f1   : > { %v6347_v5 = vcombine.high %v6345_v23, %v6345_v23  ;;  %v6394_v60 = vcombine.high %v6386_v48, %v6386_v48  ;;  %v6361_v51 = vrot.slane %v6345_v23, %v10810_v10  ;;  %v6368_v9 = vrot.slane %v6346_v25, %v10810_v10 }
 0x2f2   : > { %v6489_v2 = vcombine.low %v6481_v18, %v6488_v3  ;;  %v6513_v46 = vcombine.low %v6498_v14, %v6505_v6  ;;  %v6527_v20 = vrot.slane %v6512_v63, %v10810_v10  ;;  %v6395_v47 = vcombine.high %v6393_v53, %v6393_v53 }
 0x2f3   : > { %v6375_v42 = vrot.slane %v6347_v5, %v10810_v10  ;;  %v6402_v22 = vrot.slane %v6386_v48, %v10810_v10  ;;  %v6529_v24 = vcombine.low %v6354_v41, %v6368_v9  ;;  %v9944_v8 = vcombine.high %v6354_v41, %v6368_v9 }
 0x2f4   : > { %v6651_v28 = vadd.f32 %v6489_v2, %v11970_v32  ;;  %v6520_v33 = vrot.slane %v6513_v46, %v10810_v10  ;;  %v6416_v1 = vrot.slane %v6394_v60, %v10810_v10  ;;  %v6551_v16 = vrot.slane %v6361_v51, %v10810_v10 }
 0x2f5   : > { %v6378_v13 = vcombine.high %v6375_v42, %v6375_v42  ;;  %v6537_v49 = vrot.slane %v6529_v24, %v10810_v10  ;;  %v6544_v26 = vrot.slane %v9944_v8, %v10810_v10  ;;  %v6424_v55 = vcombine.high %v6402_v22, %v6402_v22 }
 0x2f6   : > { %v6661_v38 = vmul.f32 0.70710677, %v6651_v28  ;;  %v6528_v34 = vcombine.low %v6520_v33, %v6527_v20  ;;  %v6426_v45 = vcombine.high %v6416_v1, %v6416_v1  ;;  %v6423_v30 = vrot.slane %v6395_v47, %v10810_v10 }
 0x2f7   : > { %v6568_v11 = vcombine.low %v6378_v13, %v6402_v22  ;;  %v6434_v31 = vrot.slane %v11790_v50, %v10810_v10  ;;  %v6552_v36 = vcombine.low %v6537_v49, %v6544_v26  ;;  %v6569_v57 = vcombine.low %v6416_v1, %v6424_v55 }
 0x2f8   : > { %10609 = verf.f32 %v6661_v38  ;;  %v6652_v32 = vadd.f32 %v6528_v34, %v11997_v44  ;;  %v6566_v56 = vrot.slane %v6551_v16, %v10810_v10  ;;  %v6409_v40 = vrot.slane %v6393_v53, %v10810_v10 }
 0x2f9   : > { %v6576_v17 = vrot.slane %v6568_v11, %v10810_v10  ;;  %v6435_v37 = vcombine.high %v6434_v31, %v6434_v31  ;;  %v6559_v39 = vrot.slane %v6552_v36, %v10810_v10  ;;  %v6583_v35 = vrot.slane %v6569_v57, %v10810_v10 }
 0x2fa   : > { %v6662_v52 = vmul.f32 0.70710677, %v6652_v32  ;;  %v6590_v44 = vrot.slane %v6426_v45, %v10810_v10  ;;  %v6442_v43 = vrot.slane %v6434_v31, %v10810_v10  ;;  %v9945_v50 = vcombine.high %v6409_v40, %v6423_v30 }
 0x2fb   : > { %v6449_v21 = vrot.slane %v6435_v37, %v10810_v10  ;;  %v6567_v61 = vcombine.low %v6559_v39, %v6566_v56  ;;  %v6591_v59 = vcombine.low %v6576_v17, %v6583_v35  ;;  %v6656_v14 = vmul.f32 0.5, %v6651_v28 }
 0x2fc   : > { %10611 = verf.f32 %v6662_v52  ;;  %v6450_v62 = vcombine.high %v6442_v43, %v6442_v43  ;;  %v6605_v15 = vrot.slane %v6590_v44, %v10810_v10  ;;  %v6615_v27 = vrot.slane %v9945_v50, %v10810_v10 }
 0x2fd   : > { %v6608_v4 = vcombine.low %v6442_v43, %v6449_v21  ;;  %v6653_v29 = vadd.f32 %v6567_v61, %v12088_v0  ;;  %v6598_v58 = vrot.slane %v6591_v59, %v10810_v10  ;;  %v6657_v51 = vmul.f32 0.5, %v6652_v32 }
 0x2fe   : > { %v6629_v3 = vrot.slane %v6450_v62, %v10810_v10 }
 0x2ff   : > { %v6622_v12 = vrot.slane %v6608_v4, %v10810_v10  ;;  %v6663_v63 = vmul.f32 0.70710677, %v6653_v29  ;;  %v6606_v23 = vcombine.low %v6598_v58, %v6605_v15  ;;  %v6658_v1 = vmul.f32 0.5, %v6653_v29 }
 0x300   : > { %v6644_v5 = vrot.slane %v6629_v3, %v10810_v10 }
 0x301   : > { %v6630_v18 = vcombine.low %v6615_v27, %v6622_v12  ;;  %10613 = verf.f32 %v6663_v63  ;;  %v6654_v25 = vadd.f32 %v6606_v23, %v12071_v7 }
 0x302   : > { %v10610_v48 = vpop.eup %10609 }
 0x303   : > { %v6671_v6 = vadd.f32 1.0, %v10610_v48  ;;  %v6637_v0 = vrot.slane %v6630_v18, %v10810_v10  ;;  %v6664_v53 = vmul.f32 0.70710677, %v6654_v25  ;;  %v6659_v30 = vmul.f32 0.5, %v6654_v25 }
 0x305   : > { %v6676_v41 = vmul.f32 %v6671_v6, %v6656_v14  ;;  %v6645_v2 = vcombine.low %v6637_v0, %v6644_v5  ;;  %10615 = verf.f32 %v6664_v53 }
 0x306   : > { %v10612_v60 = vpop.eup %10611 }
 0x307   : > { %v6681_v46 = vpack.c.bf16 %v6676_v41, %v6676_v41  ;;  %v6672_v9 = vadd.f32 1.0, %v10612_v60  ;;  %v6655_v20 = vadd.f32 %v6645_v2, %v12090_v19 }
 0x309   : > { %v6700_v42 = vrot.slane %v6681_v46, %v10810_v10  ;;  %v6677_v47 = vmul.f32 %v6672_v9, %v6657_v51  ;;  %v6665_v22 = vmul.f32 0.70710677, %v6655_v20  ;;  %v6660_v61 = vmul.f32 0.5, %v6655_v20 }
 0x30b   : > { %v6701_v28 = vcombine.high %v6700_v42, %v6700_v42  ;;  %v6708_v7 = vrot.slane %v6700_v42, %v10810_v10  ;;  %v6682_v33 = vpack.c.bf16 %v6677_v47, %v6677_v47  ;;  %10617 = verf.f32 %v6665_v22  ;;  %v10614_v24 = vpop.eup %10613 }
 0x30c   : > { %v6673_v38 = vadd.f32 1.0, %v10614_v24 }
 0x30d   : > { %v6716_v8 = vcombine.high %v6708_v7, %v6708_v7  ;;  %v6723_v13 = vrot.slane %v6682_v33, %v10810_v10  ;;  %v6715_v34 = vrot.slane %v6701_v28, %v10810_v10 }
 0x30e   : > { %v6678_v16 = vmul.f32 %v6673_v38, %v6658_v1 }
 0x30f   : > { %v6724_v49 = vcombine.high %v6723_v13, %v6723_v13  ;;  %v6731_v19 = vrot.slane %v6723_v13, %v10810_v10  ;;  %v10616_v26 = vpop.eup %10615  ;;  %v6786_v52 = vcombine.low %v6708_v7, %v6715_v34 }
 0x310   : > { %v6683_v32 = vpack.c.bf16 %v6678_v16, %v6678_v16  ;;  %v6674_v31 = vadd.f32 1.0, %v10616_v26 }
 0x311   : > { %v6738_v55 = vrot.slane %v6724_v49, %v10810_v10  ;;  %v6769_v45 = vunpack.i.h.s16 %v6731_v19  ;;  %v9946_v11 = vpack.i.b16 %v6731_v19, %v6716_v8  ;;  %v6739_v36 = vcombine.high %v6731_v19, %v6731_v19 }
 0x312   : > { %v6746_v56 = vrot.slane %v6683_v32, %v10810_v10  ;;  %v6679_v40 = vmul.f32 %v6674_v31, %v6659_v30  ;;  %v6796_v62 = vrot.slane %v6786_v52, %v10810_v10  ;;  %v10563_v31 = vld [vmem:[%s12683_s5 + $0x20] sm:$0xff]  }
 0x313   : > { %v6771_v57 = vunpack.i.h.s16 %v6738_v55  ;;  %v9947_v17 = vpack.i.b16 %v6738_v55, %v6769_v45  ;;  %v7562_v21 = vcombine.low %v6731_v19, %v6738_v55 }
 0x314   : > { %v6747_v44 = vcombine.high %v6746_v56, %v6746_v56  ;;  %v6754_v43 = vrot.slane %v6746_v56, %v10810_v10  ;;  %v6684_v50 = vpack.c.bf16 %v6679_v40, %v6679_v40 }
 0x315   : > { %v9948_v37 = vpack.i.b16 %v6739_v36, %v6771_v57  ;;  %v6787_v39 = vcombine.low %v9946_v11, %v9947_v17  ;;  %v10618_v35 = vpop.eup %10617  ;;  %v7572_v6 = vrot.slane %v7562_v21, %v10810_v10  ;;  %v10566_v21 = vld [vmem:[%s12683_s5 + $0x38] sm:$0xff]  }
 0x316   : > { %v6675_v59 = vadd.f32 1.0, %v10618_v35  ;;  %v6761_v29 = vrot.slane %v6747_v44, %v10810_v10  ;;  %v7532_v58 = vrot.slane %v6684_v50, %v10810_v10  ;;  %v6762_v15 = vcombine.high %v6754_v43, %v6754_v43  ;;  %v10565_v50 = vld [vmem:[%s12683_s5 + $0x28] sm:$0xff]  }
 0x317   : > { %v6803_v4 = vrot.slane %v6787_v39, %v10810_v10  ;;  %v6788_v27 = vcombine.low %v9948_v37, %v6754_v43  ;;  %v6774_v63 = vunpack.i.h.s16 %v6754_v43  ;;  %v9974_v23 = vpack.i.b16 %v6754_v43, %v6739_v36  ;;  %v10564_v36 = vld [vmem:[%s12683_s5 + $0x30] sm:$0xff]  }
 0x318   : > { %v6680_v12 = vmul.f32 %v6675_v59, %v6660_v61  ;;  %v7533_v48 = vcombine.high %v7532_v58, %v7532_v58  ;;  %v7540_v18 = vrot.slane %v7532_v58, %v10810_v10  ;;  %v6777_v14 = vunpack.i.l.s16 %v6762_v15  ;;  %v10568_v58 = vld [vmem:[%s12683_s5 + $0x50] sm:$0xff]  }
 0x319   : > { %v6818_v3 = vcombine.low %v6796_v62, %v6803_v4  ;;  %v6810_v0 = vrot.slane %v6788_v27, %v10810_v10  ;;  %v6776_v5 = vunpack.i.h.s16 %v6761_v29  ;;  %v9975_v41 = vpack.i.b16 %v6761_v29, %v6774_v63  ;;  %v10570_v63 = vld [vmem:[%s12683_s5 + $0x58] sm:$0xff]  }
 0x31a   : > { %v6685_v25 = vpack.c.bf16 %v6680_v12, %v6680_v12  ;;  %v6789_v53 = vcombine.low %v6761_v29, %v6777_v14  ;;  %v7547_v60 = vrot.slane %v7533_v48, %v10810_v10  ;;  %v7548_v2 = vcombine.high %v7540_v18, %v7540_v18  ;;  %v10572_v48 = vld [vmem:[%s12683_s5 + $0x70] sm:$0xff]   ;;  %v10574_v14 = vld [vmem:[%s12683_s5 + $0x78] sm:$0xff]  }
 0x31b   : > { %v7550_v46 = vunpack.i.h.s16 %v7540_v18  ;;  %v9976_v9 = vpack.i.b16 %v6762_v15, %v6776_v5  ;;  %v7563_v20 = vcombine.low %v9974_v23, %v9975_v41  ;;  %v10001_v42 = vpack.i.b16 %v7540_v18, %v6762_v15  ;;  %v10571_v23 = vld [vmem:[%s12683_s5 + $0x60] sm:$0xff]   ;;  %v10578_v5 = vld [vmem:[%s12685_s7 + $0x10] sm:$0xff]   ;;  %v10579_v41 = vld [vmem:[%s12685_s7 + $0x8] sm:$0xff]  }
 0x31c   : > { %v8302_v51 = vrot.slane %v6685_v25, %v10810_v10  ;;  %v6817_v47 = vrot.slane %v6789_v53, %v10810_v10  ;;  %v7553_v22 = vunpack.i.l.s16 %v7548_v2  ;;  %v7552_v28 = vunpack.i.h.s16 %v7547_v60  ;;  %v10576_v25 = vld [vmem:[%s12683_s5 + $0x88] sm:$0xff]   ;;  %v10580_v53 = vld [vmem:[%s12685_s7 + $0x18] sm:$0xff]  }
 0x31d   : > { %v10002_v7 = vpack.i.b16 %v7547_v60, %v7550_v46  ;;  %v7564_v8 = vcombine.low %v9976_v9, %v7540_v18  ;;  %v7579_v13 = vrot.slane %v7563_v20, %v10810_v10  ;;  %v8330_v49 = vcombine.low %v6754_v43, %v6761_v29  ;;  %v10567_v29 = vld [vmem:[%s12683_s5 + $0x40] sm:$0xff]   ;;  %v10573_v18 = vld [vmem:[%s12683_s5 + $0x68] sm:$0xff]  }
 0x31e   : > { %v8303_v33 = vcombine.high %v8302_v51, %v8302_v51  ;;  %v8310_v24 = vrot.slane %v8302_v51, %v10810_v10  ;;  %v6819_v1 = vcombine.low %v6810_v0, %v6817_v47  ;;  %v7565_v38 = vcombine.low %v7547_v60, %v7553_v22  ;;  %v10577_v0 = vld [vmem:[%s12685_s7] sm:$0xff]  }
 0x31f   : > { %v10003_v34 = vpack.i.b16 %v7548_v2, %v7552_v28  ;;  %v6826_v19 = vrot.slane %v6818_v3, %v10810_v10  ;;  %v7586_v16 = vrot.slane %v7564_v8, %v10810_v10  ;;  %v7594_v26 = vcombine.low %v7572_v6, %v7579_v13  ;;  %v10569_v3 = vld [vmem:[%s12683_s5 + $0x48] sm:$0xff]   ;;  %v10575_v6 = vld [vmem:[%s12683_s5 + $0x80] sm:$0xff]  }
 0x320   : > { %v8318_v55 = vcombine.high %v8310_v24, %v8310_v24  ;;  %v6833_v45 = vrot.slane %v6819_v1, %v10810_v10  ;;  %v7593_v11 = vrot.slane %v7565_v38, %v10810_v10  ;;  %v8331_v32 = vcombine.low %v10001_v42, %v10002_v7 }
 0x321   : > { %v8332_v30 = vcombine.low %v10003_v34, %v8310_v24  ;;  %v8317_v57 = vrot.slane %v8303_v33, %v10810_v10  ;;  %v8340_v40 = vrot.slane %v8330_v49, %v10810_v10  ;;  %v7602_v35 = vrot.slane %v7594_v26, %v10810_v10 }
 0x322   : > { %v8323_v17 = vunpack.i.l.s16 %v8318_v55  ;;  %v6834_v52 = vcombine.low %v6826_v19, %v6833_v45  ;;  %v7595_v56 = vcombine.low %v7586_v16, %v7593_v11  ;;  %v8347_v37 = vrot.slane %v8331_v32, %v10810_v10 }
 0x323   : > { %v8354_v61 = vrot.slane %v8332_v30, %v10810_v10 }
 0x324   : > { %v8333_v39 = vcombine.low %v8317_v57, %v8323_v17  ;;  %10355 = vmatmul.mubr.msk.bf16.vlgmr.msra.gmra.mrb[56].mxu0 %vm1871_vm3, %v6834_v52  ;;  %10363 = vmatmul.mubr.msk.bf16.vlgmr.msra.gmra.mrb[60].mxu1 %vm1871_vm3, %v6834_v52  ;;  %v7609_v44 = vrot.slane %v7595_v56, %v10810_v10  ;;  %v8362_v43 = vcombine.low %v8340_v40, %v8347_v37 }
 0x325   : > { %10367 = vmatpush3.bf16.msra.mxu0 %v10563_v31  ;;  %10375 = vmatpush3.bf16.msra.mxu1 %v10564_v36 }
 0x326   : > { %v8361_v59 = vrot.slane %v8333_v39, %v10810_v10  ;;  %10368 = vmatprep.subr.bf16.mxu0 %v10692_v54  ;;  %10376 = vmatprep.subr.bf16.mxu1 %v10692_v54  ;;  %v7610_v62 = vcombine.low %v7602_v35, %v7609_v44  ;;  %v8370_v15 = vrot.slane %v8362_v43, %v10810_v10 }
 0x327   : > { %10370 = vmatprep.mubr.msk.bf16.mxu0 %vm10693_vm2, %v10692_v54  ;;  %10378 = vmatprep.mubr.msk.bf16.mxu1 %vm10693_vm2, %v10692_v54 }
 0x328   : > { %v8363_v4 = vcombine.low %v8354_v61, %v8361_v59 }
 0x329   : > { %10369 = vmatpush3.bf16.msra.mxu0 %v10565_v50  ;;  %10377 = vmatpush3.bf16.msra.mxu1 %v10566_v21 }
 0x32a   : > { %v8377_v27 = vrot.slane %v8363_v4, %v10810_v10  ;;  %10382 = vmatprep.subr.bf16.mxu0 %v10692_v54  ;;  %10390 = vmatprep.subr.bf16.mxu1 %v10692_v54 }
 0x32c   : > { %v8378_v12 = vcombine.low %v8370_v15, %v8377_v27  ;;  %10371 = vmatmul.mubr.msk.bf16.vlgmr.msra.gmra.mrb[60].mxu0 %vm1871_vm3, %v6834_v52  ;;  %10379 = vmatmul.mubr.msk.bf16.vlgmr.msra.gmra.mrb[64].mxu1 %vm1871_vm3, %v7610_v62 }
 0x32d   : > { %10383 = vmatpush3.bf16.msra.mxu0 %v10567_v29  ;;  %10391 = vmatpush3.bf16.msra.mxu1 %v10568_v58 }
 0x32e   : > { %10384 = vmatprep.subr.bf16.mxu0 %v10692_v54  ;;  %10392 = vmatprep.subr.bf16.mxu1 %v10692_v54 }
 0x32f   : > { %10386 = vmatprep.mubr.msk.bf16.mxu0 %vm10693_vm2, %v10692_v54  ;;  %10394 = vmatprep.mubr.msk.bf16.mxu1 %vm10693_vm2, %v10692_v54 }
 0x331   : > { %10385 = vmatpush3.bf16.msra.mxu0 %v10569_v3  ;;  %10393 = vmatpush3.bf16.msra.mxu1 %v10570_v63 }
 0x332   : > { %10398 = vmatprep.subr.bf16.mxu0 %v10692_v54  ;;  %10406 = vmatprep.subr.bf16.mxu1 %v10692_v54 }
 0x334   : > { %10387 = vmatmul.mubr.msk.bf16.vlgmr.msra.gmra.mrb[64].mxu0 %vm1871_vm3, %v7610_v62  ;;  %10395 = vmatmul.mubr.msk.bf16.vlgmr.msra.gmra.mrb[68].mxu1 %vm1871_vm3, %v7610_v62 }
 0x335   : > { %10399 = vmatpush3.bf16.msra.mxu0 %v10571_v23  ;;  %10407 = vmatpush3.bf16.msra.mxu1 %v10572_v48 }
 0x336   : > { %10400 = vmatprep.subr.bf16.mxu0 %v10692_v54  ;;  %10408 = vmatprep.subr.bf16.mxu1 %v10692_v54 }
 0x337   : > { %10402 = vmatprep.mubr.msk.bf16.mxu0 %vm10693_vm2, %v10692_v54  ;;  %10410 = vmatprep.mubr.msk.bf16.mxu1 %vm10693_vm2, %v10692_v54 }
 0x339   : > { %10401 = vmatpush3.bf16.msra.mxu0 %v10573_v18  ;;  %10409 = vmatpush3.bf16.msra.mxu1 %v10574_v14 }
 0x33a   : > { %10414 = vmatprep.subr.bf16.mxu0 %v10692_v54  ;;  %10422 = vmatprep.subr.bf16.mxu1 %v10692_v54 }
 0x33c   : > { %10403 = vmatmul.mubr.msk.bf16.vlgmr.msra.gmra.mrb[68].mxu0 %vm1871_vm3, %v8378_v12  ;;  %10411 = vmatmul.mubr.msk.bf16.vlgmr.msra.gmra.mrb[72].mxu1 %vm1871_vm3, %v8378_v12 }
 0x33d   : > { %10415 = vmatpush3.bf16.msra.mxu0 %v10575_v6  ;;  %10418 = vmatprep.mubr.msk.bf16.mxu0 %vm10693_vm2, %v10692_v54  ;;  %v9952_v6 = vld [vmem:[%s12684_s6] ss:$0 sm:$0xff] }
 0x33e   : > { %10416 = vmatprep.subr.bf16.mxu0 %v10692_v54  ;;  %10426 = vmatprep.mubr.msk.bf16.mxu1 %vm10693_vm2, %v10692_v54 }
 0x33f   : > { %10423 = vmatpush3.bf16.msra.mxu1 %v10577_v0 }
 0x340   : > { %10424 = vmatprep.subr.bf16.mxu1 %v10692_v54 }
 0x341   : > { %10417 = vmatpush3.bf16.msra.mxu0 %v10576_v25 }
 0x342   : > { %10430 = vmatprep.subr.bf16.mxu0 %v10692_v54 }
 0x343   : > { %10425 = vmatpush3.bf16.msra.mxu1 %v10579_v41 }
 0x344   : > { %10419 = vmatmul.mubr.msk.bf16.vlgmr.msra.gmra.mrb[72].mxu0 %vm1871_vm3, %v8378_v12  ;;  %10438 = vmatprep.subr.bf16.mxu1 %v10692_v54 }
 0x345   : > { %10434 = vmatprep.mubr.msk.bf16.mxu0 %vm10693_vm2, %v10692_v54  ;;  %10431 = vmatpush3.bf16.msra.mxu0 %v10578_v5 }
 0x346   : > { %10432 = vmatprep.subr.bf16.mxu0 %v10692_v54 }
 0x349   : > { %10433 = vmatpush3.bf16.msra.mxu0 %v10580_v53 }
 0x34a   : > { %10446 = vmatprep.subr.bf16.mxu0 %v10692_v54 }
 0x3f7   : > { %v6884_v60 = vpop.f32.mrb[56].mxu0  ;;  %v7112_v2 = vpop.f32.mrb[60].mxu1 }
 0x3f8   : > { %v6893_v46 = vcombine.high %v6884_v60, %v6884_v60  ;;  %v6900_v51 = vrot.slane %v6884_v60, %v10810_v10  ;;  %v7121_v9 = vcombine.high %v7112_v2, %v7112_v2  ;;  %v7128_v20 = vrot.slane %v7112_v2, %v10810_v10  ;;  %v10356_v42 = vpop.f32.mrb[57].mxu0  ;;  %v10364_v47 = vpop.f32.mrb[61].mxu1 }
 0x3f9   : > { %v6887_v22 = vpop.f32.mrb[58].mxu0  ;;  %v7115_v28 = vpop.f32.mrb[62].mxu1 }
 0x3fa   : > { %v6907_v7 = vrot.slane %v6893_v46, %v10810_v10  ;;  %v6908_v33 = vcombine.high %v6900_v51, %v6900_v51  ;;  %v6916_v24 = vrot.slane %v6900_v51, %v10810_v10  ;;  %v7135_v8 = vrot.slane %v7121_v9, %v10810_v10  ;;  %v10357_v13 = vpop.f32.mrb[59].mxu0  ;;  %v10365_v1 = vpop.f32.mrb[63].mxu1 }
 0x3fb   : > { %v7136_v38 = vcombine.high %v7128_v20, %v7128_v20  ;;  %v7144_v34 = vrot.slane %v7128_v20, %v10810_v10  ;;  %v6941_v49 = vcombine.high %v6887_v22, %v6887_v22  ;;  %v6948_v19 = vrot.slane %v6887_v22, %v10810_v10 }
 0x3fc   : > { %v6909_v16 = vcombine.high %v6907_v7, %v6907_v7  ;;  %v6923_v26 = vrot.slane %v6907_v7, %v10810_v10  ;;  %v6930_v55 = vrot.slane %v6908_v33, %v10810_v10  ;;  %v6938_v45 = vcombine.high %v6916_v24, %v6916_v24 }
 0x3fd   : > { %v7137_v11 = vcombine.high %v7135_v8, %v7135_v8  ;;  %v7151_v32 = vrot.slane %v7135_v8, %v10810_v10  ;;  %v7158_v30 = vrot.slane %v7136_v38, %v10810_v10  ;;  %v7166_v31 = vcombine.high %v7144_v34, %v7144_v34 }
 0x3fe   : > { %v6937_v36 = vrot.slane %v6909_v16, %v10810_v10  ;;  %v6939_v57 = vcombine.high %v6923_v26, %v6923_v26  ;;  %v6986_v17 = vcombine.low %v6916_v24, %v6930_v55  ;;  %v7000_v52 = vrot.slane %v6938_v45, %v10810_v10 }
 0x3ff   : > { %v7165_v56 = vrot.slane %v7137_v11, %v10810_v10  ;;  %v7168_v40 = vcombine.high %v7158_v30, %v7158_v30  ;;  %v7216_v37 = vcombine.low %v7158_v30, %v7166_v31  ;;  %v6955_v39 = vrot.slane %v6941_v49, %v10810_v10  ;;  %v7342_v35 = vpop.f32.mrb[60].mxu0  ;;  %v12288_v44 = vpop.f32.mrb[64].mxu1 }
 0x400   : > { %v6940_v43 = vcombine.high %v6937_v36, %v6937_v36  ;;  %v6993_v50 = vrot.slane %v6986_v17, %v10810_v10  ;;  %v7009_v21 = vcombine.low %v6937_v36, %v6939_v57  ;;  %v6956_v61 = vcombine.high %v6948_v19, %v6948_v19  ;;  %v10372_v59 = vpop.f32.mrb[61].mxu0  ;;  %v10380_v62 = vpop.f32.mrb[65].mxu1 }
 0x401   : > { %v7223_v4 = vrot.slane %v7216_v37, %v10810_v10  ;;  %v7230_v29 = vrot.slane %v7168_v40, %v10810_v10  ;;  %v9961_v58 = vcombine.high %v7151_v32, %v7165_v56  ;;  %v6963_v15 = vrot.slane %v6948_v19, %v10810_v10  ;;  %v12294_v27 = vpop.f32.mrb[62].mxu0  ;;  %v12296_v12 = vpop.f32.mrb[66].mxu1 }
 0x402   : > { %v7001_v3 = vcombine.low %v6993_v50, %v7000_v52  ;;  %v7016_v63 = vrot.slane %v7009_v21, %v10810_v10  ;;  %v7023_v23 = vrot.slane %v6940_v43, %v10810_v10  ;;  %v6970_v48 = vrot.slane %v6955_v39, %v10810_v10  ;;  %v10373_v18 = vpop.f32.mrb[63].mxu0  ;;  %v10381_v14 = vpop.f32.mrb[67].mxu1 }
 0x403   : > { %v7231_v25 = vcombine.low %v7223_v4, %v7230_v29  ;;  %v6977_v0 = vrot.slane %v6956_v61, %v10810_v10  ;;  %v7170_v5 = vcombine.high %v7115_v28, %v7115_v28  ;;  %v7177_v41 = vrot.slane %v7115_v28, %v10810_v10 }
 0x404   : > { %v7008_v53 = vrot.slane %v7001_v3, %v10810_v10  ;;  %v7024_v60 = vcombine.low %v7016_v63, %v7023_v23  ;;  %v7046_v2 = vrot.slane %v6970_v48, %v10810_v10  ;;  %v7246_v46 = vrot.slane %v9961_v58, %v10810_v10 }
 0x405   : > { %v7238_v51 = vrot.slane %v7231_v25, %v10810_v10  ;;  %v9953_v9 = vcombine.high %v6963_v15, %v6977_v0  ;;  %v7184_v20 = vrot.slane %v7170_v5, %v10810_v10  ;;  %v7185_v42 = vcombine.high %v7177_v41, %v7177_v41 }
 0x406   : > { %v7031_v47 = vrot.slane %v7024_v60, %v10810_v10  ;;  %v7058_v22 = vadd.f32 %v9952_v6, %v7008_v53  ;;  %v7193_v7 = vrot.slane %v7177_v41, %v10810_v10  ;;  %v7351_v33 = vcombine.high %v7342_v35, %v7342_v35 }
 0x407   : > { %v7039_v28 = vrot.slane %v9953_v9, %v10810_v10  ;;  %v7186_v24 = vcombine.high %v7184_v20, %v7184_v20  ;;  %v7200_v8 = vrot.slane %v7184_v20, %v10810_v10  ;;  %v7207_v13 = vrot.slane %v7185_v42, %v10810_v10  ;;  %v12316_v1 = vpop.f32.mrb[64].mxu0  ;;  %v12318_v38 = vpop.f32.mrb[68].mxu1 }
 0x408   : > { %v12320_v34 = vadd.f32 %v7238_v51, %v7058_v22  ;;  %v7059_v49 = vadd.f32 %v9952_v6, %v7031_v47  ;;  %v7253_v19 = vrot.slane %v7193_v7, %v10810_v10  ;;  %v7358_v16 = vrot.slane %v7342_v35, %v10810_v10  ;;  %v10388_v26 = vpop.f32.mrb[65].mxu0  ;;  %v10396_v55 = vpop.f32.mrb[69].mxu1 }
 0x409   : > { %v7047_v45 = vcombine.low %v7039_v28, %v7046_v2  ;;  %v7214_v11 = vrot.slane %v7186_v24, %v10810_v10  ;;  %v7215_v32 = vcombine.high %v7207_v13, %v7207_v13  ;;  %v7365_v30 = vrot.slane %v7351_v33, %v10810_v10  ;;  %v12326_v31 = vpop.f32.mrb[66].mxu0  ;;  %v12328_v36 = vpop.f32.mrb[70].mxu1 }
 0x40a   : > { %v7254_v57 = vcombine.low %v7246_v46, %v7253_v19  ;;  %v7366_v17 = vcombine.high %v7358_v16, %v7358_v16  ;;  %v7374_v52 = vrot.slane %v7358_v16, %v10810_v10  ;;  %v7669_v56 = vcombine.high %v12288_v44, %v12288_v44  ;;  %v10389_v40 = vpop.f32.mrb[67].mxu0  ;;  %v10397_v37 = vpop.f32.mrb[71].mxu1 }
 0x40b   : > { %v7054_v39 = vrot.slane %v7047_v45, %v10810_v10  ;;  %v7262_v35 = vcombine.low %v7215_v32, %v7200_v8  ;;  %v7276_v43 = vrot.slane %v7214_v11, %v10810_v10  ;;  %v7367_v50 = vcombine.high %v7365_v30, %v7365_v30 }
 0x40c   : > { %v7261_v21 = vrot.slane %v7254_v57, %v10810_v10  ;;  %v7381_v61 = vrot.slane %v7365_v30, %v10810_v10  ;;  %v7388_v59 = vrot.slane %v7366_v17, %v10810_v10  ;;  %v7676_v62 = vrot.slane %v12288_v44, %v10810_v10 }
 0x40d   : > { %v7060_v4 = vadd.f32 %v9952_v6, %v7054_v39  ;;  %v7269_v29 = vrot.slane %v7262_v35, %v10810_v10  ;;  %v7395_v58 = vrot.slane %v7367_v50, %v10810_v10  ;;  %v7683_v15 = vrot.slane %v7669_v56, %v10810_v10 }
 0x40e   : > { %v12343_v3 = vadd.f32 %v7261_v21, %v7059_v49  ;;  %v9969_v63 = vcombine.high %v7374_v52, %v7388_v59  ;;  %v7459_v23 = vrot.slane %v7381_v61, %v10810_v10  ;;  %v7684_v48 = vcombine.high %v7676_v62, %v7676_v62 }
 0x40f   : > { %v7277_v18 = vcombine.low %v7269_v29, %v7276_v43  ;;  %v7685_v14 = vcombine.high %v7683_v15, %v7683_v15  ;;  %v7692_v25 = vrot.slane %v7676_v62, %v10810_v10  ;;  %v7699_v0 = vrot.slane %v7683_v15, %v10810_v10  ;;  %v12348_v44 = vpop.f32.mrb[68].mxu0  ;;  %v12350_v6 = vpop.f32.mrb[72].mxu1 }
 0x410   : > { %v7452_v5 = vrot.slane %v9969_v63, %v10810_v10  ;;  %v7706_v41 = vrot.slane %v7684_v48, %v10810_v10  ;;  %v7398_v53 = vcombine.high %v7395_v58, %v7395_v58  ;;  %v7399_v60 = vcombine.high %v12294_v27, %v12294_v27  ;;  %v10404_v2 = vpop.f32.mrb[69].mxu0  ;;  %v10412_v46 = vpop.f32.mrb[73].mxu1 }
 0x411   : > { %v7284_v51 = vrot.slane %v7277_v18, %v10810_v10  ;;  %v7713_v9 = vrot.slane %v7685_v14, %v10810_v10  ;;  %v7714_v20 = vcombine.high %v7692_v25, %v7692_v25  ;;  %v7715_v42 = vcombine.high %v7699_v0, %v7699_v0  ;;  %v12358_v47 = vpop.f32.mrb[70].mxu0  ;;  %v12360_v22 = vpop.f32.mrb[74].mxu1 }
 0x412   : > { %v7460_v7 = vcombine.low %v7452_v5, %v7459_v23  ;;  %v7756_v33 = vcombine.low %v7692_v25, %v7706_v41  ;;  %v7406_v28 = vrot.slane %v12294_v27, %v10810_v10  ;;  %v7413_v24 = vrot.slane %v7399_v60, %v10810_v10  ;;  %v10405_v8 = vpop.f32.mrb[71].mxu0  ;;  %v10413_v13 = vpop.f32.mrb[75].mxu1 }
 0x413   : > { %v7290_v49 = vadd.f32 %v7284_v51, %v7060_v4  ;;  %v7716_v19 = vcombine.high %v7713_v9, %v7713_v9  ;;  %v7770_v16 = vrot.slane %v7714_v20, %v10810_v10  ;;  %v7779_v26 = vcombine.low %v7713_v9, %v7715_v42 }
 0x414   : > { %v7467_v55 = vrot.slane %v7460_v7, %v10810_v10  ;;  %v7763_v45 = vrot.slane %v7756_v33, %v10810_v10  ;;  %v7414_v11 = vcombine.high %v7406_v28, %v7406_v28  ;;  %v7415_v32 = vcombine.high %v7413_v24, %v7413_v24 }
 0x415   : > { %v7786_v30 = vrot.slane %v7779_v26, %v10810_v10  ;;  %v7793_v57 = vrot.slane %v7716_v19, %v10810_v10  ;;  %v7422_v27 = vrot.slane %v7406_v28, %v10810_v10  ;;  %v7429_v17 = vrot.slane %v7413_v24, %v10810_v10 }
 0x416   : > { %v7517_v52 = vadd.f32 %v7467_v55, %v12320_v34  ;;  %v7771_v56 = vcombine.low %v7763_v45, %v7770_v16  ;;  %v7436_v40 = vrot.slane %v7414_v11, %v10810_v10  ;;  %v7443_v37 = vrot.slane %v7415_v32, %v10810_v10 }
 0x417   : > { %v7794_v39 = vcombine.low %v7786_v30, %v7793_v57  ;;  %v7444_v35 = vcombine.high %v7429_v17, %v7429_v17  ;;  %v7468_v43 = vcombine.low %v7398_v53, %v7422_v27  ;;  %v7717_v50 = vcombine.high %v12296_v12, %v12296_v12  ;;  %v12377_v21 = vpop.f32.mrb[72].mxu0 }
 0x418   : > { %v7778_v61 = vrot.slane %v7771_v56, %v10810_v10  ;;  %v7482_v59 = vrot.slane %v7436_v40, %v10810_v10  ;;  %v7491_v62 = vcombine.low %v7429_v17, %v7443_v37  ;;  %v7724_v34 = vrot.slane %v12296_v12, %v10810_v10  ;;  %v10420_v4 = vpop.f32.mrb[73].mxu0 }
 0x419   : > { %v7801_v29 = vrot.slane %v7794_v39, %v10810_v10  ;;  %v7475_v58 = vrot.slane %v7468_v43, %v10810_v10  ;;  %v7505_v15 = vrot.slane %v7444_v35, %v10810_v10  ;;  %v7731_v63 = vrot.slane %v7717_v50, %v10810_v10  ;;  %v12387_v23 = vpop.f32.mrb[74].mxu0 }
 0x41a   : > { %v12389_v48 = vadd.f32 %v7778_v61, %v7517_v52  ;;  %v7498_v18 = vrot.slane %v7491_v62, %v10810_v10  ;;  %v7732_v14 = vcombine.high %v7724_v34, %v7724_v34  ;;  %v7739_v25 = vrot.slane %v7724_v34, %v10810_v10  ;;  %v10421_v0 = vpop.f32.mrb[75].mxu0 }
 0x41b   : > { %v7483_v12 = vcombine.low %v7475_v58, %v7482_v59  ;;  %v7746_v5 = vrot.slane %v7731_v63, %v10810_v10  ;;  %v7891_v41 = vcombine.high %v12316_v1, %v12316_v1  ;;  %v7898_v53 = vrot.slane %v12316_v1, %v10810_v10 }
 0x41c   : > { %v7506_v60 = vcombine.low %v7498_v18, %v7505_v15  ;;  %v7753_v2 = vrot.slane %v7732_v14, %v10810_v10  ;;  %v8121_v46 = vcombine.high %v12318_v38, %v12318_v38  ;;  %v8128_v51 = vrot.slane %v12318_v38, %v10810_v10 }
 0x41d   : > { %v7490_v9 = vrot.slane %v7483_v12, %v10810_v10  ;;  %v7816_v20 = vrot.slane %v7746_v5, %v10810_v10  ;;  %v7905_v42 = vrot.slane %v7891_v41, %v10810_v10  ;;  %v7906_v7 = vcombine.high %v7898_v53, %v7898_v53 }
 0x41e   : > { %v7513_v33 = vrot.slane %v7506_v60, %v10810_v10  ;;  %v9980_v28 = vcombine.high %v7739_v25, %v7753_v2  ;;  %v7914_v1 = vrot.slane %v7898_v53, %v10810_v10  ;;  %v8135_v24 = vrot.slane %v8121_v46, %v10810_v10 }
 0x41f   : > { %v7518_v8 = vadd.f32 %v7490_v9, %v12343_v3  ;;  %v7907_v13 = vcombine.high %v7905_v42, %v7905_v42  ;;  %v7921_v19 = vrot.slane %v7905_v42, %v10810_v10  ;;  %v7928_v38 = vrot.slane %v7906_v7, %v10810_v10 }
 0x420   : > { %v7519_v16 = vadd.f32 %v7513_v33, %v7290_v49  ;;  %v7809_v26 = vrot.slane %v9980_v28, %v10810_v10  ;;  %v7936_v55 = vcombine.high %v7914_v1, %v7914_v1  ;;  %v8136_v45 = vcombine.high %v8128_v51, %v8128_v51 }
 0x421   : > { %v7935_v11 = vrot.slane %v7907_v13, %v10810_v10  ;;  %v7938_v32 = vcombine.high %v7928_v38, %v7928_v38  ;;  %v8137_v30 = vcombine.high %v8135_v24, %v8135_v24  ;;  %v8144_v57 = vrot.slane %v8128_v51, %v10810_v10 }
 0x422   : > { %v7817_v27 = vcombine.low %v7809_v26, %v7816_v20  ;;  %v7986_v17 = vcombine.low %v7928_v38, %v7936_v55  ;;  %v8151_v3 = vrot.slane %v8135_v24, %v10810_v10  ;;  %v8158_v52 = vrot.slane %v8136_v45, %v10810_v10 }
 0x423   : > { %v8000_v56 = vrot.slane %v7938_v32, %v10810_v10  ;;  %v9988_v40 = vcombine.high %v7921_v19, %v7935_v11  ;;  %v8165_v49 = vrot.slane %v8137_v30, %v10810_v10  ;;  %v7829_v37 = vadd.f32 %v7801_v29, %v7518_v8 }
 0x424   : > { %v7824_v39 = vrot.slane %v7817_v27, %v10810_v10  ;;  %v7993_v35 = vrot.slane %v7986_v17, %v10810_v10  ;;  %v9996_v43 = vcombine.high %v8144_v57, %v8158_v52  ;;  %v8229_v50 = vrot.slane %v8151_v3, %v10810_v10 }
 0x425   : > { %v7940_v61 = vcombine.high %v12326_v31, %v12326_v31  ;;  %v7947_v59 = vrot.slane %v12326_v31, %v10810_v10  ;;  %v8016_v62 = vrot.slane %v9988_v40, %v10810_v10  ;;  %v8168_v34 = vcombine.high %v8165_v49, %v8165_v49 }
 0x426   : > { %v7830_v4 = vadd.f32 %v7824_v39, %v7519_v16  ;;  %v8001_v58 = vcombine.low %v7993_v35, %v8000_v56  ;;  %v8222_v29 = vrot.slane %v9996_v43, %v10810_v10  ;;  %v8169_v15 = vcombine.high %v12328_v36, %v12328_v36 }
 0x427   : > { %v7954_v63 = vrot.slane %v7940_v61, %v10810_v10  ;;  %v7955_v18 = vcombine.high %v7947_v59, %v7947_v59  ;;  %v7963_v14 = vrot.slane %v7947_v59, %v10810_v10  ;;  %v8176_v25 = vrot.slane %v12328_v36, %v10810_v10 }
 0x428   : > { %v8008_v31 = vrot.slane %v8001_v58, %v10810_v10  ;;  %v8230_v0 = vcombine.low %v8222_v29, %v8229_v50  ;;  %v8183_v12 = vrot.slane %v8169_v15, %v10810_v10  ;;  %v8437_v5 = vcombine.high %v12348_v44, %v12348_v44 }
 0x429   : > { %v7956_v41 = vcombine.high %v7954_v63, %v7954_v63  ;;  %v7970_v53 = vrot.slane %v7954_v63, %v10810_v10  ;;  %v7977_v60 = vrot.slane %v7955_v18, %v10810_v10  ;;  %v8023_v2 = vrot.slane %v7963_v14, %v10810_v10 }
 0x42a   : > { %v8058_v46 = vadd.f32 %v8008_v31, %v12389_v48  ;;  %v8237_v51 = vrot.slane %v8230_v0, %v10810_v10  ;;  %v8184_v36 = vcombine.high %v8176_v25, %v8176_v25  ;;  %v8185_v9 = vcombine.high %v8183_v12, %v8183_v12 }
 0x42b   : > { %v7984_v20 = vrot.slane %v7956_v41, %v10810_v10  ;;  %v7985_v42 = vcombine.high %v7977_v60, %v7977_v60  ;;  %v8024_v7 = vcombine.low %v8016_v62, %v8023_v2  ;;  %v8192_v33 = vrot.slane %v8176_v25, %v10810_v10 }
 0x42c   : > { %v12445_v28 = vadd.f32 %v8237_v51, %v8058_v46  ;;  %v8199_v1 = vrot.slane %v8183_v12, %v10810_v10  ;;  %v8206_v24 = vrot.slane %v8184_v36, %v10810_v10  ;;  %v8213_v8 = vrot.slane %v8185_v9, %v10810_v10 }
 0x42d   : > { %v8031_v48 = vrot.slane %v8024_v7, %v10810_v10  ;;  %v8032_v13 = vcombine.low %v7985_v42, %v7970_v53  ;;  %v8046_v19 = vrot.slane %v7984_v20, %v10810_v10  ;;  %v8238_v38 = vcombine.low %v8168_v34, %v8192_v33 }
 0x42e   : > { %v8214_v16 = vcombine.high %v8199_v1, %v8199_v1  ;;  %v8252_v26 = vrot.slane %v8206_v24, %v10810_v10  ;;  %v8261_v55 = vcombine.low %v8199_v1, %v8213_v8  ;;  %v8444_v45 = vrot.slane %v12348_v44, %v10810_v10 }
 0x42f   : > { %v8039_v11 = vrot.slane %v8032_v13, %v10810_v10  ;;  %v8059_v32 = vadd.f32 %v8031_v48, %v7829_v37  ;;  %v8245_v30 = vrot.slane %v8238_v38, %v10810_v10  ;;  %v8451_v57 = vrot.slane %v8437_v5, %v10810_v10 }
 0x430   : > { %v8268_v27 = vrot.slane %v8261_v55, %v10810_v10  ;;  %v8275_v17 = vrot.slane %v8214_v16, %v10810_v10  ;;  %v8452_v3 = vcombine.high %v8444_v45, %v8444_v45  ;;  %v8460_v52 = vrot.slane %v8444_v45, %v10810_v10 }
 0x431   : > { %v8047_v56 = vcombine.low %v8039_v11, %v8046_v19  ;;  %v8253_v40 = vcombine.low %v8245_v30, %v8252_v26  ;;  %v8453_v49 = vcombine.high %v8451_v57, %v8451_v57  ;;  %v8467_v39 = vrot.slane %v8451_v57, %v10810_v10 }
 0x432   : > { %v8276_v44 = vcombine.low %v8268_v27, %v8275_v17  ;;  %v8474_v35 = vrot.slane %v8452_v3, %v10810_v10  ;;  %v8482_v37 = vcombine.high %v8460_v52, %v8460_v52  ;;  %v8659_v43 = vcombine.high %v12350_v6, %v12350_v6 }
 0x433   : > { %v8054_v50 = vrot.slane %v8047_v56, %v10810_v10  ;;  %v8260_v61 = vrot.slane %v8253_v40, %v10810_v10  ;;  %v8481_v59 = vrot.slane %v8453_v49, %v10810_v10  ;;  %v8483_v62 = vcombine.high %v8467_v39, %v8467_v39 }
 0x434   : > { %v8283_v34 = vrot.slane %v8276_v44, %v10810_v10  ;;  %v8524_v58 = vcombine.low %v8460_v52, %v8474_v35  ;;  %v8538_v29 = vrot.slane %v8482_v37, %v10810_v10  ;;  %v8666_v15 = vrot.slane %v12350_v6, %v10810_v10 }
 0x435   : > { %v8060_v63 = vadd.f32 %v8054_v50, %v7830_v4  ;;  %v8288_v18 = vadd.f32 %v8260_v61, %v8059_v32  ;;  %v8484_v14 = vcombine.high %v8481_v59, %v8481_v59  ;;  %v8547_v25 = vcombine.low %v8481_v59, %v8483_v62 }
 0x436   : > { %v8531_v31 = vrot.slane %v8524_v58, %v10810_v10  ;;  %v8673_v0 = vrot.slane %v8659_v43, %v10810_v10  ;;  %v8674_v12 = vcombine.high %v8666_v15, %v8666_v15  ;;  %v8682_v5 = vrot.slane %v8666_v15, %v10810_v10 }
 0x437   : > { %v8554_v41 = vrot.slane %v8547_v25, %v10810_v10  ;;  %v8561_v53 = vrot.slane %v8484_v14, %v10810_v10  ;;  %v8289_v60 = vadd.f32 %v8283_v34, %v8060_v63  ;;  %v8485_v2 = vcombine.high %v12358_v47, %v12358_v47 }
 0x438   : > { %v8539_v6 = vcombine.low %v8531_v31, %v8538_v29  ;;  %v8675_v4 = vcombine.high %v8673_v0, %v8673_v0  ;;  %v8689_v46 = vrot.slane %v8673_v0, %v10810_v10  ;;  %v8696_v51 = vrot.slane %v8674_v12, %v10810_v10 }
 0x439   : > { %v8562_v36 = vcombine.low %v8554_v41, %v8561_v53  ;;  %v8704_v9 = vcombine.high %v8682_v5, %v8682_v5  ;;  %v8492_v20 = vrot.slane %v12358_v47, %v10810_v10  ;;  %v8499_v42 = vrot.slane %v8485_v2, %v10810_v10 }
 0x43a   : > { %v8546_v7 = vrot.slane %v8539_v6, %v10810_v10  ;;  %v8703_v33 = vrot.slane %v8675_v4, %v10810_v10  ;;  %v8706_v1 = vcombine.high %v8696_v51, %v8696_v51  ;;  %v8708_v24 = vcombine.high %v12360_v22, %v12360_v22 }
 0x43b   : > { %v8569_v8 = vrot.slane %v8562_v36, %v10810_v10  ;;  %v8754_v48 = vcombine.low %v8696_v51, %v8704_v9  ;;  %v8500_v13 = vcombine.high %v8492_v20, %v8492_v20  ;;  %v8507_v19 = vrot.slane %v8492_v20, %v10810_v10 }
 0x43c   : > { %v8596_v38 = vadd.f32 %v8546_v7, %v12445_v28  ;;  %v8768_v47 = vrot.slane %v8706_v1, %v10810_v10  ;;  %v10015_v16 = vcombine.high %v8689_v46, %v8703_v33  ;;  %v8514_v26 = vrot.slane %v8499_v42, %v10810_v10 }
 0x43d   : > { %v8761_v55 = vrot.slane %v8754_v48, %v10810_v10  ;;  %v8521_v45 = vrot.slane %v8500_v13, %v10810_v10  ;;  %v8597_v11 = vadd.f32 %v8569_v8, %v8288_v18  ;;  %v8715_v32 = vrot.slane %v12360_v22, %v10810_v10 }
 0x43e   : > { %v8722_v30 = vrot.slane %v8708_v24, %v10810_v10  ;;  %v8784_v57 = vrot.slane %v10015_v16, %v10810_v10  ;;  %v8889_v28 = vcombine.high %v12377_v21, %v12377_v21  ;;  %v8584_v56 = vrot.slane %v8514_v26, %v10810_v10 }
 0x43f   : > { %v8769_v27 = vcombine.low %v8761_v55, %v8768_v47  ;;  %v10007_v17 = vcombine.high %v8507_v19, %v8521_v45  ;;  %v8723_v3 = vcombine.high %v8715_v32, %v8715_v32  ;;  %v8731_v52 = vrot.slane %v8715_v32, %v10810_v10 }
 0x440   : > { %v8724_v40 = vcombine.high %v8722_v30, %v8722_v30  ;;  %v8896_v49 = vrot.slane %v12377_v21, %v10810_v10  ;;  %v8903_v22 = vrot.slane %v8889_v28, %v10810_v10  ;;  %v8738_v43 = vrot.slane %v8722_v30, %v10810_v10 }
 0x441   : > { %v8776_v39 = vrot.slane %v8769_v27, %v10810_v10  ;;  %v8577_v44 = vrot.slane %v10007_v17, %v10810_v10  ;;  %v8745_v35 = vrot.slane %v8723_v3, %v10810_v10  ;;  %v8791_v37 = vrot.slane %v8731_v52, %v10810_v10 }
 0x442   : > { %v8752_v50 = vrot.slane %v8724_v40, %v10810_v10  ;;  %v8904_v61 = vcombine.high %v8896_v49, %v8896_v49  ;;  %v8905_v59 = vcombine.high %v8903_v22, %v8903_v22  ;;  %v8912_v29 = vrot.slane %v8896_v49, %v10810_v10 }
 0x443   : > { %v8826_v62 = vadd.f32 %v8776_v39, %v8596_v38  ;;  %v8585_v34 = vcombine.low %v8577_v44, %v8584_v56  ;;  %v8753_v58 = vcombine.high %v8745_v35, %v8745_v35  ;;  %v8792_v21 = vcombine.low %v8784_v57, %v8791_v37  ;;  %v10581_v39 = vld [vmem:[%s12685_s7 + $0x20] sm:$0xff]   ;;  %v10582_v44 = vld [vmem:[%s12685_s7 + $0x30] sm:$0xff]  }
 0x444   : > { %v8919_v15 = vrot.slane %v8903_v22, %v10810_v10  ;;  %v8926_v63 = vrot.slane %v8904_v61, %v10810_v10  ;;  %v8933_v18 = vrot.slane %v8905_v59, %v10810_v10  ;;  %v8937_v0 = vcombine.high %v12387_v23, %v12387_v23  ;;  %v10583_v61 = vld [vmem:[%s12685_s7 + $0x28] sm:$0xff]   ;;  %v10584_v59 = vld [vmem:[%s12685_s7 + $0x38] sm:$0xff]  }
 0x445   : > { %v8592_v14 = vrot.slane %v8585_v34, %v10810_v10  ;;  %v8799_v25 = vrot.slane %v8792_v21, %v10810_v10  ;;  %v8800_v31 = vcombine.low %v8753_v58, %v8738_v43  ;;  %v8814_v12 = vrot.slane %v8752_v50, %v10810_v10  ;;  %v10585_v34 = vld [vmem:[%s12685_s7 + $0x40] sm:$0xff]   ;;  %v10586_v58 = vld [vmem:[%s12685_s7 + $0x50] sm:$0xff]  }
 0x446   : > { %v10023_v5 = vcombine.high %v8912_v29, %v8926_v63  ;;  %v8936_v41 = vcombine.high %v8933_v18, %v8933_v18  ;;  %v8944_v53 = vrot.slane %v12387_v23, %v10810_v10  ;;  %v8951_v46 = vrot.slane %v8937_v0, %v10810_v10  ;;  %v10587_v29 = vld [vmem:[%s12685_s7 + $0x48] sm:$0xff]   ;;  %v10589_v18 = vld [vmem:[%s12685_s7 + $0x60] sm:$0xff]  }
 0x447   : > { %v8598_v2 = vadd.f32 %v8592_v14, %v8289_v60  ;;  %v8807_v6 = vrot.slane %v8800_v31, %v10810_v10  ;;  %v8827_v4 = vadd.f32 %v8799_v25, %v8597_v11  ;;  %v8997_v36 = vrot.slane %v8919_v15, %v10810_v10  ;;  %v10588_v15 = vld [vmem:[%s12685_s7 + $0x58] sm:$0xff]   ;;  %v10590_v14 = vld [vmem:[%s12685_s7 + $0x70] sm:$0xff]   ;;  %v10591_v0 = vld [vmem:[%s12685_s7 + $0x68] sm:$0xff]  }
 0x448   : > { %v8990_v51 = vrot.slane %v10023_v5, %v10810_v10  ;;  %v8952_v9 = vcombine.high %v8944_v53, %v8944_v53  ;;  %v8960_v20 = vrot.slane %v8944_v53, %v10810_v10  ;;  %v8953_v7 = vcombine.high %v8951_v46, %v8951_v46 }
 0x449   : > { %v8815_v42 = vcombine.low %v8807_v6, %v8814_v12  ;;  %v8967_v33 = vrot.slane %v8951_v46, %v10810_v10  ;;  %v10592_v12 = vld [vmem:[%s12685_s7 + $0x78] sm:$0xff]  }
 0x44a   : > { %v8998_v1 = vcombine.low %v8990_v51, %v8997_v36  ;;  %v8974_v23 = vrot.slane %v8952_v9, %v10810_v10  ;;  %v9006_v60 = vcombine.low %v8936_v41, %v8960_v20  ;;  %v8981_v8 = vrot.slane %v8953_v7, %v10810_v10  ;;  %v10593_v41 = vld [vmem:[%s12685_s7 + $0x80] sm:$0xff]  }
 0x44b   : > { %v8822_v24 = vrot.slane %v8815_v42, %v10810_v10  ;;  %v8982_v48 = vcombine.high %v8967_v33, %v8967_v33  ;;  %v9076_v9 = vld [vmem:[%s12686_s8] sm:$0x1] }
 0x44c   : > { %v9005_v13 = vrot.slane %v8998_v1, %v10810_v10  ;;  %v9013_v19 = vrot.slane %v9006_v60, %v10810_v10  ;;  %v9020_v38 = vrot.slane %v8974_v23, %v10810_v10  ;;  %v9029_v16 = vcombine.low %v8967_v33, %v8981_v8 }
 0x44d   : > { %v8828_v47 = vadd.f32 %v8822_v24, %v8598_v2  ;;  %v9043_v11 = vrot.slane %v8982_v48, %v10810_v10  ;;  %v10594_v2 = vld [vmem:[%s12685_s7 + $0x88] sm:$0xff]  }
 0x44e   : > { %v9055_v26 = vadd.f32 %v9005_v13, %v8826_v62  ;;  %v9021_v55 = vcombine.low %v9013_v19, %v9020_v38  ;;  %v9036_v45 = vrot.slane %v9029_v16, %v10810_v10 }
 0x450   : > { %v9061_v32 = vmul.f32 0.70710677, %v9055_v26  ;;  %v9028_v30 = vrot.slane %v9021_v55, %v10810_v10  ;;  %v9044_v57 = vcombine.low %v9036_v45, %v9043_v11  ;;  %v9058_v56 = vmul.f32 0.5, %v9055_v26 }
 0x452   : > { %10619 = verf.f32 %v9061_v32  ;;  %v9056_v28 = vadd.f32 %v9028_v30, %v8827_v4  ;;  %v9051_v27 = vrot.slane %v9044_v57, %v10810_v10 }
 0x454   : > { %v9062_v17 = vmul.f32 0.70710677, %v9056_v28  ;;  %v9057_v3 = vadd.f32 %v9051_v27, %v8828_v47  ;;  %v9059_v50 = vmul.f32 0.5, %v9056_v28 }
 0x456   : > { %10621 = verf.f32 %v9062_v17  ;;  %v9063_v35 = vmul.f32 0.70710677, %v9057_v3  ;;  %v9060_v31 = vmul.f32 0.5, %v9057_v3 }
 0x458   : > { %10623 = verf.f32 %v9063_v35 }
 0x45c   : > { %v10620_v52 = vpop.eup %10619 }
 0x45d   : > { %v9067_v40 = vadd.f32 1.0, %v10620_v52 }
 0x45f   : > { %v9070_v49 = vmul.f32 %v9067_v40, %v9058_v56 }
 0x460   : > { %v10622_v22 = vpop.eup %10621 }
 0x461   : > { %v9073_v37 = vpack.c.bf16 %v9070_v49, %v9070_v49  ;;  %v9068_v43 = vadd.f32 1.0, %v10622_v22 }
 0x462   : > { %v10624_v63 = vpop.eup %10623 }
 0x463   : > { %10427 = vmatmul.mubr.msk.bf16.vlgmr.msra.gmra.mrb[76].mxu1 %vm1871_vm3, %v9073_v37  ;;  %10435 = vmatmul.mubr.msk.bf16.vlgmr.msra.gmra.mrb[76].mxu0 %vm1871_vm3, %v9073_v37  ;;  %v9071_v62 = vmul.f32 %v9068_v43, %v9059_v50  ;;  %v9069_v25 = vadd.f32 1.0, %v10624_v63 }
 0x464   : > { %10439 = vmatpush3.bf16.msra.mxu1 %v10581_v39  ;;  %10447 = vmatpush3.bf16.msra.mxu0 %v10582_v44 }
 0x465   : > { %10440 = vmatprep.subr.bf16.mxu1 %v10692_v54  ;;  %10448 = vmatprep.subr.bf16.mxu0 %v10692_v54  ;;  %v9074_v21 = vpack.c.bf16 %v9071_v62, %v9071_v62  ;;  %v9072_v5 = vmul.f32 %v9069_v25, %v9060_v31 }
 0x466   : > { %10442 = vmatprep.mubr.msk.bf16.mxu1 %vm10693_vm2, %v10692_v54  ;;  %10450 = vmatprep.mubr.msk.bf16.mxu0 %vm10693_vm2, %v10692_v54 }
 0x467   : > { %v9075_v53 = vpack.c.bf16 %v9072_v5, %v9072_v5 }
 0x468   : > { %10441 = vmatpush3.bf16.msra.mxu1 %v10583_v61  ;;  %10449 = vmatpush3.bf16.msra.mxu0 %v10584_v59 }
 0x469   : > { %10454 = vmatprep.subr.bf16.mxu1 %v10692_v54  ;;  %10462 = vmatprep.subr.bf16.mxu0 %v10692_v54 }
 0x46b   : > { %10443 = vmatmul.mubr.msk.bf16.vlgmr.msra.gmra.mrb[80].mxu1 %vm1871_vm3, %v9073_v37  ;;  %10451 = vmatmul.mubr.msk.bf16.vlgmr.msra.gmra.mrb[80].mxu0 %vm1871_vm3, %v9074_v21 }
 0x46c   : > { %10455 = vmatpush3.bf16.msra.mxu1 %v10585_v34  ;;  %10463 = vmatpush3.bf16.msra.mxu0 %v10586_v58 }
 0x46d   : > { %10456 = vmatprep.subr.bf16.mxu1 %v10692_v54  ;;  %10464 = vmatprep.subr.bf16.mxu0 %v10692_v54 }
 0x46e   : > { %10458 = vmatprep.mubr.msk.bf16.mxu1 %vm10693_vm2, %v10692_v54  ;;  %10466 = vmatprep.mubr.msk.bf16.mxu0 %vm10693_vm2, %v10692_v54 }
 0x470   : > { %10457 = vmatpush3.bf16.msra.mxu1 %v10587_v29  ;;  %10465 = vmatpush3.bf16.msra.mxu0 %v10588_v15 }
 0x471   : > { %10470 = vmatprep.subr.bf16.mxu1 %v10692_v54  ;;  %10478 = vmatprep.subr.bf16.mxu0 %v10692_v54 }
 0x473   : > { %10459 = vmatmul.mubr.msk.bf16.vlgmr.msra.gmra.mrb[84].mxu1 %vm1871_vm3, %v9074_v21  ;;  %10467 = vmatmul.mubr.msk.bf16.vlgmr.msra.gmra.mrb[84].mxu0 %vm1871_vm3, %v9074_v21 }
 0x474   : > { %10471 = vmatpush3.bf16.msra.mxu1 %v10589_v18  ;;  %10479 = vmatpush3.bf16.msra.mxu0 %v10590_v14 }
 0x475   : > { %10472 = vmatprep.subr.bf16.mxu1 %v10692_v54  ;;  %10480 = vmatprep.subr.bf16.mxu0 %v10692_v54 }
 0x476   : > { %10474 = vmatprep.mubr.msk.bf16.mxu1 %vm10693_vm2, %v10692_v54  ;;  %10482 = vmatprep.mubr.msk.bf16.mxu0 %vm10693_vm2, %v10692_v54 }
 0x478   : > { %10473 = vmatpush3.bf16.msra.mxu1 %v10591_v0  ;;  %10481 = vmatpush3.bf16.msra.mxu0 %v10592_v12 }
 0x479   : > { %10486 = vmatprep.subr.bf16.mxu1 %v10692_v54 }
 0x47b   : > { %10475 = vmatmul.mubr.msk.bf16.vlgmr.msra.gmra.mrb[88].mxu1 %vm1871_vm3, %v9075_v53  ;;  %10483 = vmatmul.mubr.msk.bf16.vlgmr.msra.gmra.mrb[88].mxu0 %vm1871_vm3, %v9075_v53 }
 0x47c   : > { %10487 = vmatpush3.bf16.msra.mxu1 %v10593_v41  ;;  %10490 = vmatprep.mubr.msk.bf16.mxu1 %vm10693_vm2, %v10692_v54 }
 0x47d   : > { %10488 = vmatprep.subr.bf16.mxu1 %v10692_v54 }
 0x480   : > { %10489 = vmatpush3.bf16.msra.mxu1 %v10594_v2 }
 0x483   : > { %10491 = vmatmul.mubr.msk.bf16.vlgmr.msra.gmra.mrb[92].mxu1 %vm1871_vm3, %v9075_v53 }
 0x536   : > { %v9130_v6 = vpop.f32.mrb[76].mxu1  ;;  %v9188_v4 = vpop.f32.mrb[76].mxu0 }
 0x537   : > { %v9201_v46 = vrot.slane %v9188_v4, %v10810_v10  ;;  %v10428_v51 = vpop.f32.mrb[77].mxu1  ;;  %v10436_v36 = vpop.f32.mrb[77].mxu0  ;;  %v9136_v23 = vadd.f32 %v9130_v6, %v9076_v9 }
 0x538   : > { %v9133_v20 = vpop.f32.mrb[78].mxu1  ;;  %v9191_v42 = vpop.f32.mrb[78].mxu0 }
 0x539   : > { %v9202_v7 = vcombine.high %v9201_v46, %v9201_v46  ;;  %v10429_v33 = vpop.f32.mrb[79].mxu1  ;;  %v10437_v1 = vpop.f32.mrb[79].mxu0 }
 0x53b   : > { %v9209_v54 = vrot.slane %v9202_v7, %v10810_v10 }
 0x53d   : > { %v9211_v60 = vadd.f32 %v9209_v54, %v9136_v23 }
 0x53e   : > { %v9263_v24 = vpop.f32.mrb[80].mxu1  ;;  %v9341_v8 = vpop.f32.mrb[80].mxu0 }
 0x53f   : > { %v9276_v48 = vrot.slane %v9263_v24, %v10810_v10  ;;  %v10444_v13 = vpop.f32.mrb[81].mxu1  ;;  %v10452_v19 = vpop.f32.mrb[81].mxu0 }
 0x540   : > { %v9266_v38 = vpop.f32.mrb[82].mxu1  ;;  %v9344_v47 = vpop.f32.mrb[82].mxu0 }
 0x541   : > { %v9283_v16 = vrot.slane %v9276_v48, %v10810_v10  ;;  %v10445_v26 = vpop.f32.mrb[83].mxu1  ;;  %v10453_v55 = vpop.f32.mrb[83].mxu0 }
 0x543   : > { %v9284_v45 = vcombine.high %v9283_v16, %v9283_v16 }
 0x545   : > { %v9286_v11 = vadd.f32 %v9284_v45, %v9211_v60 }
 0x546   : > { %v9399_v32 = vpop.f32.mrb[84].mxu1  ;;  %v9474_v30 = vpop.f32.mrb[84].mxu0 }
 0x547   : > { %v9347_v57 = vadd.f32 %v9341_v8, %v9286_v11  ;;  %v9412_v28 = vrot.slane %v9399_v32, %v10810_v10  ;;  %v9487_v27 = vrot.slane %v9474_v30, %v10810_v10  ;;  %v10460_v17 = vpop.f32.mrb[85].mxu1  ;;  %v10468_v3 = vpop.f32.mrb[85].mxu0 }
 0x548   : > { %v9402_v52 = vpop.f32.mrb[86].mxu1  ;;  %v9477_v56 = vpop.f32.mrb[86].mxu0 }
 0x549   : > { %v9413_v40 = vcombine.high %v9412_v28, %v9412_v28  ;;  %v9494_v49 = vrot.slane %v9487_v27, %v10810_v10  ;;  %v10461_v22 = vpop.f32.mrb[87].mxu1  ;;  %v10469_v39 = vpop.f32.mrb[87].mxu0 }
 0x54b   : > { %v9420_v44 = vrot.slane %v9413_v40, %v10810_v10  ;;  %v9495_v35 = vcombine.high %v9494_v49, %v9494_v49 }
 0x54d   : > { %v9422_v37 = vadd.f32 %v9420_v44, %v9347_v57 }
 0x54e   : > { %v9552_v43 = vpop.f32.mrb[88].mxu1  ;;  %v9610_v50 = vpop.f32.mrb[88].mxu0 }
 0x54f   : > { %v9497_v61 = vadd.f32 %v9495_v35, %v9422_v37  ;;  %v9623_v59 = vrot.slane %v9610_v50, %v10810_v10  ;;  %v10476_v62 = vpop.f32.mrb[89].mxu1  ;;  %v10484_v34 = vpop.f32.mrb[89].mxu0 }
 0x550   : > { %v9555_v58 = vpop.f32.mrb[90].mxu1  ;;  %v9613_v21 = vpop.f32.mrb[90].mxu0 }
 0x551   : > { %v9558_v29 = vadd.f32 %v9552_v43, %v9497_v61  ;;  %v9624_v15 = vcombine.high %v9623_v59, %v9623_v59  ;;  %v10477_v63 = vpop.f32.mrb[91].mxu1  ;;  %v10485_v18 = vpop.f32.mrb[91].mxu0 }
 0x553   : > { %v9631_v14 = vrot.slane %v9624_v15, %v10810_v10 }
 0x555   : > { %v9633_v25 = vadd.f32 %v9631_v14, %v9558_v29 }
 0x556   : > { %v9685_v31 = vpop.f32.mrb[92].mxu1 }
 0x557   : > { %v9698_v0 = vrot.slane %v9685_v31, %v10810_v10  ;;  %v10492_v12 = vpop.f32.mrb[93].mxu1 }
 0x558   : > { %v9688_v5 = vpop.f32.mrb[94].mxu1 }
 0x559   : > { %v9705_v41 = vrot.slane %v9698_v0, %v10810_v10  ;;  %v10493_v53 = vpop.f32.mrb[95].mxu1 }
 0x55b   : > { %v9706_v2 = vcombine.high %v9705_v41, %v9705_v41 }
 0x55d   : > { %v9708_v6 = vadd.f32 %v9706_v2, %v9633_v25 }
 0x55f   : > { %v9710_v4 = vmul.f32 0.70710677, %v9708_v6  ;;  %v9709_v51 = vmul.f32 0.5, %v9708_v6 }
 0x561   : > { %10625 = verf.f32 %v9710_v4 }
 0x56b   : > { %v10626_v46 = vpop.eup %10625 }
 0x56c   : > { %v9712_v36 = vadd.f32 1.0, %v10626_v46 }
 0x56e   : > { %v9713_v9 = vmul.f32 %v9712_v36, %v9709_v51 }
 0x570   : > { %v9714_v20 = vpack.c.bf16 %v9713_v9, %v9713_v9 }
 0x572   : > { %v9715_v42 = vunpack.c.l.bf16 %v9714_v20 }
 0x574   : > { %9717 = vst.msk [vmem:[%s324_s14] sm:$0x1] %vm9716_vm4, %v9715_v42 }
 0x575   : > { %10640 = shalt.err (!%p10637_p3)
}
 0x576   : > { %s10641_s27 = scalar_lea.hbm %s12636_s22, 16  ;;  %s10645_s14 = scalar_lea.hbm %s12687_s9, 32 }
 0x577   : > { %p10642_p4 = scmp.ne.s32.totalorder %s12636_s22, %s10641_s27  ;;  %p10646_p9 = scmp.lt.u32.totalorder %s12636_s22, %s12687_s9 }
 0x578   : > { %p10647_p10 = scmp.lt.u32.totalorder %s10645_s14, %s10641_s27  ;;  %p10649_p12 = scmp.lt.u32.totalorder %s10641_s27, %s12636_s22 }
 0x579   : > { %p10643_p7 = pnand %p10642_p4, %p10783_p5 }
 0x57a   : > { %p10648_p11 = por %p10647_p10, %p10646_p9 }
 0x57b   : > { %p10644_p8 = pneg %p10643_p7 }
 0x57c   : > { %p10650_p13 = por %p10649_p12, %p10648_p11 }
 0x57e   : > { %p10651_p0 = pnand %p10650_p13, %p10644_p8 }
 0x580   : > { %10654 = shalt.err (!%p10651_p0)
}
 0x581   : > { %10496 = dma.vmem_to_hbm [thread:$0]  (%p10783_p5), %s12638_s16, 16, %s12636_s22, %s9719_s23  }
 0x582 PF: > { %p10502_p1 = scmp.ge.s32.totalorder %s10689_s12, 2  ;;  %s9743_s24 = sand.u32 1, %s10677_s30  }
 0x583   : > { %s9744_s13 = scalar_lea.sflag [#allocation3], %s9743_s24 }
 0x584   : > { %p10499_p2 = pnand %p10502_p1, %p10787_p6 }
 0x586   : > { %10672 = dma.done.wait (!%p10499_p2), %s9744_s13, 16  }
 0x587   : > { %10674 = vsyncadd (!%p10499_p2), %s9744_s13, 4294967280  ;;  %p19_p3 = scmp.ge.s32.totalorder %s10770_s15, 4   ;;  %s12690_s30 = smov %s10681_s10 }
 0x588   : > { %s12691_s10 = smov %s10685_s11  ;;  %s12692_s11 = smov %s10781_s18 }
 0x589   : > { %s12693_s12 = smov %s10770_s15  ;;  %21 = sbr.rel (!%p19_p3) target bundleno = 3 (0x3), region = 115 }
 0x590   :  { %9748 = vsyncpa [#allocation3], 1 }
 0x591   :  { %9750 = vsyncpa [#allocation3 + $0x1], 1 }

</bundles_post_ra>
